<compile_context>
chip_gen: v7x
topology: tpu7x:2x2x1
jax: 0.10.0
libtpu: 0.0.40
codegen_flags: <defaults>
</compile_context>

<pallas_src>
import functools

import numpy as np
import jax
import jax.numpy as jnp
from jax import lax
from jax.experimental import pallas as pl
from jax.experimental.pallas import tpu as pltpu

LANE = 128


def _round_up(x, m):
    return (x + m - 1) // m * m


def _make_boundary_masks(H, W):
    """Static (9, HW, 1) f32 masks: mask[k, r] == 1 iff 3x3 tap k=(dy+1)*3+(dx+1)
    applied at flattened row r = h*W + w stays inside the HxW image."""
    HW = H * W
    hh, ww = np.divmod(np.arange(HW), W)
    m = np.empty((9, HW, 1), np.float32)
    for k in range(9):
        dy, dx = k // 3 - 1, k % 3 - 1
        valid = ((hh + dy >= 0) & (hh + dy < H) & (ww + dx >= 0) & (ww + dx < W))
        m[k, :, 0] = valid.astype(np.float32)
    return m


def _make_kernel(H, W):
    """Fused conv1x1+bn+relu -> conv3x3+bn+relu -> conv1x1+bn -> +identity -> relu."""
    HW = H * W

    def kernel(x_ref, mask_ref, w1_ref, b1_ref, w2_ref, b2_ref, w3_ref, b3_ref, o_ref):
        # ---- conv1 (1x1; BN scale folded into w1) + bias + ReLU --------------------
        t1 = jnp.dot(x_ref[...], w1_ref[...],                     # bf16 x bf16 -> f32
                     preferred_element_type=jnp.float32)
        t1 = jnp.maximum(t1 + b1_ref[...], 0.0)                   # (HW, p_p) f32

        # ---- conv2 (3x3, stride 1, pad 1): 9 rolled/masked taps, ONE MXU matmul ----
        taps = []
        for k in range(9):                                        # static unroll over taps
            dy, dx = k // 3 - 1, k % 3 - 1
            s = dy * W + dx                                       # flattened source offset
            if s == 0:
                src = t1
            else:
                # shifted[i] = t1[(i + s) mod HW]; wrapped / out-of-image rows zeroed
                # by the precomputed boundary mask (broadcast over channels).
                src = pltpu.roll(t1, shift=(-s) % HW, axis=0) * mask_ref[k]
            taps.append(src.astype(jnp.bfloat16))
        lhs = jnp.concatenate(taps, axis=1)                       # (HW, 9*p_p) bf16
        t2 = jnp.dot(lhs, w2_ref[...],                            # K-accumulation in MXU
                     preferred_element_type=jnp.float32)
        t2 = jnp.maximum(t2 + b2_ref[...], 0.0)                   # (HW, p_p) f32

        # ---- conv3 (1x1) + bias, identity residual, final ReLU ---------------------
        t3 = jnp.dot(t2.astype(jnp.bfloat16), w3_ref[...],
                     preferred_element_type=jnp.float32)
        res = x_ref[...].astype(jnp.float32)                      # re-read resident tile
        o_ref[...] = jnp.maximum(t3 + b3_ref[...] + res, 0.0).astype(o_ref.dtype)

    return kernel


@functools.partial(jax.jit, static_argnames=("cout",))
def res_bottleneck_forward(x_nhwc, params, *, cout):
    """x_nhwc: (N, H, W, Cin) -> (N, H, W, cout) bfloat16 (f32 math inside the kernel)."""
    N, H, W, Cin = x_nhwc.shape
    HW = H * W
    cin_p, p_p = params["w1"].shape
    cout_p = params["w3"].shape[1]
    # Identity residual (downsample=None) requires matching channel counts.
    assert Cin == cout and cin_p == cout_p, \
        "identity residual requires inplanes == planes * expansion"
    # Sublane constraint for the (HW, C) bf16 activation blocks.
    # TODO(synk): pad/mask rows for stages whose H*W is not a multiple of 16 (7x7, 14x14).
    assert HW % 16 == 0

    x2d = x_nhwc.reshape(N * HW, Cin).astype(jnp.bfloat16)        # stream activations bf16
    x2d = jnp.pad(x2d, ((0, 0), (0, cin_p - Cin)))                # lane-pad channels
    masks = jnp.asarray(_make_boundary_masks(H, W))               # (9, HW, 1) f32 constant

    out2d = pl.pallas_call(
        _make_kernel(H, W),
        out_shape=jax.ShapeDtypeStruct((N * HW, cout_p), jnp.bfloat16),
        grid=(N,),                                                # one image per grid step
        in_specs=[
            pl.BlockSpec((HW, cin_p), lambda n: (n, 0)),          # x tile (double-buffered)
            pl.BlockSpec((9, HW, 1), lambda n: (0, 0, 0)),        # boundary masks (resident)
            pl.BlockSpec((cin_p, p_p), lambda n: (0, 0)),         # w1   (VMEM-resident)
            pl.BlockSpec((1, p_p), lambda n: (0, 0)),             # b1
            pl.BlockSpec((9 * p_p, p_p), lambda n: (0, 0)),       # w2 (K-concat layout)
            pl.BlockSpec((1, p_p), lambda n: (0, 0)),             # b2
            pl.BlockSpec((p_p, cout_p), lambda n: (0, 0)),        # w3
            pl.BlockSpec((1, cout_p), lambda n: (0, 0)),          # b3
        ],
        out_specs=pl.BlockSpec((HW, cout_p), lambda n: (n, 0)),
        compiler_params=pltpu.CompilerParams(
            dimension_semantics=("parallel",),                    # megacore-shard the batch
            vmem_limit_bytes=48 * 1024 * 1024),                   # <= v7x 64 MiB physical
    )(x2d, masks, params["w1"], params["b1"], params["w2"], params["b2"],
      params["w3"], params["b3"])

    # TODO(synk): when stacking blocks, keep the padded (N*HW, Cpad) layout between blocks
    # instead of slicing here and re-padding the next block's input.
    return out2d[:, :cout].reshape(N, H, W, cout)


def make_raw_params(key, inplanes, planes, expansion=4, eps=1e-5):
    """Deterministic synthetic params matching nn.Conv2d / nn.BatchNorm2d (eval mode)."""
    ks = jax.random.split(key, 15)
    P, C4 = planes, planes * expansion

    def bn_fold(kg, kb, km, kv, c):
        gamma = jax.random.uniform(kg, (c,), jnp.float32, 0.5, 1.5)
        beta = 0.1 * jax.random.normal(kb, (c,), jnp.float32)
        mean = 0.1 * jax.random.normal(km, (c,), jnp.float32)
        var = jax.random.uniform(kv, (c,), jnp.float32, 0.5, 1.5)
        scale = gamma * lax.rsqrt(var + eps)
        return scale, beta - mean * scale

    # PyTorch layouts: conv1 (P, Cin, 1, 1), conv2 (P, P, 3, 3), conv3 (4P, P, 1, 1).
    w1 = 0.2 * jax.random.normal(ks[0], (P, inplanes), jnp.float32)
    w2 = 0.2 * jax.random.normal(ks[1], (P, P, 3, 3), jnp.float32)
    w3 = 0.2 * jax.random.normal(ks[2], (C4, P), jnp.float32)
    s1, b1 = bn_fold(ks[3], ks[4], ks[5], ks[6], P)
    s2, b2 = bn_fold(ks[7], ks[8], ks[9], ks[10], P)
    s3, b3 = bn_fold(ks[11], ks[12], ks[13], ks[14], C4)
    return dict(w1=w1, w2=w2, w3=w3, s1=s1, b1=b1, s2=s2, b2=b2, s3=s3, b3=b3)


def prepare_kernel_params(rp, inplanes, planes, expansion=4):
    """Fold BN scale into conv weights, pad channels to 128, cast MXU operands to bf16.
    conv2 weights are laid out tap-major and reshaped to (9*p_p, p_p) for the K-concat."""
    P, C4 = planes, planes * expansion
    cin_p = _round_up(inplanes, LANE)
    p_p = _round_up(P, LANE)
    cout_p = _round_up(C4, LANE)

    w1_eff = rp["w1"].T * rp["s1"][None, :]                                   # (Cin, P)
    w2_eff = (jnp.transpose(rp["w2"], (2, 3, 1, 0)).reshape(9, P, P)          # tap-major
              * rp["s2"][None, None, :])                                      # (9, P, P)
    w3_eff = rp["w3"].T * rp["s3"][None, :]                                   # (P, 4P)

    pad2 = lambda a, r, c: jnp.pad(a, ((0, r - a.shape[0]), (0, c - a.shape[1])))
    w2_pad = jnp.pad(w2_eff, ((0, 0), (0, p_p - P), (0, p_p - P)))            # (9, p_p, p_p)
    return dict(
        w1=pad2(w1_eff, cin_p, p_p).astype(jnp.bfloat16),
        w2=w2_pad.reshape(9 * p_p, p_p).astype(jnp.bfloat16),                 # K-concat slab
        w3=pad2(w3_eff, p_p, cout_p).astype(jnp.bfloat16),
        b1=jnp.pad(rp["b1"], (0, p_p - P)).reshape(1, p_p),                   # biases stay f32
        b2=jnp.pad(rp["b2"], (0, p_p - P)).reshape(1, p_p),
        b3=jnp.pad(rp["b3"], (0, cout_p - C4)).reshape(1, cout_p),
    )


def reference_forward(x_nhwc, rp):
    """Pure-JAX NHWC reference of the PyTorch forward (eval-mode BN), all f32."""
    dn = ("NHWC", "HWIO", "NHWC")
    hi = lax.Precision.HIGHEST
    cvec = lambda v: v.reshape(1, 1, 1, -1)
    w1 = rp["w1"].T[None, None]                     # (1, 1, Cin, P)
    w2 = jnp.transpose(rp["w2"], (2, 3, 1, 0))      # (3, 3, P, P)
    w3 = rp["w3"].T[None, None]                     # (1, 1, P, 4P)
    y = lax.conv_general_dilated(x_nhwc, w1, (1, 1), "VALID",
                                 dimension_numbers=dn, precision=hi)
    y = jnp.maximum(y * cvec(rp["s1"]) + cvec(rp["b1"]), 0.0)
    y = lax.conv_general_dilated(y, w2, (1, 1), ((1, 1), (1, 1)),
                                 dimension_numbers=dn, precision=hi)
    y = jnp.maximum(y * cvec(rp["s2"]) + cvec(rp["b2"]), 0.0)
    y = lax.conv_general_dilated(y, w3, (1, 1), "VALID",
                                 dimension_numbers=dn, precision=hi)
    y = y * cvec(rp["s3"]) + cvec(rp["b3"])
    return jnp.maximum(y + x_nhwc, 0.0)


if __name__ == "__main__":
    key = jax.random.PRNGKey(0)
    N, H, W = 2, 16, 16
    planes, expansion = 4, 4
    inplanes = planes * expansion                   # identity residual (downsample is None)

    k_x, k_p = jax.random.split(key)
    x = jax.random.normal(k_x, (N, H, W, inplanes), jnp.float32)   # NHWC end-to-end
    raw = make_raw_params(k_p, inplanes, planes, expansion)
    kparams = prepare_kernel_params(raw, inplanes, planes, expansion)

    out = res_bottleneck_forward(x, kparams, cout=planes * expansion)
    out = jax.block_until_ready(out)

    ref = reference_forward(x, raw)
    assert out.shape == (N, H, W, planes * expansion)
    np.testing.assert_allclose(np.asarray(out.astype(jnp.float32)), np.asarray(ref),
                               atol=5e-2, rtol=5e-2)
    print("KERNEL_OK")
</pallas_src>

<mosaic_0001>
module attributes {stable_mosaic.version = 11 : i64} {
  func.func @kernel(%arg0: i32, %arg1: memref<256x128xbf16, #tpu.memory_space<vmem>>, %arg2: memref<9x256x1xf32, #tpu.memory_space<vmem>>, %arg3: memref<128x128xbf16, #tpu.memory_space<vmem>>, %arg4: memref<1x128xf32, #tpu.memory_space<vmem>>, %arg5: memref<1152x128xbf16, #tpu.memory_space<vmem>>, %arg6: memref<1x128xf32, #tpu.memory_space<vmem>>, %arg7: memref<128x128xbf16, #tpu.memory_space<vmem>>, %arg8: memref<1x128xf32, #tpu.memory_space<vmem>>, %arg9: memref<256x128xbf16, #tpu.memory_space<vmem>>) attributes {dimension_semantics = [#tpu.dimension_semantics<parallel>], iteration_bounds = array<i64: 2>, scalar_prefetch = 0 : i64, scratch_operands = 0 : i64, tpu.core_type = #tpu.core_type<tc>, window_params = [{transform_indices = @transform_0, window_bounds = array<i64: 256, 128>}, {pipeline_mode = #tpu.pipeline_mode<synchronous>, transform_indices = @transform_1, window_bounds = array<i64: 9, 256, 1>}, {pipeline_mode = #tpu.pipeline_mode<synchronous>, transform_indices = @transform_2, window_bounds = array<i64: 128, 128>}, {pipeline_mode = #tpu.pipeline_mode<synchronous>, transform_indices = @transform_3, window_bounds = array<i64: 1, 128>}, {pipeline_mode = #tpu.pipeline_mode<synchronous>, transform_indices = @transform_4, window_bounds = array<i64: 1152, 128>}, {pipeline_mode = #tpu.pipeline_mode<synchronous>, transform_indices = @transform_5, window_bounds = array<i64: 1, 128>}, {pipeline_mode = #tpu.pipeline_mode<synchronous>, transform_indices = @transform_6, window_bounds = array<i64: 128, 128>}, {pipeline_mode = #tpu.pipeline_mode<synchronous>, transform_indices = @transform_7, window_bounds = array<i64: 1, 128>}, {transform_indices = @transform_8, window_bounds = array<i64: 256, 128>}]} {
    %c0 = arith.constant 0 : index
    %c0_0 = arith.constant 0 : index
    %0 = vector.load %arg1[%c0, %c0_0] : memref<256x128xbf16, #tpu.memory_space<vmem>>, vector<256x128xbf16>
    %c0_1 = arith.constant 0 : index
    %c0_2 = arith.constant 0 : index
    %1 = vector.load %arg3[%c0_1, %c0_2] : memref<128x128xbf16, #tpu.memory_space<vmem>>, vector<128x128xbf16>
    %cst = arith.constant dense<0.000000e+00> : vector<256x128xf32>
    %2 = tpu.matmul %0, %1, %cst {dimension_numbers = #tpu.dot_dimension_numbers<[1], [0], [0], [1], [0, 0, 1, 1], [], []>} : vector<256x128xbf16>, vector<128x128xbf16>, vector<256x128xf32> -> vector<256x128xf32>
    %c0_3 = arith.constant 0 : index
    %c0_4 = arith.constant 0 : index
    %3 = vector.load %arg4[%c0_3, %c0_4] : memref<1x128xf32, #tpu.memory_space<vmem>>, vector<1x128xf32>
    %4 = vector.broadcast %3 : vector<1x128xf32> to vector<256x128xf32>
    %5 = arith.addf %2, %4 : vector<256x128xf32>
    %cst_5 = arith.constant 0.000000e+00 : f32
    %6 = vector.broadcast %cst_5 : f32 to vector<256x128xf32>
    %7 = arith.maximumf %5, %6 : vector<256x128xf32>
    %c17_i32 = arith.constant 17 : i32
    %8 = tpu.dynamic_rotate %7 by %c17_i32 dim 0 : vector<256x128xf32>, i32 -> vector<256x128xf32>
    %c0_6 = arith.constant 0 : index
    %c0_7 = arith.constant 0 : index
    %c0_8 = arith.constant 0 : index
    %9 = vector.load %arg2[%c0_6, %c0_7, %c0_8] : memref<9x256x1xf32, #tpu.memory_space<vmem>>, vector<1x256x1xf32>
    %10 = vector.shape_cast %9 : vector<1x256x1xf32> to vector<256x1xf32>
    %11 = vector.broadcast %10 : vector<256x1xf32> to vector<256x128xf32>
    %12 = arith.mulf %8, %11 : vector<256x128xf32>
    %13 = arith.truncf %12 : vector<256x128xf32> to vector<256x128xbf16>
    %c16_i32 = arith.constant 16 : i32
    %14 = tpu.dynamic_rotate %7 by %c16_i32 dim 0 : vector<256x128xf32>, i32 -> vector<256x128xf32>
    %c1 = arith.constant 1 : index
    %c0_9 = arith.constant 0 : index
    %c0_10 = arith.constant 0 : index
    %15 = vector.load %arg2[%c1, %c0_9, %c0_10] : memref<9x256x1xf32, #tpu.memory_space<vmem>>, vector<1x256x1xf32>
    %16 = vector.shape_cast %15 : vector<1x256x1xf32> to vector<256x1xf32>
    %17 = vector.broadcast %16 : vector<256x1xf32> to vector<256x128xf32>
    %18 = arith.mulf %14, %17 : vector<256x128xf32>
    %19 = arith.truncf %18 : vector<256x128xf32> to vector<256x128xbf16>
    %c15_i32 = arith.constant 15 : i32
    %20 = tpu.dynamic_rotate %7 by %c15_i32 dim 0 : vector<256x128xf32>, i32 -> vector<256x128xf32>
    %c2 = arith.constant 2 : index
    %c0_11 = arith.constant 0 : index
    %c0_12 = arith.constant 0 : index
    %21 = vector.load %arg2[%c2, %c0_11, %c0_12] : memref<9x256x1xf32, #tpu.memory_space<vmem>>, vector<1x256x1xf32>
    %22 = vector.shape_cast %21 : vector<1x256x1xf32> to vector<256x1xf32>
    %23 = vector.broadcast %22 : vector<256x1xf32> to vector<256x128xf32>
    %24 = arith.mulf %20, %23 : vector<256x128xf32>
    %25 = arith.truncf %24 : vector<256x128xf32> to vector<256x128xbf16>
    %c1_i32 = arith.constant 1 : i32
    %26 = tpu.dynamic_rotate %7 by %c1_i32 dim 0 : vector<256x128xf32>, i32 -> vector<256x128xf32>
    %c3 = arith.constant 3 : index
    %c0_13 = arith.constant 0 : index
    %c0_14 = arith.constant 0 : index
    %27 = vector.load %arg2[%c3, %c0_13, %c0_14] : memref<9x256x1xf32, #tpu.memory_space<vmem>>, vector<1x256x1xf32>
    %28 = vector.shape_cast %27 : vector<1x256x1xf32> to vector<256x1xf32>
    %29 = vector.broadcast %28 : vector<256x1xf32> to vector<256x128xf32>
    %30 = arith.mulf %26, %29 : vector<256x128xf32>
    %31 = arith.truncf %30 : vector<256x128xf32> to vector<256x128xbf16>
    %32 = arith.truncf %7 : vector<256x128xf32> to vector<256x128xbf16>
    %c255_i32 = arith.constant 255 : i32
    %33 = tpu.dynamic_rotate %7 by %c255_i32 dim 0 : vector<256x128xf32>, i32 -> vector<256x128xf32>
    %c5 = arith.constant 5 : index
    %c0_15 = arith.constant 0 : index
    %c0_16 = arith.constant 0 : index
    %34 = vector.load %arg2[%c5, %c0_15, %c0_16] : memref<9x256x1xf32, #tpu.memory_space<vmem>>, vector<1x256x1xf32>
    %35 = vector.shape_cast %34 : vector<1x256x1xf32> to vector<256x1xf32>
    %36 = vector.broadcast %35 : vector<256x1xf32> to vector<256x128xf32>
    %37 = arith.mulf %33, %36 : vector<256x128xf32>
    %38 = arith.truncf %37 : vector<256x128xf32> to vector<256x128xbf16>
    %c241_i32 = arith.constant 241 : i32
    %39 = tpu.dynamic_rotate %7 by %c241_i32 dim 0 : vector<256x128xf32>, i32 -> vector<256x128xf32>
    %c6 = arith.constant 6 : index
    %c0_17 = arith.constant 0 : index
    %c0_18 = arith.constant 0 : index
    %40 = vector.load %arg2[%c6, %c0_17, %c0_18] : memref<9x256x1xf32, #tpu.memory_space<vmem>>, vector<1x256x1xf32>
    %41 = vector.shape_cast %40 : vector<1x256x1xf32> to vector<256x1xf32>
    %42 = vector.broadcast %41 : vector<256x1xf32> to vector<256x128xf32>
    %43 = arith.mulf %39, %42 : vector<256x128xf32>
    %44 = arith.truncf %43 : vector<256x128xf32> to vector<256x128xbf16>
    %c240_i32 = arith.constant 240 : i32
    %45 = tpu.dynamic_rotate %7 by %c240_i32 dim 0 : vector<256x128xf32>, i32 -> vector<256x128xf32>
    %c7 = arith.constant 7 : index
    %c0_19 = arith.constant 0 : index
    %c0_20 = arith.constant 0 : index
    %46 = vector.load %arg2[%c7, %c0_19, %c0_20] : memref<9x256x1xf32, #tpu.memory_space<vmem>>, vector<1x256x1xf32>
    %47 = vector.shape_cast %46 : vector<1x256x1xf32> to vector<256x1xf32>
    %48 = vector.broadcast %47 : vector<256x1xf32> to vector<256x128xf32>
    %49 = arith.mulf %45, %48 : vector<256x128xf32>
    %50 = arith.truncf %49 : vector<256x128xf32> to vector<256x128xbf16>
    %c239_i32 = arith.constant 239 : i32
    %51 = tpu.dynamic_rotate %7 by %c239_i32 dim 0 : vector<256x128xf32>, i32 -> vector<256x128xf32>
    %c8 = arith.constant 8 : index
    %c0_21 = arith.constant 0 : index
    %c0_22 = arith.constant 0 : index
    %52 = vector.load %arg2[%c8, %c0_21, %c0_22] : memref<9x256x1xf32, #tpu.memory_space<vmem>>, vector<1x256x1xf32>
    %53 = vector.shape_cast %52 : vector<1x256x1xf32> to vector<256x1xf32>
    %54 = vector.broadcast %53 : vector<256x1xf32> to vector<256x128xf32>
    %55 = arith.mulf %51, %54 : vector<256x128xf32>
    %56 = arith.truncf %55 : vector<256x128xf32> to vector<256x128xbf16>
    %57 = tpu.concatenate %13, %19, %25, %31, %32, %38, %44, %50, %56 in 1 : vector<256x128xbf16>, vector<256x128xbf16>, vector<256x128xbf16>, vector<256x128xbf16>, vector<256x128xbf16>, vector<256x128xbf16>, vector<256x128xbf16>, vector<256x128xbf16>, vector<256x128xbf16> -> vector<256x1152xbf16>
    %c0_23 = arith.constant 0 : index
    %c0_24 = arith.constant 0 : index
    %58 = vector.load %arg5[%c0_23, %c0_24] : memref<1152x128xbf16, #tpu.memory_space<vmem>>, vector<1152x128xbf16>
    %cst_25 = arith.constant dense<0.000000e+00> : vector<256x128xf32>
    %59 = tpu.matmul %57, %58, %cst_25 {dimension_numbers = #tpu.dot_dimension_numbers<[1], [0], [0], [1], [0, 0, 1, 1], [], []>} : vector<256x1152xbf16>, vector<1152x128xbf16>, vector<256x128xf32> -> vector<256x128xf32>
    %c0_26 = arith.constant 0 : index
    %c0_27 = arith.constant 0 : index
    %60 = vector.load %arg6[%c0_26, %c0_27] : memref<1x128xf32, #tpu.memory_space<vmem>>, vector<1x128xf32>
    %61 = vector.broadcast %60 : vector<1x128xf32> to vector<256x128xf32>
    %62 = arith.addf %59, %61 : vector<256x128xf32>
    %cst_28 = arith.constant 0.000000e+00 : f32
    %63 = vector.broadcast %cst_28 : f32 to vector<256x128xf32>
    %64 = arith.maximumf %62, %63 : vector<256x128xf32>
    %65 = arith.truncf %64 : vector<256x128xf32> to vector<256x128xbf16>
    %c0_29 = arith.constant 0 : index
    %c0_30 = arith.constant 0 : index
    %66 = vector.load %arg7[%c0_29, %c0_30] : memref<128x128xbf16, #tpu.memory_space<vmem>>, vector<128x128xbf16>
    %cst_31 = arith.constant dense<0.000000e+00> : vector<256x128xf32>
    %67 = tpu.matmul %65, %66, %cst_31 {dimension_numbers = #tpu.dot_dimension_numbers<[1], [0], [0], [1], [0, 0, 1, 1], [], []>} : vector<256x128xbf16>, vector<128x128xbf16>, vector<256x128xf32> -> vector<256x128xf32>
    %c0_32 = arith.constant 0 : index
    %c0_33 = arith.constant 0 : index
    %68 = vector.load %arg1[%c0_32, %c0_33] : memref<256x128xbf16, #tpu.memory_space<vmem>>, vector<256x128xbf16>
    %69 = arith.extf %68 : vector<256x128xbf16> to vector<256x128xf32>
    %c0_34 = arith.constant 0 : index
    %c0_35 = arith.constant 0 : index
    %70 = vector.load %arg8[%c0_34, %c0_35] : memref<1x128xf32, #tpu.memory_space<vmem>>, vector<1x128xf32>
    %71 = vector.broadcast %70 : vector<1x128xf32> to vector<256x128xf32>
    %72 = arith.addf %67, %71 : vector<256x128xf32>
    %73 = arith.addf %72, %69 : vector<256x128xf32>
    %cst_36 = arith.constant 0.000000e+00 : f32
    %74 = vector.broadcast %cst_36 : f32 to vector<256x128xf32>
    %75 = arith.maximumf %73, %74 : vector<256x128xf32>
    %76 = arith.truncf %75 : vector<256x128xf32> to vector<256x128xbf16>
    %c0_37 = arith.constant 0 : index
    %c0_38 = arith.constant 0 : index
    %77 = vector.load %arg9[%c0_37, %c0_38] : memref<256x128xbf16, #tpu.memory_space<vmem>>, vector<256x128xbf16>
    tpu.vector_store %arg9[%c0_37, %c0_38], %76 {strides = array<i32>} : memref<256x128xbf16, #tpu.memory_space<vmem>>, vector<256x128xbf16>,
    return
  }
  func.func @transform_0(%arg0: i32) -> (i32, i32) {
    %c0_i32 = arith.constant 0 : i32
    %c0_i32_0 = arith.constant 0 : i32
    return %arg0, %c0_i32 : i32, i32
  }
  func.func @transform_1(%arg0: i32) -> (i32, i32, i32) {
    %c0_i32 = arith.constant 0 : i32
    %c0_i32_0 = arith.constant 0 : i32
    %c0_i32_1 = arith.constant 0 : i32
    %c0_i32_2 = arith.constant 0 : i32
    return %c0_i32, %c0_i32_0, %c0_i32_1 : i32, i32, i32
  }
  func.func @transform_2(%arg0: i32) -> (i32, i32) {
    %c0_i32 = arith.constant 0 : i32
    %c0_i32_0 = arith.constant 0 : i32
    %c0_i32_1 = arith.constant 0 : i32
    return %c0_i32, %c0_i32_0 : i32, i32
  }
  func.func @transform_3(%arg0: i32) -> (i32, i32) {
    %c0_i32 = arith.constant 0 : i32
    %c0_i32_0 = arith.constant 0 : i32
    %c0_i32_1 = arith.constant 0 : i32
    return %c0_i32, %c0_i32_0 : i32, i32
  }
  func.func @transform_4(%arg0: i32) -> (i32, i32) {
    %c0_i32 = arith.constant 0 : i32
    %c0_i32_0 = arith.constant 0 : i32
    %c0_i32_1 = arith.constant 0 : i32
    return %c0_i32, %c0_i32_0 : i32, i32
  }
  func.func @transform_5(%arg0: i32) -> (i32, i32) {
    %c0_i32 = arith.constant 0 : i32
    %c0_i32_0 = arith.constant 0 : i32
    %c0_i32_1 = arith.constant 0 : i32
    return %c0_i32, %c0_i32_0 : i32, i32
  }
  func.func @transform_6(%arg0: i32) -> (i32, i32) {
    %c0_i32 = arith.constant 0 : i32
    %c0_i32_0 = arith.constant 0 : i32
    %c0_i32_1 = arith.constant 0 : i32
    return %c0_i32, %c0_i32_0 : i32, i32
  }
  func.func @transform_7(%arg0: i32) -> (i32, i32) {
    %c0_i32 = arith.constant 0 : i32
    %c0_i32_0 = arith.constant 0 : i32
    %c0_i32_1 = arith.constant 0 : i32
    return %c0_i32, %c0_i32_0 : i32, i32
  }
  func.func @transform_8(%arg0: i32) -> (i32, i32) {
    %c0_i32 = arith.constant 0 : i32
    %c0_i32_0 = arith.constant 0 : i32
    return %arg0, %c0_i32 : i32, i32
  }
}

</mosaic_0001>

<bundles_post_ra>
// kernel: res_bottleneck_forward.1
= control target key start
LH: loop header
LB: loop body
LE: loop exit
PB: predicated region body
PF: predicated region fallthrough
CT: control target
= control target key end

     0   :  { %13 = vsyncpa [#allocation3], 0  ;;  %s8439_s0 = inlined_call_operand.vmem [shape: bf16[512,128], index: 0, kind: input, shape index: {}]   ;;  %s8440_s1 = inlined_call_operand.hbm [shape: f32[9,256,1], index: 1, kind: input, shape index: {}]   ;;  %s8441_s2 = inlined_call_operand.hbm [shape: bf16[128,128], index: 2, kind: input, shape index: {}]   ;;  %s8442_s3 = inlined_call_operand.hbm [shape: f32[1,128], index: 3, kind: input, shape index: {}]   ;;  %s8443_s4 = inlined_call_operand.hbm [shape: bf16[1152,128], index: 4, kind: input, shape index: {}]   ;;  %s8444_s5 = inlined_call_operand.hbm [shape: f32[1,128], index: 5, kind: input, shape index: {}]   ;;  %s8445_s6 = inlined_call_operand.hbm [shape: bf16[128,128], index: 6, kind: input, shape index: {}]   ;;  %s8446_s7 = inlined_call_operand.hbm [shape: f32[1,128], index: 7, kind: input, shape index: {}]   ;;  %s8447_s8 = inlined_call_operand.hbm [shape: bf16[512,128], index: 8, kind: output, shape index: {}]  }
   0x1   :  { %14 = vsyncpa [#allocation6], 0 }
   0x2   :  { %15 = vsyncpa [#allocation9], 0 }
   0x3   :  { %16 = vsyncpa [#allocation12], 0 }
   0x4   :  { %17 = vsyncpa [#allocation4], 0 }
   0x5   :  { %19 = vsyncpa [#allocation4 + $0x1], 0  ;;  %s6504_s27 = smov 0   ;;  %s6506_s28 = smov 0  }
   0x6   :  { %s6508_s29 = smov 0   ;;  %s6510_s30 = smov 0  }
   0x7 LB: > { %8578 = sst [smem:[#allocation20_spill]] %s6438_s29  ;;  %s6525_s9 = sadd.s32 4294967295, %s6442_s30   ;;  %s6442_s30 = sphi %s6510_s30, %s8922_s30   ;;  %s6438_s29 = sphi %s6508_s29, %s8924_s29   ;;  %s6434_s28 = sphi %s6506_s28, %s8926_s28   ;;  %s6430_s27 = sphi %s6504_s27, %s8925_s27  }
   0x8   : > { %s4940_s10 = sadd.s32 4294967294, %s6442_s30   ;;  %s6529_s11 = sadd.s32 1, %s6442_s30  }
   0x9   : > { %8579 = sst [smem:[#allocation21_spill]] %s6529_s11  ;;  %s205_s12 = sadd.s32 1, %s6438_s29 }
   0xa   : > { %s202_s13 = ssub.s32 %s6442_s30, %s6529_s11  ;;  %p215_p0 = scmp.ne.s32.totalorder %s6438_s29, %s6434_s28 }
   0xb   : > { %p203_p1 = scmp.eq.s32.totalorder %s202_s13, 0  ;;  %p216_p2 = scmp.eq.s32.totalorder %s6525_s9, 1 }
   0xc   : > { %p221_p3 = scmp.ne.s32.totalorder %s6434_s28, %s6430_s27  ;;  %p222_p4 = scmp.eq.s32.totalorder %s4940_s10, 1 }
   0xd   : > { %s6540_s14 = scalar_select %p203_p1, %s6438_s29, %s205_s12  }
   0xe   : > { %p6542_p5 = por %p216_p2, %p215_p0  ;;  %p6546_p6 = por %p222_p4, %p221_p3 }
   0xf   : > { %8580 = sst [smem:[#allocation22_spill]] %s6540_s14  ;;  %p4941_p7 = scmp.ge.s32.totalorder %s6442_s30, 1 }
  0x10   : > { %s8581_s15 = scalar_select %p6542_p5, 1, 0 }
  0x11   : > { %s8582_s16 = scalar_select %p6546_p6, 1, 0 }
  0x12   : > { %p229_p8 = scmp.lt.s32.totalorder %s6442_s30, 3  ;;  %p8448_p9 = scmp.eq.s32.totalorder %s6525_s9, 0 }
  0x13   : > { %8583 = sst [smem:[#allocation23_spill]] %s8582_s16  ;;  %s6444_s18 = smov [#allocation5]  }
  0x14   : > { %p6553_p10 = pnand %p4941_p7, %p229_p8  ;;  %s254_s19 = sshll.u32 %s6444_s18, 4  ;;  %s6559_s19 = int_to_ptr.vmem [resolvable:$true] %s254_s19 }
  0x15   : > { %s6445_s21 = smov [#allocation8]   ;;  %s6446_s23 = smov [#allocation11]  }
  0x16   : > { %s8584_s17 = scalar_select %p6553_p10, 1, 0 }
  0x17   : > { %p5943_p11 = pneg %p6553_p10  ;;  %s278_s22 = sshll.u32 %s6445_s21, 4  ;;  %s6567_s22 = int_to_ptr.vmem [resolvable:$true] %s278_s22 }
  0x18   : > { %s6569_s24 = sshll.u32 %s6446_s23, 4  ;;  %s6168_s10 = scalar_lea.hbm %s8441_s2, 1024  ;;  %s303_s24 = int_to_ptr.vmem [resolvable:$true] %s6569_s24 }
  0x19   : > { %p6563_p12 = pnand %p8448_p9, %p5943_p11  ;;  %p6169_p13 = scmp.ne.s32.totalorder %s8441_s2, %s6168_s10 }
  0x1a   : > { %p6175_p3 = scmp.lt.u32.totalorder %s6168_s10, %s8441_s2 }
  0x1b   : > { %p6579_p0 = pneg %p6563_p12 }
  0x1d   : > { %p6171_p1 = pnand %p6579_p0, %p6169_p13 }
  0x1f   : > { %p6172_p2 = pneg %p6171_p1 }
  0x21   : > { %p6177_p4 = pnand %p6175_p3, %p6172_p2 }
  0x23   : > { %6180 = shalt.err (!%p6177_p4)
}
  0x24   : > { %s6181_s25 = scalar_lea.vmem %s6559_s19, 1024  ;;  %p6189_p9 = scmp.lt.s32.totalorder %s6559_s19, %s6559_s19 }
  0x25   : > { %p6182_p7 = scmp.ne.s32.totalorder %s6559_s19, %s6181_s25  ;;  %p6190_p6 = scmp.lt.s32.totalorder %s6181_s25, %s6181_s25 }
  0x27   : > { %p6184_p8 = pnand %p6182_p7, %p6579_p0  ;;  %p6191_p13 = por %p6190_p6, %p6189_p9 }
  0x29   : > { %p6185_p11 = pneg %p6184_p8 }
  0x2b   : > { %p6192_p1 = pnand %p6191_p13, %p6185_p11 }
  0x2d   : > { %6195 = shalt.err (!%p6192_p1)
}
  0x2e   : > { %s6447_s26 = smov 64   ;;  %s6448_s10 = smov 4  }
  0x2f   : > { %5949 = dma.hbm_to_vmem [thread:$0]  (!%p6563_p12), %s8441_s2, 1024, %s6559_s19, [#allocation6], %s6447_s26, %s6447_s26, %s6448_s10  }
  0x30   : > { %s6196_s25 = scalar_lea.hbm %s8443_s4, 9216 }
  0x31   : > { %p6197_p6 = scmp.ne.s32.totalorder %s8443_s4, %s6196_s25  ;;  %p6203_p3 = scmp.lt.u32.totalorder %s6196_s25, %s8443_s4 }
  0x33   : > { %p6199_p9 = pnand %p6197_p6, %p6579_p0 }
  0x35   : > { %p6200_p2 = pneg %p6199_p9 }
  0x37   : > { %p6205_p4 = pnand %p6203_p3, %p6200_p2 }
  0x39   : > { %6208 = shalt.err (!%p6205_p4)
}
  0x3a   : > { %s6209_s19 = scalar_lea.vmem %s6567_s22, 9216  ;;  %p6217_p13 = scmp.lt.s32.totalorder %s6567_s22, %s6567_s22 }
  0x3b   : > { %p6210_p7 = scmp.ne.s32.totalorder %s6567_s22, %s6209_s19  ;;  %p6218_p1 = scmp.lt.s32.totalorder %s6209_s19, %s6209_s19 }
  0x3d   : > { %p6212_p8 = pnand %p6210_p7, %p6579_p0  ;;  %p6219_p6 = por %p6218_p1, %p6217_p13 }
  0x3f   : > { %p6213_p11 = pneg %p6212_p8 }
  0x41   : > { %p6220_p9 = pnand %p6219_p6, %p6213_p11 }
  0x43   : > { %6223 = shalt.err (!%p6220_p9)
}
  0x44   : > { %5955 = dma.hbm_to_vmem [thread:$0]  (!%p6563_p12), %s8443_s4, 9216, %s6567_s22, [#allocation9], %s6447_s26, %s6447_s26, %s6448_s10  }
  0x45   : > { %s6224_s12 = scalar_lea.hbm %s8445_s6, 1024 }
  0x46   : > { %p6225_p2 = scmp.ne.s32.totalorder %s8445_s6, %s6224_s12  ;;  %p6231_p7 = scmp.lt.u32.totalorder %s6224_s12, %s8445_s6 }
  0x48   : > { %p6227_p3 = pnand %p6225_p2, %p6579_p0 }
  0x4a   : > { %p6228_p4 = pneg %p6227_p3 }
  0x4c   : > { %p6233_p8 = pnand %p6231_p7, %p6228_p4 }
  0x4e   : > { %6236 = shalt.err (!%p6233_p8)
}
  0x4f   : > { %s6237_s19 = scalar_lea.vmem %s303_s24, 1024  ;;  %p6245_p6 = scmp.lt.s32.totalorder %s303_s24, %s303_s24 }
  0x50   : > { %p6238_p11 = scmp.ne.s32.totalorder %s303_s24, %s6237_s19  ;;  %p6246_p9 = scmp.lt.s32.totalorder %s6237_s19, %s6237_s19 }
  0x52   : > { %p6240_p13 = pnand %p6238_p11, %p6579_p0  ;;  %p6247_p5 = por %p6246_p9, %p6245_p6 }
  0x54   : > { %p6241_p1 = pneg %p6240_p13 }
  0x56   : > { %p6248_p10 = pnand %p6247_p5, %p6241_p1 }
  0x58   : > { %6251 = shalt.err (!%p6248_p10)
}
  0x59   : > { %5961 = dma.hbm_to_vmem [thread:$0]  (!%p6563_p12), %s8445_s6, 1024, %s303_s24, [#allocation12], %s6447_s26, %s6447_s26, %s6448_s10  }
  0x5a   : > { %s6449_s11 = smov [#allocation2]   ;;  %s6252_s13 = scalar_lea.hbm %s8440_s1, 36864 }
  0x5b   : > { %s241_s14 = sshll.u32 %s6449_s11, 4  ;;  %p6253_p5 = scmp.ne.s32.totalorder %s8440_s1, %s6252_s13  ;;  %s242_s14 = int_to_ptr.vmem [resolvable:$true] %s241_s14 }
  0x5c   : > { %p6259_p3 = scmp.lt.u32.totalorder %s6252_s13, %s8440_s1 }
  0x5d   : > { %p6255_p10 = pnand %p6253_p5, %p6579_p0 }
  0x5f   : > { %p6256_p2 = pneg %p6255_p10 }
  0x61   : > { %p6261_p4 = pnand %p6259_p3, %p6256_p2 }
  0x63   : > { %6264 = shalt.err (!%p6261_p4)
}
  0x64   : > { %s6265_s24 = scalar_lea.vmem %s242_s14, 36864  ;;  %p6273_p13 = scmp.lt.s32.totalorder %s242_s14, %s242_s14 }
  0x65   : > { %p6266_p7 = scmp.ne.s32.totalorder %s242_s14, %s6265_s24  ;;  %p6274_p1 = scmp.lt.s32.totalorder %s6265_s24, %s6265_s24 }
  0x67   : > { %p6268_p8 = pnand %p6266_p7, %p6579_p0  ;;  %p6275_p6 = por %p6274_p1, %p6273_p13 }
  0x69   : > { %p6269_p11 = pneg %p6268_p8 }
  0x6b   : > { %p6276_p9 = pnand %p6275_p6, %p6269_p11 }
  0x6d   : > { %6279 = shalt.err (!%p6276_p9)
}
  0x6e   : > { %s6450_s26 = smov 128   ;;  %s6451_s10 = smov 8  }
  0x6f   : > { %5946 = dma.hbm_to_vmem [thread:$0]  (!%p6563_p12), %s8440_s1, 36864, %s242_s14, [#allocation3], %s6450_s26, %s6450_s26, %s6451_s10  }
  0x70   : > { %s6452_s11 = smov [#allocation7]   ;;  %s6453_s12 = smov [#allocation10]  }
  0x71   : > { %s268_s16 = sshll.u32 %s6452_s11, 4  ;;  %s292_s13 = sshll.u32 %s6453_s12, 4  ;;  %s269_s16 = int_to_ptr.vmem [resolvable:$true] %s268_s16  ;;  %s6669_s13 = int_to_ptr.vmem [resolvable:$true] %s292_s13 }
  0x72   : > { %s6280_s25 = scalar_lea.hbm %s8442_s3, 16 }
  0x73   : > { %p6281_p5 = scmp.ne.s32.totalorder %s8442_s3, %s6280_s25  ;;  %p6287_p3 = scmp.lt.u32.totalorder %s6280_s25, %s8442_s3 }
  0x75   : > { %p6283_p10 = pnand %p6281_p5, %p6579_p0 }
  0x77   : > { %p6284_p2 = pneg %p6283_p10 }
  0x79   : > { %p6289_p4 = pnand %p6287_p3, %p6284_p2 }
  0x7b   : > { %6292 = shalt.err (!%p6289_p4)
}
  0x7c   : > { %s6293_s26 = scalar_lea.vmem %s269_s16, 16  ;;  %s6300_s10 = scalar_lea.vmem %s269_s16, 32 }
  0x7d   : > { %p6294_p7 = scmp.ne.s32.totalorder %s269_s16, %s6293_s26  ;;  %p6301_p13 = scmp.lt.s32.totalorder %s269_s16, %s269_s16 }
  0x7e   : > { %p6302_p1 = scmp.lt.s32.totalorder %s6300_s10, %s6293_s26 }
  0x7f   : > { %p6296_p8 = pnand %p6294_p7, %p6579_p0 }
  0x80   : > { %p6303_p6 = por %p6302_p1, %p6301_p13 }
  0x81   : > { %p6297_p11 = pneg %p6296_p8 }
  0x83   : > { %p6304_p9 = pnand %p6303_p6, %p6297_p11 }
  0x85   : > { %6307 = shalt.err (!%p6304_p9)
}
  0x86   : > { %5952 = dma.hbm_to_vmem [thread:$0]  (!%p6563_p12), %s8442_s3, 16, %s269_s16, [#allocation6]  }
  0x87   : > { %s6308_s23 = scalar_lea.hbm %s8444_s5, 16 }
  0x88   : > { %p6309_p5 = scmp.ne.s32.totalorder %s8444_s5, %s6308_s23  ;;  %p6315_p3 = scmp.lt.u32.totalorder %s6308_s23, %s8444_s5 }
  0x8a   : > { %p6311_p10 = pnand %p6309_p5, %p6579_p0 }
  0x8c   : > { %p6312_p2 = pneg %p6311_p10 }
  0x8e   : > { %p6317_p4 = pnand %p6315_p3, %p6312_p2 }
  0x90   : > { %6320 = shalt.err (!%p6317_p4)
}
  0x91   : > { %s6321_s16 = scalar_lea.vmem %s6669_s13, 16  ;;  %s6328_s14 = scalar_lea.vmem %s6669_s13, 32 }
  0x92   : > { %p6322_p7 = scmp.ne.s32.totalorder %s6669_s13, %s6321_s16  ;;  %p6329_p13 = scmp.lt.s32.totalorder %s6669_s13, %s6669_s13 }
  0x93   : > { %p6330_p1 = scmp.lt.s32.totalorder %s6328_s14, %s6321_s16 }
  0x94   : > { %p6324_p8 = pnand %p6322_p7, %p6579_p0 }
  0x95   : > { %p6331_p6 = por %p6330_p1, %p6329_p13 }
  0x96   : > { %p6325_p11 = pneg %p6324_p8 }
  0x98   : > { %p6332_p9 = pnand %p6331_p6, %p6325_p11 }
  0x9a   : > { %6335 = shalt.err (!%p6332_p9)
}
  0x9b   : > { %5958 = dma.hbm_to_vmem [thread:$0]  (!%p6563_p12), %s8444_s5, 16, %s6669_s13, [#allocation9]  }
  0x9c   : > { %s6454_s29 = smov [#allocation13]   ;;  %s6336_s23 = scalar_lea.hbm %s8446_s7, 16 }
  0x9d   : > { %s316_s11 = sshll.u32 %s6454_s29, 4  ;;  %p6337_p5 = scmp.ne.s32.totalorder %s8446_s7, %s6336_s23  ;;  %s317_s11 = int_to_ptr.vmem [resolvable:$true] %s316_s11 }
  0x9e   : > { %p6343_p3 = scmp.lt.u32.totalorder %s6336_s23, %s8446_s7 }
  0x9f   : > { %p6339_p10 = pnand %p6337_p5, %p6579_p0 }
  0xa1   : > { %p6340_p2 = pneg %p6339_p10 }
  0xa3   : > { %p6345_p4 = pnand %p6343_p3, %p6340_p2 }
  0xa5   : > { %6348 = shalt.err (!%p6345_p4)
}
  0xa6   : > { %s6349_s13 = scalar_lea.vmem %s317_s11, 16  ;;  %s6356_s16 = scalar_lea.vmem %s317_s11, 32 }
  0xa7   : > { %p6350_p7 = scmp.ne.s32.totalorder %s317_s11, %s6349_s13  ;;  %p6357_p13 = scmp.lt.s32.totalorder %s317_s11, %s317_s11 }
  0xa8   : > { %p6358_p1 = scmp.lt.s32.totalorder %s6356_s16, %s6349_s13 }
  0xa9   : > { %p6352_p8 = pnand %p6350_p7, %p6579_p0 }
  0xaa   : > { %p6359_p6 = por %p6358_p1, %p6357_p13 }
  0xab   : > { %p6353_p11 = pneg %p6352_p8 }
  0xad   : > { %p6360_p9 = pnand %p6359_p6, %p6353_p11 }
  0xaf   : > { %6363 = shalt.err (!%p6360_p9)
}
  0xb0   : > { %5964 = dma.hbm_to_vmem [thread:$0]  (!%p6563_p12), %s8446_s7, 16, %s317_s11, [#allocation12]  }
  0xb1   : > { %p8587_p5 = scmp.ne.s32.totalorder %s8584_s17, 0 }
  0xb3   : > { %338 = sbr.rel (%p8587_p5) target bundleno = 1304 (0x518), region = 52 }
  0xba   : > { %p8588_p10 = scmp.eq.s32.totalorder %s6525_s9, 0 }
  0xbc   : > { %6409 = dma.done.wait (%p8588_p10), [#allocation3], 36864   ;;  %p8589_p0 = pmov %p8588_p10 }
  0xbe   : > { %6411 = vsyncadd (%p8589_p0), [#allocation3], 4294930432  ;;  %p8590_p2 = pmov %p8589_p0 }
  0xbf   : > { %p8591_p3 = pmov %p8589_p0 }
  0xc0   : > { %6413 = dma.done.wait (%p8590_p2), [#allocation6], 1040  }
  0xc1   : > { %6415 = vsyncadd (%p8591_p3), [#allocation6], 4294966256  ;;  %p8592_p4 = pmov %p8589_p0 }
  0xc2   : > { %p8593_p12 = pmov %p8589_p0 }
  0xc3   : > { %6417 = dma.done.wait (%p8592_p4), [#allocation9], 9232  }
  0xc4   : > { %6419 = vsyncadd (%p8593_p12), [#allocation9], 4294958064  ;;  %p8594_p7 = pmov %p8589_p0 }
  0xc5   : > { %p8595_p8 = pmov %p8589_p0 }
  0xc6   : > { %6421 = dma.done.wait (%p8594_p7), [#allocation12], 1040  }
  0xc7   : > { %6423 = vsyncadd (%p8595_p8), [#allocation12], 4294966256  ;;  %v6455_v0 = vmov 0   ;;  %s4959_s17 = sshll.u32 %s6525_s9, 5  ;;  %v865_v1 = vld [vmem:[#allocation2 + $0x10] sm:$0xff]  ;;  %v863_v2 = vld [vmem:[#allocation2] sm:$0xff] }
  0xc8   : > { %6031 = vset.pattern.permute.xlu1 %v6455_v0  ;;  %6030 = vset.pattern.permute.xlu0 %v6455_v0  ;;  %p397_p11 = scmp.lt.s32.totalorder %s4959_s17, 63  ;;  %v6032_v3 = vld [vmem:[#allocation5] sm:$0xff]   ;;  %v866_v4 = vld [vmem:[#allocation2 + $0x18] sm:$0xff]  ;;  %v864_v5 = vld [vmem:[#allocation2 + $0x8] sm:$0xff]  ;;  %s393_s11 = sand.u32 1, %s6434_s28  }
  0xc9   : > { %907 = vperm.xlu1 %6031, %v865_v1   ;;  %897 = vperm.xlu0 %6030, %v863_v2   ;;  %v6033_v6 = vld [vmem:[#allocation5 + $0x8] sm:$0xff]   ;;  %v867_v8 = vld [vmem:[#allocation2 + $0x20] sm:$0xff]  ;;  %v6034_v9 = vld [vmem:[#allocation5 + $0x10] sm:$0xff]   ;;  %s4958_s12 = sshll.u32 %s393_s11, 7  ;;  %s5137_s23 = sshll.u32 %s6525_s9, 11 }
  0xca   : > { %5753 = vmatprep.subr.bf16.mxu0 %v6032_v3  ;;  %5897 = vmatprep.subr.bf16.mxu1 %v6032_v3  ;;  %s8928_s17 = smov (!%p397_p11, %s4959_s17), 63  ;;  %v868_v7 = vld [vmem:[#allocation2 + $0x28] sm:$0xff]  ;;  %v870_v10 = vld [vmem:[#allocation2 + $0x38] sm:$0xff]  ;;  %v869_v11 = vld [vmem:[#allocation2 + $0x30] sm:$0xff]  ;;  %s8331_s21 = scalar_lea.vmem [#allocation14], %s4958_s12 }
  0xcb   : > { %5754 = vmatpush3.bf16.msra.mxu0 %v6032_v3  ;;  %5905 = vmatpush3.bf16.msra.mxu1 %v6032_v3  ;;  %s4960_s20 = sshll.u32 %s8928_s17, 2  ;;  %v6035_v12 = vld [vmem:[#allocation5 + $0x18] sm:$0xff]   ;;  %v872_v13 = vld [vmem:[#allocation2 + $0x48] sm:$0xff]  ;;  %v871_v14 = vld [vmem:[#allocation2 + $0x40] sm:$0xff]  ;;  %s4809_s25 = sshll.u32 %s8331_s21, 4  ;;  %s8392_s25 = int_to_ptr.vmem [resolvable:$true] %s4809_s25 }
  0xcc   : > { %5755 = vmatprep.subr.bf16.mxu0 %v6033_v6  ;;  %5898 = vmatprep.subr.bf16.mxu1 %v6033_v6  ;;  %s6753_s29 = scalar_lea.vmem %s8439_s0, %s4960_s20  ;;  %v6036_v15 = vld [vmem:[#allocation5 + $0x20] sm:$0xff]   ;;  %v874_v18 = vld [vmem:[#allocation2 + $0x58] sm:$0xff]  ;;  %v873_v19 = vld [vmem:[#allocation2 + $0x50] sm:$0xff]  ;;  %s8390_s22 = scalar_lea.hbm %s8447_s8, %s5137_s23 }
  0xcd   : > { %912 = vperm.xlu1 %6031, %v866_v4   ;;  %902 = vperm.xlu0 %6030, %v864_v5   ;;  %v404_v16 = vld [vmem:[%s6753_s29] sm:$0xff]   ;;  %v6037_v20 = vld [vmem:[#allocation5 + $0x28] sm:$0xff]   ;;  %v6038_v23 = vld [vmem:[#allocation5 + $0x30] sm:$0xff]   ;;  %s8398_s9 = scalar_lea.sflag [#allocation4], %s393_s11  ;;  %s6364_s13 = scalar_lea.vmem %s8392_s25, 2048 }
  0xce   : > { %v420_v17 = vld [vmem:[%s6753_s29 + $0x40] sm:$0xff]   ;;  %5769 = vmatprep.mubr.bf16.mxu0 %v404_v16  ;;  %v876_v21 = vld [vmem:[#allocation2 + $0x68] sm:$0xff]  ;;  %v878_v24 = vld [vmem:[#allocation2 + $0x78] sm:$0xff]  ;;  %p6365_p13 = scmp.ne.s32.totalorder %s8392_s25, %s6364_s13  ;;  %p8919_p1 = scmp.ne.s32.totalorder %s8581_s15, 0 }
  0xcf   : > { %5756 = vmatpush3.bf16.msra.mxu0 %v6033_v6  ;;  %5906 = vmatpush3.bf16.msra.mxu1 %v6033_v6  ;;  %v875_v22 = vld [vmem:[#allocation2 + $0x60] sm:$0xff]  ;;  %v877_v25 = vld [vmem:[#allocation2 + $0x70] sm:$0xff]  ;;  %v6039_v26 = vld [vmem:[#allocation5 + $0x38] sm:$0xff]   ;;  %s6456_s16 = smov [#allocation14]  }
  0xd0   : > { %5757 = vmatprep.subr.bf16.mxu0 %v6034_v9  ;;  %5899 = vmatprep.subr.bf16.mxu1 %v6034_v9  ;;  %v406_v27 = vld [vmem:[%s6753_s29 + $0x8] sm:$0xff]   ;;  %v408_v29 = vld [vmem:[%s6753_s29 + $0x10] sm:$0xff]   ;;  %v879_v32 = vld [vmem:[#allocation2 + $0x80] sm:$0xff]  ;;  %p6366_p6 = pnand %p6365_p13, %p8919_p1  ;;  %s6368_s14 = sshll.u32 %s6456_s16, 4  ;;  %s6369_s14 = int_to_ptr.vmem [resolvable:$false] %s6368_s14 }
  0xd1   : > { %922 = vperm.xlu1 %6031, %v868_v7   ;;  %917 = vperm.xlu0 %6030, %v867_v8   ;;  %v422_v28 = vld [vmem:[%s6753_s29 + $0x48] sm:$0xff]   ;;  %v424_v30 = vld [vmem:[%s6753_s29 + $0x50] sm:$0xff]   ;;  %v882_v33 = vld [vmem:[#allocation2 + $0x98] sm:$0xff]  ;;  %s6370_s26 = scalar_lea.vmem %s6369_s14, 4096  ;;  %p6371_p5 = scmp.lt.s32.totalorder %s8392_s25, %s6369_s14 }
  0xd2   : > { %5785 = vmatprep.mubr.bf16.mxu1 %v420_v17  ;;  %v880_v31 = vld [vmem:[#allocation2 + $0x88] sm:$0xff]  ;;  %v881_v34 = vld [vmem:[#allocation2 + $0x90] sm:$0xff]  ;;  %v410_v35 = vld [vmem:[%s6753_s29 + $0x18] sm:$0xff]   ;;  %p6367_p9 = pneg %p6366_p6  ;;  %p6372_p10 = scmp.lt.s32.totalorder %s6370_s26, %s6364_s13 }
  0xd3   : > { %5758 = vmatpush3.bf16.msra.mxu0 %v6034_v9  ;;  %5907 = vmatpush3.bf16.msra.mxu1 %v6034_v9  ;;  %v426_v36 = vld [vmem:[%s6753_s29 + $0x58] sm:$0xff]   ;;  %v412_v37 = vld [vmem:[%s6753_s29 + $0x20] sm:$0xff]   ;;  %v884_v39 = vld [vmem:[#allocation2 + $0xa8] sm:$0xff] }
  0xd4   : > { %5759 = vmatprep.subr.bf16.mxu0 %v6035_v12  ;;  %5900 = vmatprep.subr.bf16.mxu1 %v6035_v12  ;;  %v428_v38 = vld [vmem:[%s6753_s29 + $0x60] sm:$0xff]   ;;  %v886_v41 = vld [vmem:[#allocation2 + $0xb8] sm:$0xff]  ;;  %v885_v42 = vld [vmem:[#allocation2 + $0xb0] sm:$0xff]  ;;  %p6373_p0 = por %p6372_p10, %p6371_p5 }
  0xd5   : > { %932 = vperm.xlu1 %6031, %v870_v10   ;;  %927 = vperm.xlu0 %6030, %v869_v11   ;;  %v883_v40 = vld [vmem:[#allocation2 + $0xa0] sm:$0xff]  ;;  %v414_v43 = vld [vmem:[%s6753_s29 + $0x28] sm:$0xff]   ;;  %v416_v47 = vld [vmem:[%s6753_s29 + $0x30] sm:$0xff]  }
  0xd6   : > { %v430_v44 = vld [vmem:[%s6753_s29 + $0x68] sm:$0xff]   ;;  %v887_v46 = vld [vmem:[#allocation2 + $0xc0] sm:$0xff]  ;;  %v432_v48 = vld [vmem:[%s6753_s29 + $0x70] sm:$0xff]   ;;  %p6374_p2 = pnand %p6373_p0, %p6367_p9 }
  0xd7   : > { %5760 = vmatpush3.bf16.msra.mxu0 %v6035_v12  ;;  %5908 = vmatpush3.bf16.msra.mxu1 %v6035_v12  ;;  %v888_v45 = vld [vmem:[#allocation2 + $0xc8] sm:$0xff]  ;;  %v890_v49 = vld [vmem:[#allocation2 + $0xd8] sm:$0xff]  ;;  %v889_v50 = vld [vmem:[#allocation2 + $0xd0] sm:$0xff] }
  0xd8   : > { %5761 = vmatprep.subr.bf16.mxu0 %v6036_v15  ;;  %5901 = vmatprep.subr.bf16.mxu1 %v6036_v15  ;;  %v418_v51 = vld [vmem:[%s6753_s29 + $0x38] sm:$0xff]   ;;  %v892_v52 = vld [vmem:[#allocation2 + $0xe8] sm:$0xff]  ;;  %v891_v54 = vld [vmem:[#allocation2 + $0xe0] sm:$0xff] }
  0xd9   : > { %942 = vperm.xlu1 %6031, %v872_v13   ;;  %937 = vperm.xlu0 %6030, %v871_v14   ;;  %v434_v53 = vld [vmem:[%s6753_s29 + $0x78] sm:$0xff]   ;;  %v893_v56 = vld [vmem:[#allocation2 + $0xf0] sm:$0xff]  ;;  %v1105_v57 = vld [vmem:[#allocation2 + $0x108] sm:$0xff] }
  0xda   : > { %v894_v55 = vld [vmem:[#allocation2 + $0xf8] sm:$0xff]  ;;  %v1104_v58 = vld [vmem:[#allocation2 + $0x100] sm:$0xff]  ;;  %v1106_v60 = vld [vmem:[#allocation2 + $0x110] sm:$0xff] }
  0xdb   : > { %5762 = vmatpush3.bf16.msra.mxu0 %v6036_v15  ;;  %5909 = vmatpush3.bf16.msra.mxu1 %v6036_v15  ;;  %v1107_v59 = vld [vmem:[#allocation2 + $0x118] sm:$0xff]  ;;  %v1109_v61 = vld [vmem:[#allocation2 + $0x128] sm:$0xff]  ;;  %v1108_v62 = vld [vmem:[#allocation2 + $0x120] sm:$0xff] }
  0xdc   : > { %5763 = vmatprep.subr.bf16.mxu0 %v6037_v20  ;;  %5902 = vmatprep.subr.bf16.mxu1 %v6037_v20  ;;  %v1111_v63 = vld [vmem:[#allocation2 + $0x138] sm:$0xff]  ;;  %v1110_v0 = vld [vmem:[#allocation2 + $0x130] sm:$0xff]  ;;  %v1113_v1 = vld [vmem:[#allocation2 + $0x148] sm:$0xff] }
  0xdd   : > { %952 = vperm.xlu1 %6031, %v874_v18   ;;  %947 = vperm.xlu0 %6030, %v873_v19   ;;  %v1112_v2 = vld [vmem:[#allocation2 + $0x140] sm:$0xff]  ;;  %v1115_v3 = vld [vmem:[#allocation2 + $0x158] sm:$0xff]  ;;  %v1114_v4 = vld [vmem:[#allocation2 + $0x150] sm:$0xff] }
  0xde   : > { %v1117_v5 = vld [vmem:[#allocation2 + $0x168] sm:$0xff]  ;;  %v1116_v6 = vld [vmem:[#allocation2 + $0x160] sm:$0xff]  ;;  %v1119_v7 = vld [vmem:[#allocation2 + $0x178] sm:$0xff] }
  0xdf   : > { %5764 = vmatpush3.bf16.msra.mxu0 %v6037_v20  ;;  %5910 = vmatpush3.bf16.msra.mxu1 %v6037_v20  ;;  %v1118_v8 = vld [vmem:[#allocation2 + $0x170] sm:$0xff]  ;;  %v1121_v9 = vld [vmem:[#allocation2 + $0x188] sm:$0xff]  ;;  %v1120_v10 = vld [vmem:[#allocation2 + $0x180] sm:$0xff] }
  0xe0   : > { %5765 = vmatprep.subr.bf16.mxu0 %v6038_v23  ;;  %5903 = vmatprep.subr.bf16.mxu1 %v6038_v23  ;;  %v1123_v11 = vld [vmem:[#allocation2 + $0x198] sm:$0xff]  ;;  %v1122_v12 = vld [vmem:[#allocation2 + $0x190] sm:$0xff]  ;;  %v1125_v13 = vld [vmem:[#allocation2 + $0x1a8] sm:$0xff] }
  0xe1   : > { %962 = vperm.xlu1 %6031, %v876_v21   ;;  %957 = vperm.xlu0 %6030, %v875_v22   ;;  %v1124_v14 = vld [vmem:[#allocation2 + $0x1a0] sm:$0xff]  ;;  %v1127_v15 = vld [vmem:[#allocation2 + $0x1b8] sm:$0xff]  ;;  %v1126_v16 = vld [vmem:[#allocation2 + $0x1b0] sm:$0xff] }
  0xe2   : > { %v1129_v17 = vld [vmem:[#allocation2 + $0x1c8] sm:$0xff]  ;;  %v1128_v18 = vld [vmem:[#allocation2 + $0x1c0] sm:$0xff]  ;;  %v1131_v19 = vld [vmem:[#allocation2 + $0x1d8] sm:$0xff] }
  0xe3   : > { %5766 = vmatpush3.bf16.msra.mxu0 %v6038_v23  ;;  %5911 = vmatpush3.bf16.msra.mxu1 %v6038_v23  ;;  %v1130_v20 = vld [vmem:[#allocation2 + $0x1d0] sm:$0xff]  ;;  %v1133_v21 = vld [vmem:[#allocation2 + $0x1e8] sm:$0xff]  ;;  %v1132_v22 = vld [vmem:[#allocation2 + $0x1e0] sm:$0xff] }
  0xe4   : > { %5767 = vmatprep.subr.bf16.mxu0 %v6039_v26  ;;  %5904 = vmatprep.subr.bf16.mxu1 %v6039_v26  ;;  %v1135_v23 = vld [vmem:[#allocation2 + $0x1f8] sm:$0xff] }
  0xe5   : > { %972 = vperm.xlu1 %6031, %v878_v24   ;;  %967 = vperm.xlu0 %6030, %v877_v25   ;;  %v1134_v24 = vld [vmem:[#allocation2 + $0x1f0] sm:$0xff]  ;;  %v6056_v25 = vld [vmem:[#allocation8 + $0x40] sm:$0xff]  }
  0xe7   : > { %5768 = vmatpush3.bf16.msra.mxu0 %v6039_v26  ;;  %5912 = vmatpush3.bf16.msra.mxu1 %v6039_v26  ;;  %v6057_v26 = vld [vmem:[#allocation8 + $0xc0] sm:$0xff]  }
  0xe8   : > { %5257 = vmatprep.subr.bf16.mxu1 %v6056_v25  ;;  %5369 = vmatprep.subr.bf16.mxu0 %v6057_v26  ;;  %v1660_v25 = vld [vmem:[#allocation2 + $0x348] sm:$0xff]  ;;  %v1659_v26 = vld [vmem:[#allocation2 + $0x340] sm:$0xff] }
  0xe9   : > { %982 = vperm.xlu1 %6031, %v880_v31   ;;  %977 = vperm.xlu0 %6030, %v879_v32  }
  0xea   : > { %5770 = vmatmul.mubr.bf16.vlgmr.msra.gmra.mrb[0].mxu0 %v406_v27  ;;  %5786 = vmatmul.mubr.bf16.vlgmr.msra.gmra.mrb[0].mxu1 %v422_v28  ;;  %v6058_v27 = vld [vmem:[#allocation8] sm:$0xff]  }
  0xeb   : > { %5773 = vmatprep.mubr.bf16.mxu0 %v408_v29  ;;  %5789 = vmatprep.mubr.bf16.mxu1 %v424_v30  ;;  %v1651_v28 = vld [vmem:[#allocation2 + $0x300] sm:$0xff] }
  0xec   : > { %v1410_v29 = vld [vmem:[#allocation2 + $0x200] sm:$0xff]  ;;  %5258 = vmatpush3.bf16.msra.mxu1 %v6058_v27 }
  0xed   : > { %992 = vperm.xlu1 %6031, %v882_v33   ;;  %987 = vperm.xlu0 %6030, %v881_v34   ;;  %v6059_v30 = vld [vmem:[#allocation8 + $0x80] sm:$0xff]   ;;  %v6060_v33 = vld [vmem:[#allocation8 + $0x48] sm:$0xff]  }
  0xee   : > { %5370 = vmatpush3.bf16.msra.mxu0 %v6059_v30  ;;  %v6061_v34 = vld [vmem:[#allocation8 + $0xc8] sm:$0xff]   ;;  %5259 = vmatprep.subr.bf16.mxu1 %v6060_v33  ;;  %v1418_v30 = vld [vmem:[#allocation2 + $0x240] sm:$0xff] }
  0xef   : > { %5371 = vmatprep.subr.bf16.mxu0 %v6061_v34 }
  0xf1   : > { %1002 = vperm.xlu1 %6031, %v884_v39   ;;  %997 = vperm.xlu0 %6030, %v883_v40  }
  0xf2   : > { %5774 = vmatmul.mubr.bf16.gmra.mrb[4].mxu0 %v410_v35  ;;  %5790 = vmatmul.mubr.bf16.gmra.mrb[4].mxu1 %v426_v36  ;;  %v6062_v35 = vld [vmem:[#allocation8 + $0x8] sm:$0xff]  }
  0xf3   : > { %5777 = vmatprep.mubr.bf16.mxu0 %v412_v37  ;;  %5793 = vmatprep.mubr.bf16.mxu1 %v428_v38  ;;  %v6063_v36 = vld [vmem:[#allocation8 + $0x88] sm:$0xff]  }
  0xf4   : > { %v1411_v37 = vld [vmem:[#allocation2 + $0x208] sm:$0xff]  ;;  %5260 = vmatpush3.bf16.msra.mxu1 %v6062_v35  ;;  %5372 = vmatpush3.bf16.msra.mxu0 %v6063_v36  ;;  %v1662_v35 = vld [vmem:[#allocation2 + $0x358] sm:$0xff]  ;;  %v1661_v36 = vld [vmem:[#allocation2 + $0x350] sm:$0xff] }
  0xf5   : > { %1012 = vperm.xlu1 %6031, %v886_v41   ;;  %1007 = vperm.xlu0 %6030, %v885_v42   ;;  %v1652_v38 = vld [vmem:[#allocation2 + $0x308] sm:$0xff]  ;;  %v6064_v41 = vld [vmem:[#allocation8 + $0x50] sm:$0xff]  }
  0xf6   : > { %v6065_v42 = vld [vmem:[#allocation8 + $0xd0] sm:$0xff]   ;;  %5261 = vmatprep.subr.bf16.mxu1 %v6064_v41 }
  0xf7   : > { %5373 = vmatprep.subr.bf16.mxu0 %v6065_v42  ;;  %v1421_v41 = vld [vmem:[#allocation2 + $0x258] sm:$0xff]  ;;  %v1420_v42 = vld [vmem:[#allocation2 + $0x250] sm:$0xff] }
  0xf9   : > { %1022 = vperm.xlu1 %6031, %v888_v45   ;;  %1017 = vperm.xlu0 %6030, %v887_v46   ;;  %v1653_v45 = vld [vmem:[#allocation2 + $0x310] sm:$0xff] }
  0xfa   : > { %5778 = vmatmul.mubr.bf16.gmra.mrb[8].mxu0 %v414_v43  ;;  %5794 = vmatmul.mubr.bf16.gmra.mrb[8].mxu1 %v430_v44  ;;  %v6066_v43 = vld [vmem:[#allocation8 + $0x10] sm:$0xff]  }
  0xfb   : > { %5781 = vmatprep.mubr.bf16.mxu0 %v416_v47  ;;  %5797 = vmatprep.mubr.bf16.mxu1 %v432_v48  ;;  %v1654_v44 = vld [vmem:[#allocation2 + $0x318] sm:$0xff] }
  0xfc   : > { %v6067_v46 = vld [vmem:[#allocation8 + $0x90] sm:$0xff]   ;;  %5262 = vmatpush3.bf16.msra.mxu1 %v6066_v43 }
  0xfd   : > { %1032 = vperm.xlu1 %6031, %v890_v49   ;;  %1027 = vperm.xlu0 %6030, %v889_v50   ;;  %v6068_v49 = vld [vmem:[#allocation8 + $0x58] sm:$0xff]  }
  0xfe   : > { %5374 = vmatpush3.bf16.msra.mxu0 %v6067_v46  ;;  %v6069_v50 = vld [vmem:[#allocation8 + $0xd8] sm:$0xff]   ;;  %5263 = vmatprep.subr.bf16.mxu1 %v6068_v49 }
  0xff   : > { %5375 = vmatprep.subr.bf16.mxu0 %v6069_v50  ;;  %v1663_v46 = vld [vmem:[#allocation2 + $0x360] sm:$0xff] }
 0x101   : > { %1042 = vperm.xlu1 %6031, %v892_v52   ;;  %1037 = vperm.xlu0 %6030, %v891_v54   ;;  %v6071_v52 = vld [vmem:[#allocation8 + $0x98] sm:$0xff]   ;;  %v1412_v54 = vld [vmem:[#allocation2 + $0x210] sm:$0xff] }
 0x102   : > { %5782 = vmatmul.mubr.bf16.gmra.mrb[12].mxu0 %v418_v51  ;;  %5798 = vmatmul.mubr.bf16.gmra.mrb[12].mxu1 %v434_v53  ;;  %v6070_v51 = vld [vmem:[#allocation8 + $0x18] sm:$0xff]  }
 0x103   : > { %v1413_v53 = vld [vmem:[#allocation2 + $0x218] sm:$0xff]  ;;  %5264 = vmatpush3.bf16.msra.mxu1 %v6070_v51  ;;  %5376 = vmatpush3.bf16.msra.mxu0 %v6071_v52  ;;  %v1423_v51 = vld [vmem:[#allocation2 + $0x268] sm:$0xff]  ;;  %v1422_v52 = vld [vmem:[#allocation2 + $0x260] sm:$0xff] }
 0x105   : > { %1052 = vperm.xlu1 %6031, %v894_v55   ;;  %1047 = vperm.xlu0 %6030, %v893_v56  }
 0x109   : > { %1143 = vperm.xlu1 %6031, %v1105_v57   ;;  %1138 = vperm.xlu0 %6030, %v1104_v58   ;;  %v6072_v57 = vld [vmem:[#allocation8 + $0x60] sm:$0xff]  }
 0x10a   : > { %v6073_v58 = vld [vmem:[#allocation8 + $0xe0] sm:$0xff]   ;;  %5265 = vmatprep.subr.bf16.mxu1 %v6072_v57  ;;  %v1666_v57 = vld [vmem:[#allocation2 + $0x378] sm:$0xff] }
 0x10b   : > { %5377 = vmatprep.subr.bf16.mxu0 %v6073_v58  ;;  %v1665_v58 = vld [vmem:[#allocation2 + $0x370] sm:$0xff] }
 0x10d   : > { %1153 = vperm.xlu1 %6031, %v1107_v59   ;;  %1148 = vperm.xlu0 %6030, %v1106_v60   ;;  %v6074_v59 = vld [vmem:[#allocation8 + $0x20] sm:$0xff]  }
 0x10e   : > { %v6075_v60 = vld [vmem:[#allocation8 + $0xa0] sm:$0xff]   ;;  %5266 = vmatpush3.bf16.msra.mxu1 %v6074_v59 }
 0x10f   : > { %5378 = vmatpush3.bf16.msra.mxu0 %v6075_v60 }
 0x111   : > { %1163 = vperm.xlu1 %6031, %v1109_v61   ;;  %1158 = vperm.xlu0 %6030, %v1108_v62   ;;  %v1656_v61 = vld [vmem:[#allocation2 + $0x328] sm:$0xff]  ;;  %v1655_v62 = vld [vmem:[#allocation2 + $0x320] sm:$0xff] }
 0x115   : > { %1173 = vperm.xlu1 %6031, %v1111_v63   ;;  %1168 = vperm.xlu0 %6030, %v1110_v0  }
 0x119   : > { %1183 = vperm.xlu1 %6031, %v1113_v1   ;;  %1178 = vperm.xlu0 %6030, %v1112_v2   ;;  %v1415_v1 = vld [vmem:[#allocation2 + $0x228] sm:$0xff]  ;;  %v1414_v2 = vld [vmem:[#allocation2 + $0x220] sm:$0xff] }
 0x11d   : > { %1193 = vperm.xlu1 %6031, %v1115_v3   ;;  %1188 = vperm.xlu0 %6030, %v1114_v4   ;;  %v6076_v3 = vld [vmem:[#allocation8 + $0x68] sm:$0xff]  }
 0x11e   : > { %v6077_v4 = vld [vmem:[#allocation8 + $0xe8] sm:$0xff]   ;;  %5267 = vmatprep.subr.bf16.mxu1 %v6076_v3 }
 0x11f   : > { %5379 = vmatprep.subr.bf16.mxu0 %v6077_v4  ;;  %v1668_v3 = vld [vmem:[#allocation2 + $0x388] sm:$0xff]  ;;  %v1667_v4 = vld [vmem:[#allocation2 + $0x380] sm:$0xff] }
 0x121   : > { %1203 = vperm.xlu1 %6031, %v1117_v5   ;;  %1198 = vperm.xlu0 %6030, %v1116_v6   ;;  %v6078_v5 = vld [vmem:[#allocation8 + $0x28] sm:$0xff]  }
 0x122   : > { %v6079_v6 = vld [vmem:[#allocation8 + $0xa8] sm:$0xff]   ;;  %5268 = vmatpush3.bf16.msra.mxu1 %v6078_v5 }
 0x123   : > { %5380 = vmatpush3.bf16.msra.mxu0 %v6079_v6 }
 0x125   : > { %1213 = vperm.xlu1 %6031, %v1119_v7   ;;  %1208 = vperm.xlu0 %6030, %v1118_v8  }
 0x129   : > { %1223 = vperm.xlu1 %6031, %v1121_v9   ;;  %1218 = vperm.xlu0 %6030, %v1120_v10   ;;  %v1658_v9 = vld [vmem:[#allocation2 + $0x338] sm:$0xff]  ;;  %v1657_v10 = vld [vmem:[#allocation2 + $0x330] sm:$0xff] }
 0x12d   : > { %1233 = vperm.xlu1 %6031, %v1123_v11   ;;  %1228 = vperm.xlu0 %6030, %v1122_v12   ;;  %v6080_v11 = vld [vmem:[#allocation8 + $0x70] sm:$0xff]  }
 0x12e   : > { %v6081_v12 = vld [vmem:[#allocation8 + $0xf0] sm:$0xff]   ;;  %5269 = vmatprep.subr.bf16.mxu1 %v6080_v11 }
 0x12f   : > { %5381 = vmatprep.subr.bf16.mxu0 %v6081_v12 }
 0x131   : > { %1243 = vperm.xlu1 %6031, %v1125_v13   ;;  %1238 = vperm.xlu0 %6030, %v1124_v14   ;;  %v6082_v13 = vld [vmem:[#allocation8 + $0x30] sm:$0xff]  }
 0x132   : > { %v6083_v14 = vld [vmem:[#allocation8 + $0xb0] sm:$0xff]   ;;  %5270 = vmatpush3.bf16.msra.mxu1 %v6082_v13  ;;  %v1909_v13 = vld [vmem:[#allocation2 + $0x508] sm:$0xff] }
 0x133   : > { %5382 = vmatpush3.bf16.msra.mxu0 %v6083_v14  ;;  %v1908_v14 = vld [vmem:[#allocation2 + $0x500] sm:$0xff] }
 0x135   : > { %1253 = vperm.xlu1 %6031, %v1127_v15   ;;  %1248 = vperm.xlu0 %6030, %v1126_v16  }
 0x139   : > { %1263 = vperm.xlu1 %6031, %v1129_v17   ;;  %1258 = vperm.xlu0 %6030, %v1128_v18   ;;  %v1417_v17 = vld [vmem:[#allocation2 + $0x238] sm:$0xff]  ;;  %v1416_v18 = vld [vmem:[#allocation2 + $0x230] sm:$0xff] }
 0x13d   : > { %1273 = vperm.xlu1 %6031, %v1131_v19   ;;  %1268 = vperm.xlu0 %6030, %v1130_v20   ;;  %v6084_v19 = vld [vmem:[#allocation8 + $0x78] sm:$0xff]  }
 0x13e   : > { %5271 = vmatprep.subr.bf16.mxu1 %v6084_v19  ;;  %v1670_v19 = vld [vmem:[#allocation2 + $0x398] sm:$0xff] }
 0x141   : > { %1283 = vperm.xlu1 %6031, %v1133_v21   ;;  %1278 = vperm.xlu0 %6030, %v1132_v22   ;;  %v6085_v22 = vld [vmem:[#allocation8 + $0xf8] sm:$0xff]  }
 0x142   : > { %5383 = vmatprep.subr.bf16.mxu0 %v6085_v22  ;;  %v1669_v22 = vld [vmem:[#allocation2 + $0x390] sm:$0xff] }
 0x145   : > { %1293 = vperm.xlu1 %6031, %v1135_v23   ;;  %1288 = vperm.xlu0 %6030, %v1134_v24   ;;  %v6086_v23 = vld [vmem:[#allocation8 + $0x38] sm:$0xff]  }
 0x146   : > { %v6087_v24 = vld [vmem:[#allocation8 + $0xb8] sm:$0xff]   ;;  %5272 = vmatpush3.bf16.msra.mxu1 %v6086_v23  ;;  %v6088_v23 = vld [vmem:[#allocation8 + $0x140] sm:$0xff]  }
 0x147   : > { %5384 = vmatpush3.bf16.msra.mxu0 %v6087_v24  ;;  %5481 = vmatprep.subr.bf16.mxu1 %v6088_v23 }
 0x148   : > { %v6771_v31 = vpop.permute.xlu1 %907  ;;  %v6773_v32 = vpop.permute.xlu0 %897 }
 0x149   : > { %1685 = vperm.xlu1 %6031, %v1651_v28   ;;  %1444 = vperm.xlu0 %6030, %v1410_v29   ;;  %v1419_v29 = vld [vmem:[#allocation2 + $0x248] sm:$0xff] }
 0x14c   : > { %v6775_v39 = vpop.permute.xlu1 %912  ;;  %v6777_v40 = vpop.permute.xlu0 %902 }
 0x14d   : > { %1449 = vperm.xlu1 %6031, %v1411_v37   ;;  %1690 = vperm.xlu0 %6030, %v1652_v38  }
 0x150   : > { %v6779_v47 = vpop.permute.xlu1 %922  ;;  %v6781_v48 = vpop.permute.xlu0 %917 }
 0x151   : > { %1700 = vperm.xlu1 %6031, %v1654_v44   ;;  %1695 = vperm.xlu0 %6030, %v1653_v45   ;;  %v1664_v45 = vld [vmem:[#allocation2 + $0x368] sm:$0xff] }
 0x154   : > { %v6783_v55 = vpop.permute.xlu1 %932  ;;  %v6785_v56 = vpop.permute.xlu0 %927 }
 0x155   : > { %1459 = vperm.xlu1 %6031, %v1413_v53   ;;  %1454 = vperm.xlu0 %6030, %v1412_v54  }
 0x158   : > { %v6787_v63 = vpop.permute.xlu1 %942  ;;  %v6789_v0 = vpop.permute.xlu0 %937 }
 0x159   : > { %8596 = vst [vmem:[#allocation24_spill] sm:$0xff] %v6787_v63  ;;  %8597 = vst [vmem:[#allocation25_spill] sm:$0xff] %v6789_v0  ;;  %1710 = vperm.xlu1 %6031, %v1656_v61   ;;  %1705 = vperm.xlu0 %6030, %v1655_v62   ;;  %v1425_v61 = vld [vmem:[#allocation2 + $0x278] sm:$0xff]  ;;  %v1424_v62 = vld [vmem:[#allocation2 + $0x270] sm:$0xff] }
 0x15a   : > { %v1440_v63 = vld [vmem:[#allocation2 + $0x2f0] sm:$0xff] }
 0x15c   : > { %v6791_v7 = vpop.permute.xlu1 %952  ;;  %v6793_v8 = vpop.permute.xlu0 %947 }
 0x15d   : > { %8598 = vst [vmem:[#allocation26_spill] sm:$0xff] %v6791_v7  ;;  %8599 = vst [vmem:[#allocation27_spill] sm:$0xff] %v6793_v8  ;;  %1469 = vperm.xlu1 %6031, %v1415_v1   ;;  %1464 = vperm.xlu0 %6030, %v1414_v2   ;;  %v1681_v8 = vld [vmem:[#allocation2 + $0x3f0] sm:$0xff] }
 0x160   : > { %v6795_v15 = vpop.permute.xlu1 %962  ;;  %v6797_v16 = vpop.permute.xlu0 %957 }
 0x161   : > { %8600 = vst [vmem:[#allocation28_spill] sm:$0xff] %v6795_v15  ;;  %8601 = vst [vmem:[#allocation29_spill] sm:$0xff] %v6797_v16  ;;  %1720 = vperm.xlu1 %6031, %v1658_v9   ;;  %1715 = vperm.xlu0 %6030, %v1657_v10   ;;  %v1427_v9 = vld [vmem:[#allocation2 + $0x288] sm:$0xff]  ;;  %v1426_v10 = vld [vmem:[#allocation2 + $0x280] sm:$0xff] }
 0x164   : > { %v6799_v20 = vpop.permute.xlu1 %972  ;;  %v6801_v21 = vpop.permute.xlu0 %967 }
 0x165   : > { %8602 = vst [vmem:[#allocation30_spill] sm:$0xff] %v6799_v20  ;;  %8603 = vst [vmem:[#allocation31_spill] sm:$0xff] %v6801_v21  ;;  %1479 = vperm.xlu1 %6031, %v1417_v17   ;;  %1474 = vperm.xlu0 %6030, %v1416_v18  }
 0x168   : > { %v6803_v27 = vpop.permute.xlu1 %982  ;;  %v6805_v28 = vpop.permute.xlu0 %977 }
 0x169   : > { %8604 = vst [vmem:[#allocation32_spill] sm:$0xff] %v6803_v27  ;;  %8605 = vst [vmem:[#allocation33_spill] sm:$0xff] %v6805_v28  ;;  %1730 = vperm.xlu1 %6031, %v1660_v25   ;;  %1725 = vperm.xlu0 %6030, %v1659_v26   ;;  %v1429_v26 = vld [vmem:[#allocation2 + $0x298] sm:$0xff] }
 0x16c   : > { %v6807_v33 = vpop.permute.xlu1 %992  ;;  %v6809_v34 = vpop.permute.xlu0 %987 }
 0x16d   : > { %8606 = vst [vmem:[#allocation34_spill] sm:$0xff] %v6807_v33  ;;  %8607 = vst [vmem:[#allocation35_spill] sm:$0xff] %v6809_v34  ;;  %1489 = vperm.xlu1 %6031, %v1419_v29   ;;  %1484 = vperm.xlu0 %6030, %v1418_v30   ;;  %v1428_v29 = vld [vmem:[#allocation2 + $0x290] sm:$0xff]  ;;  %v1919_v33 = vld [vmem:[#allocation2 + $0x558] sm:$0xff] }
 0x170   : > { %v6811_v37 = vpop.permute.xlu1 %1002  ;;  %v6813_v38 = vpop.permute.xlu0 %997 }
 0x171   : > { %8608 = vst [vmem:[#allocation36_spill] sm:$0xff] %v6811_v37  ;;  %8609 = vst [vmem:[#allocation37_spill] sm:$0xff] %v6813_v38  ;;  %1740 = vperm.xlu1 %6031, %v1662_v35   ;;  %1735 = vperm.xlu0 %6030, %v1661_v36   ;;  %v1911_v36 = vld [vmem:[#allocation2 + $0x518] sm:$0xff] }
 0x174   : > { %v6815_v43 = vpop.permute.xlu1 %1012  ;;  %v6817_v44 = vpop.permute.xlu0 %1007 }
 0x175   : > { %8610 = vst [vmem:[#allocation38_spill] sm:$0xff] %v6815_v43  ;;  %8611 = vst [vmem:[#allocation39_spill] sm:$0xff] %v6817_v44  ;;  %1499 = vperm.xlu1 %6031, %v1421_v41   ;;  %1494 = vperm.xlu0 %6030, %v1420_v42   ;;  %v1910_v41 = vld [vmem:[#allocation2 + $0x510] sm:$0xff] }
 0x176   : > { %v1677_v44 = vld [vmem:[#allocation2 + $0x3d0] sm:$0xff] }
 0x178   : > { %v6819_v49 = vpop.permute.xlu1 %1022  ;;  %v6821_v50 = vpop.permute.xlu0 %1017 }
 0x179   : > { %8612 = vst [vmem:[#allocation40_spill] sm:$0xff] %v6819_v49  ;;  %8613 = vst [vmem:[#allocation41_spill] sm:$0xff] %v6821_v50  ;;  %1750 = vperm.xlu1 %6031, %v1664_v45   ;;  %1745 = vperm.xlu0 %6030, %v1663_v46   ;;  %v1672_v46 = vld [vmem:[#allocation2 + $0x3a8] sm:$0xff] }
 0x17c   : > { %v6823_v53 = vpop.permute.xlu1 %1032  ;;  %v6825_v54 = vpop.permute.xlu0 %1027 }
 0x17d   : > { %8614 = vst [vmem:[#allocation42_spill] sm:$0xff] %v6823_v53  ;;  %8615 = vst [vmem:[#allocation43_spill] sm:$0xff] %v6825_v54  ;;  %1509 = vperm.xlu1 %6031, %v1423_v51   ;;  %1504 = vperm.xlu0 %6030, %v1422_v52   ;;  %v1671_v51 = vld [vmem:[#allocation2 + $0x3a0] sm:$0xff] }
 0x17e   : > { %v1916_v54 = vld [vmem:[#allocation2 + $0x540] sm:$0xff] }
 0x180   : > { %v6827_v59 = vpop.permute.xlu1 %1042  ;;  %v6829_v60 = vpop.permute.xlu0 %1037 }
 0x181   : > { %8616 = vst [vmem:[#allocation44_spill] sm:$0xff] %v6827_v59  ;;  %8617 = vst [vmem:[#allocation45_spill] sm:$0xff] %v6829_v60  ;;  %1760 = vperm.xlu1 %6031, %v1666_v57   ;;  %1755 = vperm.xlu0 %6030, %v1665_v58   ;;  %v1431_v58 = vld [vmem:[#allocation2 + $0x2a8] sm:$0xff]  ;;  %v6891_v59 = vld [vmem:[#allocation7] ss:$0 sm:$0xff] }
 0x182   : > { %v1917_v60 = vld [vmem:[#allocation2 + $0x548] sm:$0xff] }
 0x184   : > { %v6831_v1 = vpop.permute.xlu1 %1052  ;;  %v6833_v2 = vpop.permute.xlu0 %1047 }
 0x185   : > { %8618 = vst [vmem:[#allocation46_spill] sm:$0xff] %v6831_v1  ;;  %8619 = vst [vmem:[#allocation47_spill] sm:$0xff] %v6833_v2  ;;  %1519 = vperm.xlu1 %6031, %v1425_v61   ;;  %1514 = vperm.xlu0 %6030, %v1424_v62   ;;  %v1430_v61 = vld [vmem:[#allocation2 + $0x2a0] sm:$0xff]  ;;  %v1435_v2 = vld [vmem:[#allocation2 + $0x2c8] sm:$0xff] }
 0x186   : > { %v1434_v1 = vld [vmem:[#allocation2 + $0x2c0] sm:$0xff] }
 0x188   : > { %v6835_v5 = vpop.permute.xlu1 %1143  ;;  %v6837_v6 = vpop.permute.xlu0 %1138 }
 0x189   : > { %1770 = vperm.xlu1 %6031, %v1668_v3   ;;  %1765 = vperm.xlu0 %6030, %v1667_v4   ;;  %v1913_v4 = vld [vmem:[#allocation2 + $0x528] sm:$0xff] }
 0x18c   : > { %v6839_v11 = vpop.permute.xlu1 %1153  ;;  %v6841_v12 = vpop.permute.xlu0 %1148 }
 0x18d   : > { %1529 = vperm.xlu1 %6031, %v1427_v9   ;;  %1524 = vperm.xlu0 %6030, %v1426_v10   ;;  %v1912_v9 = vld [vmem:[#allocation2 + $0x520] sm:$0xff] }
 0x190   : > { %v6843_v17 = vpop.permute.xlu1 %1163  ;;  %v6845_v18 = vpop.permute.xlu0 %1158 }
 0x191   : > { %1947 = vperm.xlu1 %6031, %v1909_v13   ;;  %1942 = vperm.xlu0 %6030, %v1908_v14   ;;  %v1674_v14 = vld [vmem:[#allocation2 + $0x3b8] sm:$0xff] }
 0x194   : > { %v6847_v24 = vpop.permute.xlu1 %1173  ;;  %v6849_v25 = vpop.permute.xlu0 %1168 }
 0x195   : > { %1780 = vperm.xlu1 %6031, %v1670_v19   ;;  %1775 = vperm.xlu0 %6030, %v1669_v22   ;;  %v1673_v19 = vld [vmem:[#allocation2 + $0x3b0] sm:$0xff] }
 0x198   : > { %v6851_v30 = vpop.permute.xlu1 %1183  ;;  %v6853_v35 = vpop.permute.xlu0 %1178 }
 0x199   : > { %8620 = vst [vmem:[#allocation48_spill] sm:$0xff] %v6853_v35  ;;  %1539 = vperm.xlu1 %6031, %v1429_v26   ;;  %1534 = vperm.xlu0 %6030, %v1428_v29   ;;  %v1433_v26 = vld [vmem:[#allocation2 + $0x2b8] sm:$0xff]  ;;  %v1432_v29 = vld [vmem:[#allocation2 + $0x2b0] sm:$0xff] }
 0x19c   : > { %v6855_v42 = vpop.permute.xlu1 %1193  ;;  %v6857_v45 = vpop.permute.xlu0 %1188 }
 0x19d   : > { %8621 = vst [vmem:[#allocation49_spill] sm:$0xff] %v6855_v42  ;;  %8622 = vst [vmem:[#allocation50_spill] sm:$0xff] %v6857_v45  ;;  %1957 = vperm.xlu1 %6031, %v1911_v36   ;;  %1952 = vperm.xlu0 %6030, %v1910_v41  }
 0x1a0   : > { %v6859_v52 = vpop.permute.xlu1 %1203  ;;  %v6861_v57 = vpop.permute.xlu0 %1198 }
 0x1a1   : > { %8623 = vst [vmem:[#allocation51_spill] sm:$0xff] %v6859_v52  ;;  %8624 = vst [vmem:[#allocation52_spill] sm:$0xff] %v6861_v57  ;;  %1790 = vperm.xlu1 %6031, %v1672_v46   ;;  %1785 = vperm.xlu0 %6030, %v1671_v51   ;;  %v1915_v46 = vld [vmem:[#allocation2 + $0x538] sm:$0xff]  ;;  %v1914_v51 = vld [vmem:[#allocation2 + $0x530] sm:$0xff] }
 0x1a2   : > { %v1682_v57 = vld [vmem:[#allocation2 + $0x3f8] sm:$0xff] }
 0x1a3   : > { %v1441_v52 = vld [vmem:[#allocation2 + $0x2f8] sm:$0xff] }
 0x1a4   : > { %v6863_v62 = vpop.permute.xlu1 %1213  ;;  %v6865_v3 = vpop.permute.xlu0 %1208 }
 0x1a5   : > { %8625 = vst [vmem:[#allocation53_spill] sm:$0xff] %v6863_v62  ;;  %8626 = vst [vmem:[#allocation54_spill] sm:$0xff] %v6865_v3  ;;  %1549 = vperm.xlu1 %6031, %v1431_v58   ;;  %1544 = vperm.xlu0 %6030, %v1430_v61   ;;  %v1920_v3 = vld [vmem:[#allocation2 + $0x560] sm:$0xff] }
 0x1a8   : > { %v6867_v10 = vpop.permute.xlu1 %1223  ;;  %v6869_v13 = vpop.permute.xlu0 %1218 }
 0x1a9   : > { %8627 = vst [vmem:[#allocation55_spill] sm:$0xff] %v6867_v10  ;;  %8628 = vst [vmem:[#allocation56_spill] sm:$0xff] %v6869_v13  ;;  %1967 = vperm.xlu1 %6031, %v1913_v4   ;;  %1962 = vperm.xlu0 %6030, %v1912_v9   ;;  %v1676_v4 = vld [vmem:[#allocation2 + $0x3c8] sm:$0xff]  ;;  %v1675_v9 = vld [vmem:[#allocation2 + $0x3c0] sm:$0xff] }
 0x1ac   : > { %v6871_v22 = vpop.permute.xlu1 %1233  ;;  %v6873_v23 = vpop.permute.xlu0 %1228 }
 0x1ad   : > { %8629 = vst [vmem:[#allocation57_spill] sm:$0xff] %v6871_v22  ;;  %8630 = vst [vmem:[#allocation58_spill] sm:$0xff] %v6873_v23  ;;  %1800 = vperm.xlu1 %6031, %v1674_v14   ;;  %1795 = vperm.xlu0 %6030, %v1673_v19  }
 0x1b0   : > { %v6875_v36 = vpop.permute.xlu1 %1243  ;;  %v6877_v41 = vpop.permute.xlu0 %1238 }
 0x1b1   : > { %8631 = vst [vmem:[#allocation59_spill] sm:$0xff] %v6875_v36  ;;  %8632 = vst [vmem:[#allocation60_spill] sm:$0xff] %v6877_v41  ;;  %1559 = vperm.xlu1 %6031, %v1433_v26   ;;  %1554 = vperm.xlu0 %6030, %v1432_v29  }
 0x1b4   : > { %v6879_v58 = vpop.permute.xlu1 %1253  ;;  %v6881_v61 = vpop.permute.xlu0 %1248 }
 0x1b5   : > { %8633 = vst [vmem:[#allocation61_spill] sm:$0xff] %v6879_v58  ;;  %8634 = vst [vmem:[#allocation62_spill] sm:$0xff] %v6881_v61  ;;  %1977 = vperm.xlu1 %6031, %v1915_v46   ;;  %1972 = vperm.xlu0 %6030, %v1914_v51   ;;  %v1437_v61 = vld [vmem:[#allocation2 + $0x2d8] sm:$0xff] }
 0x1b8   : > { %v6883_v14 = vpop.permute.xlu1 %1263  ;;  %v6885_v19 = vpop.permute.xlu0 %1258 }
 0x1b9   : > { %8635 = vst [vmem:[#allocation63_spill] sm:$0xff] %v6883_v14  ;;  %8636 = vst [vmem:[#allocation64_spill] sm:$0xff] %v6885_v19  ;;  %1810 = vperm.xlu1 %6031, %v1676_v4   ;;  %1805 = vperm.xlu0 %6030, %v1675_v9  }
 0x1bc   : > { %v6887_v26 = vpop.permute.xlu1 %1273  ;;  %v6889_v29 = vpop.permute.xlu0 %1268 }
 0x1bd   : > { %8637 = vst [vmem:[#allocation65_spill] sm:$0xff] %v6887_v26  ;;  %8638 = vst [vmem:[#allocation66_spill] sm:$0xff] %v6889_v29  ;;  %1569 = vperm.xlu1 %6031, %v1435_v2   ;;  %1564 = vperm.xlu0 %6030, %v1434_v1   ;;  %v6893_v46 = vpop.f32.mrb[0].mxu0  ;;  %v5787_v51 = vpop.f32.mrb[0].mxu1 }
 0x1be   : > { %v6896_v53 = vadd.f32 %v5787_v51, %v6891_v59  ;;  %v6898_v4 = vpop.f32.mrb[1].mxu0  ;;  %v6900_v9 = vpop.f32.mrb[1].mxu1  ;;  %v1678_v51 = vld [vmem:[#allocation2 + $0x3d8] sm:$0xff] }
 0x1bf   : > { %8640 = vst [vmem:[#allocation68_spill] sm:$0xff] %v6900_v9  ;;  %v5772_v29 = vpop.f32.mrb[2].mxu0  ;;  %v5788_v50 = vpop.f32.mrb[2].mxu1  ;;  %v638_v10 = vadd.f32 %v6891_v59, %v6898_v4 }
 0x1c0   : > { %8639 = vst [vmem:[#allocation67_spill] sm:$0xff] %v6896_v53  ;;  %v6902_v49 = vpop.permute.xlu1 %1283  ;;  %v6904_v26 = vpop.permute.xlu0 %1278  ;;  %v6907_v1 = vadd.f32 %v5788_v50, %v6891_v59  ;;  %v1438_v53 = vld [vmem:[#allocation2 + $0x2e0] sm:$0xff] }
 0x1c1   : > { %8641 = vst [vmem:[#allocation69_spill] sm:$0xff] %v6902_v49  ;;  %8642 = vst [vmem:[#allocation70_spill] sm:$0xff] %v6904_v26  ;;  %1987 = vperm.xlu1 %6031, %v1917_v60   ;;  %1982 = vperm.xlu0 %6030, %v1916_v54   ;;  %v640_v2 = vpop.f32.mrb[3].mxu0  ;;  %v6909_v19 = vpop.f32.mrb[3].mxu1  ;;  %v1436_v60 = vld [vmem:[#allocation2 + $0x2d0] sm:$0xff] }
 0x1c2   : > { %8643 = vst [vmem:[#allocation71_spill] sm:$0xff] %v6907_v1  ;;  %8644 = vst [vmem:[#allocation72_spill] sm:$0xff] %v6909_v19 }
 0x1c4   : > { %v6911_v14 = vpop.permute.xlu1 %1293  ;;  %v6913_v43 = vpop.permute.xlu0 %1288 }
 0x1c5   : > { %8645 = vst [vmem:[#allocation73_spill] sm:$0xff] %v6911_v14  ;;  %8646 = vst [vmem:[#allocation74_spill] sm:$0xff] %v6913_v43  ;;  %1820 = vperm.xlu1 %6031, %v1678_v51   ;;  %1815 = vperm.xlu0 %6030, %v1677_v44   ;;  %v6915_v49 = vpop.f32.mrb[4].mxu0  ;;  %v5791_v26 = vpop.f32.mrb[4].mxu1 }
 0x1c6   : > { %v6918_v54 = vadd.f32 %v5791_v26, %v6891_v59  ;;  %v6920_v50 = vpop.f32.mrb[5].mxu0  ;;  %v717_v58 = vpop.f32.mrb[5].mxu1 }
 0x1c7   : > { %v6923_v37 = vadd.f32 %v6891_v59, %v717_v58  ;;  %v6929_v51 = vpop.f32.mrb[6].mxu0  ;;  %v5792_v44 = vpop.f32.mrb[6].mxu1 }
 0x1c8   : > { %8647 = vst [vmem:[#allocation75_spill] sm:$0xff] %v6918_v54  ;;  %v6925_v38 = vpop.permute.xlu1 %1685  ;;  %v6927_v14 = vpop.permute.xlu0 %1444  ;;  %v6932_v43 = vadd.f32 %v5792_v44, %v6891_v59  ;;  %v1918_v54 = vld [vmem:[#allocation2 + $0x550] sm:$0xff]  ;;  %v1679_v44 = vld [vmem:[#allocation2 + $0x3e0] sm:$0xff] }
 0x1c9   : > { %8648 = vst [vmem:[#allocation76_spill] sm:$0xff] %v6923_v37  ;;  %1579 = vperm.xlu1 %6031, %v1437_v61   ;;  %1574 = vperm.xlu0 %6030, %v1436_v60   ;;  %v6934_v26 = vpop.f32.mrb[7].mxu0  ;;  %v720_v41 = vpop.f32.mrb[7].mxu1  ;;  %v1680_v60 = vld [vmem:[#allocation2 + $0x3e8] sm:$0xff]  ;;  %v828_v37 = vlaneseq }
 0x1ca   : > { %8649 = vst [vmem:[#allocation77_spill] sm:$0xff] %v6932_v43  ;;  %v6937_v58 = vadd.f32 %v6891_v59, %v720_v41 }
 0x1cb   : > { %v6979_v1 = vshrl.u32 %v828_v37, 7 }
 0x1cc   : > { %8650 = vst [vmem:[#allocation78_spill] sm:$0xff] %v6937_v58  ;;  %v6939_v36 = vpop.permute.xlu1 %1449  ;;  %v6941_v34 = vpop.permute.xlu0 %1690 }
 0x1cd   : > { %1997 = vperm.xlu1 %6031, %v1919_v33   ;;  %1992 = vperm.xlu0 %6030, %v1918_v54   ;;  %v6943_v23 = vpop.f32.mrb[8].mxu0  ;;  %v5795_v61 = vpop.f32.mrb[8].mxu1  ;;  %v6096_v33 = vld [vmem:[#allocation8 + $0x1c0] sm:$0xff]   ;;  %v641_v54 = vadd.f32 %v6891_v59, %v640_v2  ;;  %v649_v2 = vadd.f32 %v5772_v29, %v6891_v59  ;;  %vm830_vm0 = vcmp.lt.s32.totalorder %v6979_v1, 1  ;;  %vm1376_vm1 = vcmp.lt.s32.totalorder %v6979_v1, 7 }
 0x1ce   : > { %v6946_v43 = vadd.f32 %v5795_v61, %v6891_v59  ;;  %v6948_v22 = vpop.f32.mrb[9].mxu0  ;;  %v733_v27 = vpop.f32.mrb[9].mxu1  ;;  %5593 = vmatprep.subr.bf16.mxu0 %v6096_v33  ;;  %v1921_v29 = vld [vmem:[#allocation2 + $0x568] sm:$0xff] }
 0x1cf   : > { %v6951_v41 = vadd.f32 %v6891_v59, %v733_v27  ;;  %v6958_v13 = vpop.f32.mrb[10].mxu0  ;;  %v5796_v21 = vpop.f32.mrb[10].mxu1 }
 0x1d0   : > { %8651 = vst [vmem:[#allocation79_spill] sm:$0xff] %v6946_v43  ;;  %v6953_v28 = vpop.permute.xlu1 %1700  ;;  %v6955_v58 = vpop.permute.xlu0 %1695  ;;  %v6961_v61 = vadd.f32 %v5796_v21, %v6891_v59 }
 0x1d1   : > { %8652 = vst [vmem:[#allocation80_spill] sm:$0xff] %v6951_v41  ;;  %1830 = vperm.xlu1 %6031, %v1680_v60   ;;  %1825 = vperm.xlu0 %6030, %v1679_v44   ;;  %v6963_v43 = vpop.f32.mrb[11].mxu0  ;;  %v736_v27 = vpop.f32.mrb[11].mxu1  ;;  %v1439_v41 = vld [vmem:[#allocation2 + $0x2e8] sm:$0xff]  ;;  %v646_v60 = vadd.f32 %v6893_v46, %v6891_v59 }
 0x1d2   : > { %8653 = vst [vmem:[#allocation81_spill] sm:$0xff] %v6961_v61  ;;  %v6969_v20 = vadd.f32 %v6891_v59, %v736_v27  ;;  %v6977_v61 = vmax.f32 %v641_v54, 0.0  ;;  %v6983_v27 = vmax.f32 %v638_v10, 0.0 }
 0x1d3   : > { %v6990_v54 = vmax.f32 %v646_v60, 0.0 }
 0x1d4   : > { %8654 = vst [vmem:[#allocation82_spill] sm:$0xff] %v6969_v20  ;;  %v6973_v44 = vpop.permute.xlu1 %1459  ;;  %v6975_v21 = vpop.permute.xlu0 %1454  ;;  %8655 = vst [vmem:[#allocation83_spill] sm:$0xff] %v6977_v61  ;;  %v6985_v20 = vmax.f32 %v649_v2, 0.0  ;;  %v796_v10 = vrot.slane %v6983_v27, 7  ;;  %v797_v2 = vrot.slane %v6977_v61, 7 }
 0x1d5   : > { %1589 = vperm.xlu1 %6031, %v1439_v41   ;;  %1584 = vperm.xlu0 %6030, %v1438_v53   ;;  %v6981_v33 = vpop.f32.mrb[12].mxu0  ;;  %v5799_v4 = vpop.f32.mrb[12].mxu1  ;;  %8657 = vst [vmem:[#allocation85_spill] sm:$0xff] %v6983_v27 }
 0x1d6   : > { %8656 = vst [vmem:[#allocation84_spill] sm:$0xff] %v6981_v33  ;;  %v758_v46 = vadd.f32 %v5799_v4, %v6891_v59  ;;  %v6988_v62 = vpop.f32.mrb[13].mxu0  ;;  %v749_v15 = vpop.f32.mrb[13].mxu1  ;;  %v7029_v7 = vsel %vm830_vm0, %v796_v10, %v797_v2 }
 0x1d7   : > { %v6993_v37 = vadd.f32 %v6891_v59, %v749_v15  ;;  %v7004_v4 = vpop.f32.mrb[14].mxu0  ;;  %v5800_v9 = vpop.f32.mrb[14].mxu1  ;;  %v798_v15 = vrot.slane %v6990_v54, 7  ;;  %8663 = vst [vmem:[#allocation91_spill] sm:$0xff] %v7029_v7 }
 0x1d8   : > { %v6995_v53 = vpop.permute.xlu1 %1710  ;;  %v6997_v41 = vpop.permute.xlu0 %1705  ;;  %v7002_v16 = vmax.f32 %v758_v46, 0.0  ;;  %8660 = vst [vmem:[#allocation88_spill] sm:$0xff] %v7004_v4  ;;  %v761_v60 = vadd.f32 %v5800_v9, %v6891_v59  ;;  %v654_v46 = vadd.f32 %v6891_v59, %v6920_v50  ;;  %v657_v50 = vadd.f32 %v6891_v59, %v6934_v26 }
 0x1d9   : > { %8658 = vst [vmem:[#allocation86_spill] sm:$0xff] %v6993_v37  ;;  %2007 = vperm.xlu1 %6031, %v1921_v29   ;;  %2002 = vperm.xlu0 %6030, %v1920_v3   ;;  %v7009_v37 = vpop.f32.mrb[15].mxu0  ;;  %v752_v19 = vpop.f32.mrb[15].mxu1 }
 0x1da   : > { %8659 = vst [vmem:[#allocation87_spill] sm:$0xff] %v7002_v16  ;;  %8661 = vst [vmem:[#allocation89_spill] sm:$0xff] %v7009_v37  ;;  %v826_v4 = vrot.slane %v7002_v16, 7  ;;  %v7018_v45 = vmax.f32 %v761_v60, 0.0  ;;  %v753_v9 = vadd.f32 %v6891_v59, %v752_v19  ;;  %v1296_v60 = vmul.f32 %v6837_v6, %v7002_v16 }
 0x1db   : > { %v7040_v37 = vmax.f32 %v654_v46, 0.0 }
 0x1dc   : > { %8662 = vst [vmem:[#allocation90_spill] sm:$0xff] %v7018_v45  ;;  %v7021_v33 = vpop.permute.xlu1 %1469  ;;  %v7023_v42 = vpop.permute.xlu0 %1464  ;;  %v1375_v19 = vrot.slane %v7018_v45, 1  ;;  %v7035_v29 = vmax.f32 %v753_v9, 0.0  ;;  %v1297_v26 = vmul.f32 %v6835_v5, %v7018_v45  ;;  %v827_v0 = vrot.slane %v7018_v45, 7 }
 0x1dd   : > { %1840 = vperm.xlu1 %6031, %v1682_v57   ;;  %1835 = vperm.xlu0 %6030, %v1681_v8   ;;  %8664 = vst [vmem:[#allocation92_spill] sm:$0xff] %v7040_v37  ;;  %v1844_v57 = vmul.f32 %v6941_v34, %v7029_v7  ;;  %v8665_v8 = vrot.slane %v6985_v20, 7  ;;  %v7052_v9 = vsel %vm830_vm0, %v797_v2, %v798_v15 }
 0x1de   : > { %v8457_v3 = vrot.slane %v7035_v29, 7  ;;  %v1328_v46 = vpack.c.bf16 %v1297_v26, %v1296_v60  ;;  %v7061_v34 = vsel %vm830_vm0, %v827_v0, %v796_v10  ;;  %v7065_v35 = vsel %vm830_vm0, %v826_v4, %v827_v0  ;;  %v1923_v10 = vld [vmem:[#allocation2 + $0x578] sm:$0xff]  ;;  %v1922_v26 = vld [vmem:[#allocation2 + $0x570] sm:$0xff] }
 0x1df   : > { %v7048_v6 = vsel %vm830_vm0, %v798_v15, %v8665_v8  ;;  %8666 = vst [vmem:[#allocation93_spill] sm:$0xff] %v7061_v34  ;;  %8667 = vst [vmem:[#allocation94_spill] sm:$0xff] %v7065_v35  ;;  %v7067_v8 = vmax.f32 %v657_v50, 0.0  ;;  %v1843_v15 = vmul.f32 %v6925_v38, %v7061_v34  ;;  %v1299_v60 = vmul.f32 %v6839_v11, %v6977_v61 }
 0x1e0   : > { %v7055_v5 = vpop.permute.xlu1 %1720  ;;  %v7057_v45 = vpop.permute.xlu0 %1715  ;;  %v1846_v2 = vmul.f32 %v6953_v28, %v7048_v6  ;;  %3486 = vmatprep.mubr.bf16.mxu1 %v1328_v46  ;;  %v7079_v0 = vsel %vm830_vm0, %v8457_v3, %v826_v4  ;;  %v1056_v50 = vmul.f32 %v6777_v40, %v7065_v35  ;;  %v8669_v28 = vrot.slane %v7002_v16, 1 }
 0x1e1   : > { %1599 = vperm.xlu1 %6031, %v1441_v52   ;;  %1594 = vperm.xlu0 %6030, %v1440_v63   ;;  %8668 = vst [vmem:[#allocation95_spill] sm:$0xff] %v7079_v0  ;;  %v8671_v38 = vrot.slane %v6983_v27, 1  ;;  %v1845_v52 = vmul.f32 %v6955_v58, %v7052_v9  ;;  %v1875_v4 = vpack.c.bf16 %v1844_v57, %v1843_v15  ;;  %v800_v57 = vrot.slane %v7040_v37, 7 }
 0x1e2   : > { %v7087_v63 = vsel %vm1376_vm1, %v8669_v28, %v1375_v19  ;;  %v1055_v40 = vmul.f32 %v6773_v32, %v7079_v0  ;;  %v665_v28 = vadd.f32 %v6929_v51, %v6891_v59  ;;  %v1298_v58 = vmul.f32 %v6841_v12, %v6983_v27  ;;  %v6089_v0 = vld [vmem:[#allocation8 + $0x100] sm:$0xff]  }
 0x1e3   : > { %8670 = vst [vmem:[#allocation96_spill] sm:$0xff] %v7087_v63  ;;  %v7093_v11 = vsel %vm1376_vm1, %v1375_v19, %v8671_v38  ;;  %v1602_v46 = vmul.f32 %v6927_v14, %v7087_v63  ;;  %3647 = vmatprep.mubr.bf16.mxu0 %v1875_v4  ;;  %v662_v14 = vadd.f32 %v6915_v49, %v6891_v59  ;;  %v8466_v51 = vrot.slane %v7067_v8, 7  ;;  %v2391_v63 = vld [vmem:[#allocation2 + $0x708] sm:$0xff] }
 0x1e4   : > { %8672 = vst [vmem:[#allocation97_spill] sm:$0xff] %v7093_v11  ;;  %v7103_v3 = vpop.permute.xlu1 %1479  ;;  %v7105_v16 = vpop.permute.xlu0 %1474  ;;  %v1603_v19 = vmul.f32 %v6939_v36, %v7093_v11  ;;  %v1087_v32 = vpack.c.bf16 %v1056_v50, %v1055_v40  ;;  %v1329_v38 = vpack.c.bf16 %v1299_v60, %v1298_v58  ;;  %v1876_v35 = vpack.c.bf16 %v1846_v2, %v1845_v52  ;;  %v2390_v60 = vld [vmem:[#allocation2 + $0x700] sm:$0xff] }
 0x1e5   : > { %2017 = vperm.xlu1 %6031, %v1923_v10   ;;  %2012 = vperm.xlu0 %6030, %v1922_v26   ;;  %v8673_v36 = vrot.slane %v6990_v54, 1  ;;  %v8674_v12 = vrot.slane %v6977_v61, 1  ;;  %v8677_v49 = vrot.slane %v6983_v27, 1  ;;  %v6090_v26 = vld [vmem:[#allocation8 + $0x148] sm:$0xff]   ;;  %v6097_v2 = vld [vmem:[#allocation8 + $0x180] sm:$0xff]   ;;  %v7131_v52 = vmax.f32 %v665_v28, 0.0 }
 0x1e6   : > { %v1634_v15 = vpack.c.bf16 %v1603_v19, %v1602_v46  ;;  %3487 = vmatmul.mubr.bf16.vlgmr.msra.gmra.mrb[16].mxu1 %v1087_v32  ;;  %v6100_v19 = vld [vmem:[#allocation8 + $0x1c8] sm:$0xff]   ;;  %v8680_v58 = vrot.slane %v6985_v20, 7  ;;  %v1347_v32 = vrot.slane %v6985_v20, 1  ;;  %v1057_v28 = vmul.f32 %v6771_v31, %v7061_v34 }
 0x1e7   : > { %v7121_v4 = vsel %vm1376_vm1, %v8674_v12, %v8673_v36  ;;  %v8676_v10 = vmov %v8674_v12  ;;  %8679 = vst [vmem:[#allocation100_spill] sm:$0xff] %v7131_v52  ;;  %3494 = vmatprep.mubr.bf16.mxu1 %v1329_v38  ;;  %v7148_v38 = vmax.f32 %v662_v14, 0.0  ;;  %5482 = vmatpush3.bf16.msra.mxu1 %v6089_v0  ;;  %v6091_v31 = vld [vmem:[#allocation8 + $0x108] sm:$0xff]  }
 0x1e8   : > { %8675 = vst [vmem:[#allocation98_spill] sm:$0xff] %v7121_v4  ;;  %v7129_v50 = vsel %vm1376_vm1, %v8677_v49, %v8676_v10  ;;  %3648 = vmatmul.mubr.bf16.vlgmr.msra.gmra.mrb[16].mxu0 %v1634_v15  ;;  %v7133_v40 = vpop.permute.xlu1 %1730  ;;  %v7135_v46 = vpop.permute.xlu0 %1725  ;;  %v7141_v36 = vsel %vm830_vm0, %v8680_v58, %v800_v57  ;;  %v1301_v15 = vmul.f32 %v6843_v17, %v6985_v20  ;;  %v2149_v49 = vld [vmem:[#allocation2 + $0x600] sm:$0xff]  ;;  %v6092_v58 = vld [vmem:[#allocation8 + $0x150] sm:$0xff]   ;;  %v1925_v0 = vld [vmem:[#allocation2 + $0x588] sm:$0xff] }
 0x1e9   : > { %8678 = vst [vmem:[#allocation99_spill] sm:$0xff] %v7129_v50  ;;  %8681 = vst [vmem:[#allocation101_spill] sm:$0xff] %v7141_v36  ;;  %3655 = vmatprep.mubr.bf16.mxu0 %v1876_v35  ;;  %2429 = vperm.xlu1 %6031, %v2391_v63   ;;  %v1605_v12 = vmul.f32 %v6973_v44, %v7121_v4  ;;  %v1604_v10 = vmul.f32 %v6975_v21, %v7129_v50  ;;  %v2150_v63 = vld [vmem:[#allocation2 + $0x608] sm:$0xff] }
 0x1ea   : > { %8682 = vst [vmem:[#allocation102_spill] sm:$0xff] %v7148_v38  ;;  %v7158_v35 = vsel %vm830_vm0, %v800_v57, %v8466_v51  ;;  %2424 = vperm.xlu0 %6030, %v2390_v60   ;;  %v1847_v14 = vmul.f32 %v6997_v41, %v7141_v36  ;;  %v1058_v21 = vmul.f32 %v6775_v39, %v7029_v7  ;;  %v802_v57 = vrot.slane %v7148_v38, 7 }
 0x1eb   : > { %8683 = vst [vmem:[#allocation103_spill] sm:$0xff] %v7158_v35  ;;  %v1848_v17 = vmul.f32 %v6995_v53, %v7158_v35  ;;  %5483 = vmatprep.subr.bf16.mxu1 %v6090_v26  ;;  %5594 = vmatpush3.bf16.msra.mxu0 %v6097_v2  ;;  %v1300_v53 = vmul.f32 %v6845_v18, %v6990_v54  ;;  %v8684_v7 = vrot.slane %v7040_v37, 1 }
 0x1ec   : > { %v7169_v60 = vpop.permute.xlu1 %1489  ;;  %v7171_v51 = vpop.permute.xlu0 %1484  ;;  %5595 = vmatprep.subr.bf16.mxu0 %v6100_v19  ;;  %v670_v41 = vadd.f32 %v6891_v59, %v6948_v22  ;;  %v1088_v39 = vpack.c.bf16 %v1058_v21, %v1057_v28  ;;  %v673_v26 = vadd.f32 %v6891_v59, %v6963_v43  ;;  %v1635_v2 = vpack.c.bf16 %v1605_v12, %v1604_v10  ;;  %v1924_v43 = vld [vmem:[#allocation2 + $0x580] sm:$0xff]  ;;  %v6093_v28 = vld [vmem:[#allocation8 + $0x110] sm:$0xff]  }
 0x1ed   : > { %2188 = vperm.xlu1 %6031, %v2150_v63   ;;  %v1330_v44 = vpack.c.bf16 %v1301_v15, %v1300_v53  ;;  %5484 = vmatpush3.bf16.msra.mxu1 %v6091_v31  ;;  %v1877_v34 = vpack.c.bf16 %v1848_v17, %v1847_v14  ;;  %v7183_v18 = vsel %vm1376_vm1, %v1347_v32, %v8684_v7  ;;  %v8685_v19 = vrot.slane %v6990_v54, 1  ;;  %v6101_v15 = vld [vmem:[#allocation8 + $0x188] sm:$0xff]   ;;  %v6094_v31 = vld [vmem:[#allocation8 + $0x158] sm:$0xff]  }
 0x1ee   : > { %2183 = vperm.xlu0 %6030, %v2149_v49   ;;  %3495 = vmatmul.mubr.bf16.gmra.mrb[20].mxu1 %v1088_v39  ;;  %v8686_v12 = vrot.slane %v7131_v52, 7  ;;  %v8689_v17 = vrot.slane %v7067_v8, 7  ;;  %v1059_v49 = vmul.f32 %v6781_v48, %v7052_v9  ;;  %v7213_v21 = vmax.f32 %v673_v26, 0.0 }
 0x1ef   : > { %v7189_v22 = vsel %vm1376_vm1, %v8685_v19, %v1347_v32  ;;  %5485 = vmatprep.subr.bf16.mxu1 %v6092_v58  ;;  %3502 = vmatprep.mubr.bf16.mxu1 %v1330_v44  ;;  %v7201_v32 = vmax.f32 %v670_v41, 0.0  ;;  %v1060_v44 = vmul.f32 %v6779_v47, %v7048_v6  ;;  %v1607_v58 = vmul.f32 %v7021_v33, %v7183_v18  ;;  %v2393_v41 = vld [vmem:[#allocation2 + $0x718] sm:$0xff]  ;;  %v2392_v33 = vld [vmem:[#allocation2 + $0x710] sm:$0xff] }
 0x1f0   : > { %v7195_v10 = vsel %vm830_vm0, %v802_v57, %v8686_v12  ;;  %3656 = vmatmul.mubr.bf16.gmra.mrb[20].mxu0 %v1635_v2  ;;  %v7197_v7 = vpop.permute.xlu1 %1740  ;;  %v7199_v63 = vpop.permute.xlu0 %1735  ;;  %v7207_v14 = vsel %vm830_vm0, %v8689_v17, %v802_v57  ;;  %8691 = vst [vmem:[#allocation107_spill] sm:$0xff] %v7213_v21  ;;  %v1606_v53 = vmul.f32 %v7023_v42, %v7189_v22  ;;  %v6103_v57 = vld [vmem:[#allocation8 + $0x1d0] sm:$0xff]   ;;  %v8470_v39 = vrot.slane %v7148_v38, 1 }
 0x1f1   : > { %8687 = vst [vmem:[#allocation104_spill] sm:$0xff] %v7195_v10  ;;  %8688 = vst [vmem:[#allocation105_spill] sm:$0xff] %v7201_v32  ;;  %3663 = vmatprep.mubr.bf16.mxu0 %v1877_v34  ;;  %2027 = vperm.xlu1 %6031, %v1925_v0   ;;  %v1303_v34 = vmul.f32 %v6847_v24, %v7067_v8  ;;  %v1850_v48 = vmul.f32 %v7055_v5, %v7195_v10  ;;  %v1349_v0 = vrot.slane %v7067_v8, 1  ;;  %v2151_v17 = vld [vmem:[#allocation2 + $0x610] sm:$0xff] }
 0x1f2   : > { %8690 = vst [vmem:[#allocation106_spill] sm:$0xff] %v7207_v14  ;;  %2022 = vperm.xlu0 %6030, %v1924_v43   ;;  %v1849_v47 = vmul.f32 %v7057_v45, %v7207_v14  ;;  %5486 = vmatpush3.bf16.msra.mxu1 %v6093_v28  ;;  %v678_v42 = vadd.f32 %v6943_v23, %v6891_v59  ;;  %v804_v2 = vrot.slane %v7201_v32, 7  ;;  %v8469_v28 = vrot.slane %v7213_v21, 7 }
 0x1f3   : > { %5596 = vmatpush3.bf16.msra.mxu0 %v6101_v15  ;;  %v1302_v5 = vmul.f32 %v6849_v25, %v7040_v37  ;;  %5487 = vmatprep.subr.bf16.mxu1 %v6094_v31  ;;  %v681_v45 = vadd.f32 %v6958_v13, %v6891_v59  ;;  %v1089_v19 = vpack.c.bf16 %v1060_v44, %v1059_v49  ;;  %v2152_v15 = vld [vmem:[#allocation2 + $0x618] sm:$0xff]  ;;  %v8692_v13 = vrot.slane %v7040_v37, 1 }
 0x1f4   : > { %v7229_v26 = vpop.permute.xlu1 %1499  ;;  %v7231_v24 = vpop.permute.xlu0 %1494  ;;  %v1636_v43 = vpack.c.bf16 %v1607_v58, %v1606_v53  ;;  %5597 = vmatprep.subr.bf16.mxu0 %v6103_v57  ;;  %v1878_v12 = vpack.c.bf16 %v1850_v48, %v1849_v47  ;;  %v7243_v25 = vsel %vm1376_vm1, %v1349_v0, %v8470_v39  ;;  %v6095_v49 = vld [vmem:[#allocation8 + $0x118] sm:$0xff]   ;;  %v7251_v44 = vmax.f32 %v678_v42, 0.0 }
 0x1f5   : > { %2439 = vperm.xlu1 %6031, %v2393_v41   ;;  %v1331_v23 = vpack.c.bf16 %v1303_v34, %v1302_v5  ;;  %v7249_v31 = vsel %vm1376_vm1, %v8692_v13, %v1349_v0  ;;  %v6098_v41 = vld [vmem:[#allocation8 + $0x160] sm:$0xff]   ;;  %v6105_v34 = vld [vmem:[#allocation8 + $0x190] sm:$0xff]   ;;  %v7257_v57 = vmax.f32 %v681_v45, 0.0  ;;  %v8695_v48 = vrot.slane %v7131_v52, 7  ;;  %v6107_v42 = vld [vmem:[#allocation8 + $0x1d8] sm:$0xff]  }
 0x1f6   : > { %2434 = vperm.xlu0 %6030, %v2392_v33   ;;  %3503 = vmatmul.mubr.bf16.gmra.mrb[24].mxu1 %v1089_v19  ;;  %8693 = vst [vmem:[#allocation108_spill] sm:$0xff] %v7251_v44  ;;  %v1351_v0 = vrot.slane %v7131_v52, 1  ;;  %v1062_v33 = vmul.f32 %v6783_v55, %v7158_v35  ;;  %v1609_v5 = vmul.f32 %v7103_v3, %v7243_v25  ;;  %v8713_v35 = vrot.slane %v7251_v44, 1 }
 0x1f7   : > { %3510 = vmatprep.mubr.bf16.mxu1 %v1331_v23  ;;  %8694 = vst [vmem:[#allocation109_spill] sm:$0xff] %v7257_v57  ;;  %v7263_v47 = vsel %vm830_vm0, %v8695_v48, %v804_v2  ;;  %v1608_v45 = vmul.f32 %v7105_v16, %v7249_v31  ;;  %v7276_v19 = vsel %vm830_vm0, %v804_v2, %v8469_v28  ;;  %v1926_v16 = vld [vmem:[#allocation2 + $0x590] sm:$0xff]  ;;  %v806_v28 = vrot.slane %v7251_v44, 7 }
 0x1f8   : > { %3664 = vmatmul.mubr.bf16.gmra.mrb[24].mxu0 %v1636_v43  ;;  %v7253_v58 = vpop.permute.xlu1 %1750  ;;  %v7255_v53 = vpop.permute.xlu0 %1745  ;;  %8696 = vst [vmem:[#allocation110_spill] sm:$0xff] %v7263_v47  ;;  %8697 = vst [vmem:[#allocation111_spill] sm:$0xff] %v7276_v19  ;;  %v1927_v43 = vld [vmem:[#allocation2 + $0x598] sm:$0xff]  ;;  %v1305_v23 = vmul.f32 %v6851_v30, %v7131_v52  ;;  %v1852_v55 = vmul.f32 %v7133_v40, %v7276_v19  ;;  %v1851_v3 = vmul.f32 %v7135_v46, %v7263_v47  ;;  %v8698_v30 = vld [vmem:[#allocation48_spill] sm:$0xff] }
 0x1f9   : > { %3671 = vmatprep.mubr.bf16.mxu0 %v1878_v12  ;;  %2198 = vperm.xlu1 %6031, %v2152_v15   ;;  %v1061_v12 = vmul.f32 %v6785_v56, %v7141_v36  ;;  %v686_v2 = vadd.f32 %v6891_v59, %v6988_v62  ;;  %v1304_v40 = vmul.f32 %v8698_v30, %v7148_v38  ;;  %v8699_v46 = vld [vmem:[#allocation89_spill] sm:$0xff]  ;;  %v8475_v56 = vrot.slane %v7257_v57, 7 }
 0x1fa   : > { %2193 = vperm.xlu0 %6030, %v2151_v17   ;;  %5488 = vmatpush3.bf16.msra.mxu1 %v6095_v49  ;;  %v689_v48 = vadd.f32 %v6891_v59, %v8699_v46  ;;  %v1637_v62 = vpack.c.bf16 %v1609_v5, %v1608_v45  ;;  %v2395_v15 = vld [vmem:[#allocation2 + $0x728] sm:$0xff]  ;;  %v1879_v11 = vpack.c.bf16 %v1852_v55, %v1851_v3  ;;  %v8700_v52 = vrot.slane %v7201_v32, 1  ;;  %v6109_v5 = vld [vmem:[#allocation8 + $0x198] sm:$0xff]  }
 0x1fb   : > { %5489 = vmatprep.subr.bf16.mxu1 %v6098_v41  ;;  %5598 = vmatpush3.bf16.msra.mxu0 %v6105_v34  ;;  %v1090_v49 = vpack.c.bf16 %v1062_v33, %v1061_v12  ;;  %v1332_v39 = vpack.c.bf16 %v1305_v23, %v1304_v40  ;;  %v8701_v34 = vrot.slane %v7148_v38, 1  ;;  %v2394_v33 = vld [vmem:[#allocation2 + $0x720] sm:$0xff]  ;;  %v7311_v45 = vmax.f32 %v686_v2, 0.0  ;;  %v8705_v3 = vld [vmem:[#allocation25_spill] sm:$0xff] }
 0x1fc   : > { %v7289_v13 = vpop.permute.xlu1 %1509  ;;  %v7291_v17 = vpop.permute.xlu0 %1504  ;;  %5599 = vmatprep.subr.bf16.mxu0 %v6107_v42  ;;  %v7303_v41 = vsel %vm1376_vm1, %v1351_v0, %v8700_v52  ;;  %v6099_v42 = vld [vmem:[#allocation8 + $0x120] sm:$0xff]   ;;  %v6102_v52 = vld [vmem:[#allocation8 + $0x168] sm:$0xff]   ;;  %v7317_v55 = vmax.f32 %v689_v48, 0.0  ;;  %v8707_v46 = vrot.slane %v7213_v21, 7 }
 0x1fd   : > { %2037 = vperm.xlu1 %6031, %v1927_v43   ;;  %v7309_v30 = vsel %vm1376_vm1, %v8701_v34, %v1351_v0  ;;  %8702 = vst [vmem:[#allocation48_spill] sm:$0xff] %v7311_v45  ;;  %v7323_v0 = vsel %vm830_vm0, %v806_v28, %v8475_v56  ;;  %v1611_v2 = vmul.f32 %v7169_v60, %v7303_v41  ;;  %v1929_v38 = vld [vmem:[#allocation2 + $0x5a8] sm:$0xff] }
 0x1fe   : > { %2032 = vperm.xlu0 %6030, %v1926_v16   ;;  %3511 = vmatmul.mubr.bf16.gmra.mrb[28].mxu1 %v1090_v49  ;;  %8703 = vst [vmem:[#allocation89_spill] sm:$0xff] %v7317_v55  ;;  %8704 = vst [vmem:[#allocation112_spill] sm:$0xff] %v7323_v0  ;;  %v1063_v16 = vmul.f32 %v8705_v3, %v7207_v14  ;;  %v1610_v40 = vmul.f32 %v7171_v51, %v7309_v30  ;;  %v1353_v51 = vrot.slane %v7213_v21, 1 }
 0x1ff   : > { %3518 = vmatprep.mubr.bf16.mxu1 %v1332_v39  ;;  %v8706_v39 = vld [vmem:[#allocation24_spill] sm:$0xff]  ;;  %v7337_v48 = vsel %vm830_vm0, %v8707_v46, %v806_v28  ;;  %v1854_v34 = vmul.f32 %v7197_v7, %v7323_v0  ;;  %5490 = vmatpush3.bf16.msra.mxu1 %v6099_v42  ;;  %v8711_v7 = vld [vmem:[#allocation50_spill] sm:$0xff]  ;;  %v808_v3 = vrot.slane %v7311_v45, 7 }
 0x200   : > { %3672 = vmatmul.mubr.bf16.gmra.mrb[28].mxu0 %v1637_v62  ;;  %v7313_v43 = vpop.permute.xlu1 %1760  ;;  %v7315_v23 = vpop.permute.xlu0 %1755  ;;  %v1064_v12 = vmul.f32 %v8706_v39, %v7195_v10  ;;  %8708 = vst [vmem:[#allocation25_spill] sm:$0xff] %v7337_v48  ;;  %v6111_v62 = vld [vmem:[#allocation8 + $0x1e0] sm:$0xff]   ;;  %v1853_v60 = vmul.f32 %v7199_v63, %v7337_v48  ;;  %v1306_v14 = vmul.f32 %v8711_v7, %v7201_v32  ;;  %v809_v10 = vrot.slane %v7317_v55, 7 }
 0x201   : > { %3679 = vmatprep.mubr.bf16.mxu0 %v1879_v11  ;;  %2449 = vperm.xlu1 %6031, %v2395_v15   ;;  %v2154_v11 = vld [vmem:[#allocation2 + $0x628] sm:$0xff]  ;;  %v2153_v39 = vld [vmem:[#allocation2 + $0x620] sm:$0xff]  ;;  %v8715_v7 = vrot.slane %v7201_v32, 1 }
 0x202   : > { %2444 = vperm.xlu0 %6030, %v2394_v33   ;;  %v8709_v15 = vld [vmem:[#allocation49_spill] sm:$0xff]  ;;  %5600 = vmatpush3.bf16.msra.mxu0 %v6109_v5  ;;  %v6113_v28 = vld [vmem:[#allocation8 + $0x1a0] sm:$0xff]   ;;  %v1091_v42 = vpack.c.bf16 %v1064_v12, %v1063_v16  ;;  %v1638_v5 = vpack.c.bf16 %v1611_v2, %v1610_v40  ;;  %v1880_v36 = vpack.c.bf16 %v1854_v34, %v1853_v60  ;;  %v1355_v60 = vrot.slane %v7257_v57, 1 }
 0x203   : > { %v1307_v49 = vmul.f32 %v8709_v15, %v7213_v21  ;;  %v8710_v33 = vld [vmem:[#allocation84_spill] sm:$0xff]  ;;  %5491 = vmatprep.subr.bf16.mxu1 %v6102_v52  ;;  %5601 = vmatprep.subr.bf16.mxu0 %v6111_v62  ;;  %v7363_v52 = vsel %vm1376_vm1, %v1353_v51, %v8713_v35  ;;  %v6106_v35 = vld [vmem:[#allocation8 + $0x170] sm:$0xff]   ;;  %v8719_v62 = vrot.slane %v7257_v57, 7 }
 0x204   : > { %v694_v46 = vadd.f32 %v8710_v33, %v6891_v59  ;;  %v7349_v56 = vpop.permute.xlu1 %1519  ;;  %v7351_v15 = vpop.permute.xlu0 %1514  ;;  %v8712_v63 = vld [vmem:[#allocation88_spill] sm:$0xff]  ;;  %8714 = vst [vmem:[#allocation24_spill] sm:$0xff] %v7363_v52 }
 0x205   : > { %v697_v21 = vadd.f32 %v8712_v63, %v6891_v59  ;;  %2208 = vperm.xlu1 %6031, %v2154_v11   ;;  %v1333_v33 = vpack.c.bf16 %v1307_v49, %v1306_v14  ;;  %v7369_v11 = vsel %vm1376_vm1, %v8715_v7, %v1353_v51  ;;  %v1928_v16 = vld [vmem:[#allocation2 + $0x5a0] sm:$0xff]  ;;  %v6104_v12 = vld [vmem:[#allocation8 + $0x128] sm:$0xff]   ;;  %v7383_v34 = vsel %vm830_vm0, %v8719_v62, %v808_v3  ;;  %v8721_v51 = vld [vmem:[#allocation26_spill] sm:$0xff] }
 0x206   : > { %2203 = vperm.xlu0 %6030, %v2153_v39   ;;  %8716 = vst [vmem:[#allocation49_spill] sm:$0xff] %v7369_v11  ;;  %3519 = vmatmul.mubr.bf16.gmra.mrb[32].mxu1 %v1091_v42  ;;  %v7371_v14 = vmax.f32 %v694_v46, 0.0  ;;  %8720 = vst [vmem:[#allocation88_spill] sm:$0xff] %v7383_v34  ;;  %v1066_v39 = vmul.f32 %v8721_v51, %v7276_v19  ;;  %v7394_v46 = vsel %vm830_vm0, %v808_v3, %v809_v10  ;;  %v2397_v63 = vld [vmem:[#allocation2 + $0x738] sm:$0xff]  ;;  %v2396_v7 = vld [vmem:[#allocation2 + $0x730] sm:$0xff] }
 0x207   : > { %5602 = vmatpush3.bf16.msra.mxu0 %v6113_v28  ;;  %3526 = vmatprep.mubr.bf16.mxu1 %v1333_v33  ;;  %v7377_v49 = vmax.f32 %v697_v21, 0.0  ;;  %v1613_v28 = vmul.f32 %v7229_v26, %v7363_v52  ;;  %v1612_v21 = vmul.f32 %v7231_v24, %v7369_v11  ;;  %8722 = vst [vmem:[#allocation26_spill] sm:$0xff] %v7394_v46  ;;  %v8723_v42 = vld [vmem:[#allocation51_spill] sm:$0xff]  ;;  %v8727_v32 = vld [vmem:[#allocation68_spill] sm:$0xff]  ;;  %v6108_v52 = vld [vmem:[#allocation8 + $0x130] sm:$0xff]  }
 0x208   : > { %8717 = vst [vmem:[#allocation84_spill] sm:$0xff] %v7371_v14  ;;  %3680 = vmatmul.mubr.bf16.gmra.mrb[32].mxu0 %v1638_v5  ;;  %v7373_v2 = vpop.permute.xlu1 %1770  ;;  %v7375_v40 = vpop.permute.xlu0 %1765  ;;  %v1309_v5 = vmul.f32 %v8723_v42, %v7257_v57  ;;  %v1855_v33 = vmul.f32 %v7255_v53, %v7383_v34  ;;  %v8724_v24 = vld [vmem:[#allocation27_spill] sm:$0xff]  ;;  %5492 = vmatpush3.bf16.msra.mxu1 %v6104_v12  ;;  %v810_v3 = vrot.slane %v7371_v14, 7  ;;  %v8725_v42 = vld [vmem:[#allocation52_spill] sm:$0xff] }
 0x209   : > { %8718 = vst [vmem:[#allocation50_spill] sm:$0xff] %v7377_v49  ;;  %3687 = vmatprep.mubr.bf16.mxu0 %v1880_v36  ;;  %2047 = vperm.xlu1 %6031, %v1929_v38   ;;  %v6114_v36 = vld [vmem:[#allocation8 + $0x1e8] sm:$0xff]   ;;  %v1856_v38 = vmul.f32 %v7253_v58, %v7394_v46  ;;  %v1065_v62 = vmul.f32 %v8724_v24, %v7263_v47  ;;  %v8496_v26 = vrot.slane %v7377_v49, 7  ;;  %v2156_v11 = vld [vmem:[#allocation2 + $0x638] sm:$0xff] }
 0x20a   : > { %2042 = vperm.xlu0 %6030, %v1928_v16   ;;  %v1308_v19 = vmul.f32 %v8725_v42, %v7251_v44  ;;  %5493 = vmatprep.subr.bf16.mxu1 %v6106_v35  ;;  %v8726_v58 = vld [vmem:[#allocation72_spill] sm:$0xff]  ;;  %v702_v12 = vadd.f32 %v6891_v59, %v8727_v32  ;;  %v1639_v24 = vpack.c.bf16 %v1613_v28, %v1612_v21  ;;  %v8728_v42 = vrot.slane %v7311_v45, 1  ;;  %v6110_v32 = vld [vmem:[#allocation8 + $0x178] sm:$0xff]  }
 0x20b   : > { %v705_v53 = vadd.f32 %v6891_v59, %v8726_v58  ;;  %v1092_v57 = vpack.c.bf16 %v1066_v39, %v1065_v62  ;;  %5603 = vmatprep.subr.bf16.mxu0 %v6114_v36  ;;  %v1881_v37 = vpack.c.bf16 %v1856_v38, %v1855_v33  ;;  %v8729_v58 = vrot.slane %v7251_v44, 1  ;;  %v2155_v59 = vld [vmem:[#allocation2 + $0x630] sm:$0xff]  ;;  %v1931_v62 = vld [vmem:[#allocation2 + $0x5b8] sm:$0xff] }
 0x20c   : > { %v7406_v16 = vpop.permute.xlu1 %1529  ;;  %v7408_v51 = vpop.permute.xlu0 %1524  ;;  %v1334_v47 = vpack.c.bf16 %v1309_v5, %v1308_v19  ;;  %v7421_v35 = vsel %vm1376_vm1, %v1355_v60, %v8728_v42  ;;  %v7431_v19 = vsel %vm830_vm0, %v809_v10, %v810_v3  ;;  %v8734_v10 = vld [vmem:[#allocation29_spill] sm:$0xff]  ;;  %v7449_v38 = vmax.f32 %v702_v12, 0.0  ;;  %5494 = vmatpush3.bf16.msra.mxu1 %v6108_v52  ;;  %v8738_v52 = vld [vmem:[#allocation54_spill] sm:$0xff] }
 0x20d   : > { %2459 = vperm.xlu1 %6031, %v2397_v63   ;;  %v7427_v39 = vsel %vm1376_vm1, %v8729_v58, %v1355_v60  ;;  %8731 = vst [vmem:[#allocation27_spill] sm:$0xff] %v7431_v19  ;;  %v6115_v63 = vld [vmem:[#allocation8 + $0x1a8] sm:$0xff]   ;;  %v7437_v5 = vmax.f32 %v705_v53, 0.0  ;;  %v1067_v60 = vmul.f32 %v8734_v10, %v7337_v48  ;;  %v1615_v33 = vmul.f32 %v7289_v13, %v7421_v35 }
 0x20e   : > { %2454 = vperm.xlu0 %6030, %v2396_v7   ;;  %8730 = vst [vmem:[#allocation51_spill] sm:$0xff] %v7427_v39  ;;  %3527 = vmatmul.mubr.bf16.gmra.mrb[36].mxu1 %v1092_v57  ;;  %v7443_v57 = vsel %vm830_vm0, %v810_v3, %v8496_v26  ;;  %8736 = vst [vmem:[#allocation68_spill] sm:$0xff] %v7449_v38  ;;  %v1614_v7 = vmul.f32 %v7291_v17, %v7427_v39  ;;  %v8737_v3 = vld [vmem:[#allocation53_spill] sm:$0xff] }
 0x20f   : > { %3534 = vmatprep.mubr.bf16.mxu1 %v1334_v47  ;;  %8732 = vst [vmem:[#allocation52_spill] sm:$0xff] %v7437_v5  ;;  %8733 = vst [vmem:[#allocation72_spill] sm:$0xff] %v7443_v57  ;;  %v8735_v47 = vld [vmem:[#allocation28_spill] sm:$0xff]  ;;  %v1858_v53 = vmul.f32 %v7313_v43, %v7443_v57  ;;  %v1857_v12 = vmul.f32 %v7315_v23, %v7431_v19  ;;  %v1930_v42 = vld [vmem:[#allocation2 + $0x5b0] sm:$0xff]  ;;  %5495 = vmatprep.subr.bf16.mxu1 %v6110_v32  ;;  %v812_v43 = vrot.slane %v7449_v38, 7 }
 0x210   : > { %3688 = vmatmul.mubr.bf16.gmra.mrb[36].mxu0 %v1639_v24  ;;  %v7433_v28 = vpop.permute.xlu1 %1947  ;;  %v7435_v21 = vpop.permute.xlu0 %1942  ;;  %v1068_v36 = vmul.f32 %v8735_v47, %v7323_v0  ;;  %v1357_v24 = vrot.slane %v7317_v55, 1  ;;  %v6116_v17 = vld [vmem:[#allocation8 + $0x1f0] sm:$0xff]   ;;  %v1310_v10 = vmul.f32 %v8738_v52, %v7311_v45  ;;  %v8501_v47 = vrot.slane %v7437_v5, 7  ;;  %v2399_v13 = vld [vmem:[#allocation2 + $0x748] sm:$0xff] }
 0x211   : > { %3695 = vmatprep.mubr.bf16.mxu0 %v1881_v37  ;;  %2218 = vperm.xlu1 %6031, %v2156_v11   ;;  %v1311_v37 = vmul.f32 %v8737_v3, %v7317_v55  ;;  %v6112_v11 = vld [vmem:[#allocation8 + $0x138] sm:$0xff]   ;;  %v1640_v3 = vpack.c.bf16 %v1615_v33, %v1614_v7  ;;  %v6117_v32 = vld [vmem:[#allocation8 + $0x1b0] sm:$0xff]   ;;  %v1882_v48 = vpack.c.bf16 %v1858_v53, %v1857_v12  ;;  %v8739_v0 = vrot.slane %v7371_v14, 1  ;;  %v7483_v33 = vld [vmem:[#allocation8 + $0x200] sm:$0xff]  }
 0x212   : > { %2213 = vperm.xlu0 %6030, %v2155_v59   ;;  %5604 = vmatpush3.bf16.msra.mxu0 %v6115_v63  ;;  %v1093_v23 = vpack.c.bf16 %v1068_v36, %v1067_v60  ;;  %v8741_v63 = vrot.slane %v7311_v45, 1  ;;  %v2398_v60 = vld [vmem:[#allocation2 + $0x740] sm:$0xff]  ;;  %v8746_v53 = vrot.slane %v7377_v49, 7  ;;  %v8754_v45 = vrot.slane %v7371_v14, 1 }
 0x213   : > { %v1335_v26 = vpack.c.bf16 %v1311_v37, %v1310_v10  ;;  %5496 = vmatpush3.bf16.msra.mxu1 %v6112_v11  ;;  %v7475_v55 = vsel %vm1376_vm1, %v1357_v24, %v8739_v0  ;;  %5605 = vmatprep.subr.bf16.mxu0 %v6116_v17  ;;  %v6118_v36 = vld [vmem:[#allocation8 + $0x1f8] sm:$0xff]   ;;  %v7496_v11 = vsel %vm830_vm0, %v812_v43, %v8501_v47  ;;  %v2158_v10 = vld [vmem:[#allocation2 + $0x648] sm:$0xff] }
 0x214   : > { %v7463_v58 = vpop.permute.xlu1 %1780  ;;  %v7465_v59 = vpop.permute.xlu0 %1775  ;;  %8740 = vst [vmem:[#allocation29_spill] sm:$0xff] %v7475_v55  ;;  %v7481_v52 = vsel %vm1376_vm1, %v8741_v63, %v1357_v24  ;;  %v8743_v0 = vld [vmem:[#allocation71_spill] sm:$0xff]  ;;  %8745 = vst [vmem:[#allocation54_spill] sm:$0xff] %v7496_v11  ;;  %v7502_v12 = vsel %vm830_vm0, %v8746_v53, %v812_v43  ;;  %5801 = vmatprep.subr.bf16.mxu1 %v7483_v33 }
 0x215   : > { %2057 = vperm.xlu1 %6031, %v1931_v62   ;;  %8742 = vst [vmem:[#allocation28_spill] sm:$0xff] %v7481_v52  ;;  %v7490_v37 = vmax.f32 %v8743_v0, 0.0  ;;  %8747 = vst [vmem:[#allocation71_spill] sm:$0xff] %v7502_v12  ;;  %v1616_v17 = vmul.f32 %v7351_v15, %v7481_v52  ;;  %v6119_v63 = vld [vmem:[#allocation8 + $0x1b8] sm:$0xff]   ;;  %v8756_v52 = vld [vmem:[#allocation76_spill] sm:$0xff] }
 0x216   : > { %2052 = vperm.xlu0 %6030, %v1930_v42   ;;  %3535 = vmatmul.mubr.bf16.gmra.mrb[40].mxu1 %v1093_v23  ;;  %v1617_v42 = vmul.f32 %v7349_v56, %v7475_v55  ;;  %v8749_v23 = vld [vmem:[#allocation55_spill] sm:$0xff]  ;;  %v7539_v55 = vmax.f32 %v8756_v52, 0.0  ;;  %v8762_v52 = vld [vmem:[#allocation33_spill] sm:$0xff] }
 0x217   : > { %3542 = vmatprep.mubr.bf16.mxu1 %v1335_v26  ;;  %8744 = vst [vmem:[#allocation53_spill] sm:$0xff] %v7490_v37  ;;  %v8748_v26 = vld [vmem:[#allocation30_spill] sm:$0xff]  ;;  %5606 = vmatpush3.bf16.msra.mxu0 %v6117_v32  ;;  %v8750_v43 = vld [vmem:[#allocation67_spill] sm:$0xff]  ;;  %v1360_v32 = vrot.slane %v7449_v38, 1  ;;  %v8514_v47 = vrot.slane %v7490_v37, 7 }
 0x218   : > { %3696 = vmatmul.mubr.bf16.gmra.mrb[40].mxu0 %v1640_v3  ;;  %v7485_v7 = vpop.permute.xlu1 %1539  ;;  %v7487_v62 = vpop.permute.xlu0 %1534  ;;  %v1070_v24 = vmul.f32 %v8748_v26, %v7394_v46  ;;  %v1313_v3 = vmul.f32 %v8749_v23, %v7377_v49  ;;  %v7513_v0 = vmax.f32 %v8750_v43, 0.0  ;;  %v2157_v56 = vld [vmem:[#allocation2 + $0x640] sm:$0xff]  ;;  %5607 = vmatprep.subr.bf16.mxu0 %v6118_v36  ;;  %v1641_v36 = vpack.c.bf16 %v1617_v42, %v1616_v17  ;;  %v1933_v46 = vld [vmem:[#allocation2 + $0x5c8] sm:$0xff] }
 0x219   : > { %3703 = vmatprep.mubr.bf16.mxu0 %v1882_v48  ;;  %2469 = vperm.xlu1 %6031, %v2399_v13   ;;  %v1860_v48 = vmul.f32 %v7373_v2, %v7496_v11  ;;  %v1859_v13 = vmul.f32 %v7375_v40, %v7502_v12  ;;  %v8752_v53 = vld [vmem:[#allocation31_spill] sm:$0xff]  ;;  %v8753_v2 = vld [vmem:[#allocation56_spill] sm:$0xff]  ;;  %8757 = vst [vmem:[#allocation67_spill] sm:$0xff] %v7539_v55 }
 0x21a   : > { %2464 = vperm.xlu0 %6030, %v2398_v60   ;;  %8751 = vst [vmem:[#allocation30_spill] sm:$0xff] %v7513_v0  ;;  %v1069_v15 = vmul.f32 %v8752_v53, %v7383_v34  ;;  %v1359_v60 = vrot.slane %v7377_v49, 1  ;;  %v1312_v43 = vmul.f32 %v8753_v2, %v7371_v14  ;;  %v814_v40 = vrot.slane %v7513_v0, 7  ;;  %v1932_v2 = vld [vmem:[#allocation2 + $0x5c0] sm:$0xff] }
 0x21b   : > { %5608 = vmatpush3.bf16.msra.mxu0 %v6119_v63  ;;  %v1883_v49 = vpack.c.bf16 %v1860_v48, %v1859_v13  ;;  %v1071_v63 = vmul.f32 %v8762_v52, %v7431_v19  ;;  %v8763_v48 = vld [vmem:[#allocation32_spill] sm:$0xff]  ;;  %v2160_v19 = vld [vmem:[#allocation2 + $0x658] sm:$0xff] }
 0x21c   : > { %v7524_v26 = vpop.permute.xlu1 %1957  ;;  %v7526_v23 = vpop.permute.xlu0 %1952  ;;  %v1094_v53 = vpack.c.bf16 %v1070_v24, %v1069_v15  ;;  %v1336_v34 = vpack.c.bf16 %v1313_v3, %v1312_v43  ;;  %v7536_v44 = vsel %vm1376_vm1, %v8754_v45, %v1359_v60  ;;  %v7543_v24 = vsel %vm1376_vm1, %v1359_v60, %v1360_v32 }
 0x21d   : > { %2228 = vperm.xlu1 %6031, %v2158_v10   ;;  %8755 = vst [vmem:[#allocation55_spill] sm:$0xff] %v7536_v44  ;;  %8758 = vst [vmem:[#allocation31_spill] sm:$0xff] %v7543_v24  ;;  %v8759_v10 = vld [vmem:[#allocation78_spill] sm:$0xff]  ;;  %v7552_v45 = vsel %vm830_vm0, %v814_v40, %v8514_v47  ;;  %v1072_v13 = vmul.f32 %v8763_v48, %v7443_v57  ;;  %v8764_v15 = vrot.slane %v7437_v5, 7  ;;  %v1362_v48 = vrot.slane %v7513_v0, 1 }
 0x21e   : > { %2223 = vperm.xlu0 %6030, %v2157_v56   ;;  %3543 = vmatmul.mubr.bf16.gmra.mrb[44].mxu1 %v1094_v53  ;;  %v7546_v3 = vmax.f32 %v8759_v10, 0.0  ;;  %8761 = vst [vmem:[#allocation76_spill] sm:$0xff] %v7552_v45  ;;  %v1618_v56 = vmul.f32 %v7408_v51, %v7536_v44  ;;  %v1862_v53 = vmul.f32 %v7463_v58, %v7552_v45  ;;  %v1361_v51 = vrot.slane %v7437_v5, 1 }
 0x21f   : > { %3550 = vmatprep.mubr.bf16.mxu1 %v1336_v34  ;;  %v1619_v34 = vmul.f32 %v7406_v16, %v7543_v24  ;;  %v7566_v60 = vsel %vm830_vm0, %v8764_v15, %v814_v40  ;;  %v8767_v40 = vld [vmem:[#allocation58_spill] sm:$0xff]  ;;  %v816_v47 = vrot.slane %v7539_v55, 7 }
 0x220   : > { %3704 = vmatmul.mubr.bf16.gmra.mrb[44].mxu0 %v1641_v36  ;;  %v1791_v42 = vpop.permute.xlu1 %1790  ;;  %v1786_v17 = vpop.permute.xlu0 %1785  ;;  %8760 = vst [vmem:[#allocation56_spill] sm:$0xff] %v7546_v3  ;;  %8765 = vst [vmem:[#allocation78_spill] sm:$0xff] %v7566_v60  ;;  %v1861_v16 = vmul.f32 %v7465_v59, %v7566_v60  ;;  %v2400_v36 = vld [vmem:[#allocation2 + $0x750] sm:$0xff]  ;;  %v7586_v14 = vsel %vm1376_vm1, %v1360_v32, %v1361_v51  ;;  %v8774_v32 = vld [vmem:[#allocation35_spill] sm:$0xff] }
 0x221   : > { %3711 = vmatprep.mubr.bf16.mxu0 %v1883_v49  ;;  %2067 = vperm.xlu1 %6031, %v1933_v46   ;;  %v2401_v49 = vld [vmem:[#allocation2 + $0x758] sm:$0xff]  ;;  %v8766_v46 = vld [vmem:[#allocation57_spill] sm:$0xff]  ;;  %v1642_v58 = vpack.c.bf16 %v1619_v34, %v1618_v56  ;;  %8768 = vst [vmem:[#allocation33_spill] sm:$0xff] %v7586_v14  ;;  %v7597_v34 = vsel %vm1376_vm1, %v1361_v51, %v1362_v48  ;;  %v8772_v56 = vrot.slane %v7546_v3, 7 }
 0x222   : > { %2062 = vperm.xlu0 %6030, %v1932_v2   ;;  %v1315_v43 = vmul.f32 %v8766_v46, %v7437_v5  ;;  %v1314_v2 = vmul.f32 %v8767_v40, %v7449_v38  ;;  %v1095_v46 = vpack.c.bf16 %v1072_v13, %v1071_v63  ;;  %v1884_v57 = vpack.c.bf16 %v1862_v53, %v1861_v16  ;;  %v2159_v5 = vld [vmem:[#allocation2 + $0x650] sm:$0xff] }
 0x223   : > { %v8769_v63 = vld [vmem:[#allocation77_spill] sm:$0xff]  ;;  %8771 = vst [vmem:[#allocation57_spill] sm:$0xff] %v7597_v34  ;;  %v1621_v53 = vmul.f32 %v7485_v7, %v7597_v34  ;;  %v1620_v16 = vmul.f32 %v7487_v62, %v7586_v14  ;;  %v8780_v62 = vld [vmem:[#allocation34_spill] sm:$0xff] }
 0x224   : > { %v7575_v10 = vpop.permute.xlu1 %1549  ;;  %v7577_v52 = vpop.permute.xlu0 %1544  ;;  %v1337_v59 = vpack.c.bf16 %v1315_v43, %v1314_v2  ;;  %v7593_v13 = vmax.f32 %v8769_v63, 0.0  ;;  %v1073_v43 = vmul.f32 %v8774_v32, %v7502_v12  ;;  %v1935_v2 = vld [vmem:[#allocation2 + $0x5d8] sm:$0xff]  ;;  %v1934_v63 = vld [vmem:[#allocation2 + $0x5d0] sm:$0xff]  ;;  %v1363_v32 = vrot.slane %v7490_v37, 1  ;;  %v8781_v12 = vld [vmem:[#allocation60_spill] sm:$0xff] }
 0x225   : > { %2479 = vperm.xlu1 %6031, %v2401_v49   ;;  %v7603_v49 = vsel %vm830_vm0, %v816_v47, %v8772_v56  ;;  %v1074_v56 = vmul.f32 %v8780_v62, %v7496_v11  ;;  %v2403_v34 = vld [vmem:[#allocation2 + $0x768] sm:$0xff]  ;;  %v2402_v11 = vld [vmem:[#allocation2 + $0x760] sm:$0xff]  ;;  %v8783_v24 = vld [vmem:[#allocation82_spill] sm:$0xff] }
 0x226   : > { %2474 = vperm.xlu0 %6030, %v2400_v36   ;;  %3551 = vmatmul.mubr.bf16.gmra.mrb[48].mxu1 %v1095_v46  ;;  %8770 = vst [vmem:[#allocation32_spill] sm:$0xff] %v7593_v13  ;;  %8773 = vst [vmem:[#allocation58_spill] sm:$0xff] %v7603_v49  ;;  %v8775_v36 = vrot.slane %v7490_v37, 7  ;;  %v8778_v46 = vld [vmem:[#allocation75_spill] sm:$0xff]  ;;  %v819_v38 = vrot.slane %v7593_v13, 7  ;;  %v7636_v39 = vmax.f32 %v8783_v24, 0.0 }
 0x227   : > { %3558 = vmatprep.mubr.bf16.mxu1 %v1337_v59  ;;  %v1864_v59 = vmul.f32 %v1791_v42, %v7603_v49  ;;  %v1096_v42 = vpack.c.bf16 %v1074_v56, %v1073_v43  ;;  %v7644_v43 = vsel %vm1376_vm1, %v1362_v48, %v1363_v32  ;;  %v8789_v56 = vld [vmem:[#allocation61_spill] sm:$0xff] }
 0x228   : > { %3712 = vmatmul.mubr.bf16.gmra.mrb[48].mxu0 %v1642_v58  ;;  %v7588_v40 = vpop.permute.xlu1 %1967  ;;  %v7590_v15 = vpop.permute.xlu0 %1962  ;;  %v7615_v51 = vsel %vm830_vm0, %v8775_v36, %v816_v47  ;;  %v7620_v58 = vmax.f32 %v8778_v46, 0.0  ;;  %v1364_v47 = vrot.slane %v7539_v55, 1 }
 0x229   : > { %3719 = vmatprep.mubr.bf16.mxu0 %v1884_v57  ;;  %2238 = vperm.xlu1 %6031, %v2160_v19   ;;  %8776 = vst [vmem:[#allocation77_spill] sm:$0xff] %v7615_v51  ;;  %v8777_v57 = vld [vmem:[#allocation59_spill] sm:$0xff]  ;;  %v1863_v7 = vmul.f32 %v1786_v17, %v7615_v51  ;;  %v1643_v17 = vpack.c.bf16 %v1621_v53, %v1620_v16 }
 0x22a   : > { %2233 = vperm.xlu0 %6030, %v2159_v5   ;;  %v1317_v19 = vmul.f32 %v8777_v57, %v7490_v37  ;;  %8779 = vst [vmem:[#allocation35_spill] sm:$0xff] %v7620_v58  ;;  %v1316_v57 = vmul.f32 %v8781_v12, %v7513_v0  ;;  %v818_v46 = vrot.slane %v7620_v58, 7  ;;  %v8782_v37 = vld [vmem:[#allocation80_spill] sm:$0xff]  ;;  %v7640_v12 = vsel %vm1376_vm1, %v1363_v32, %v1364_v47 }
 0x22b   : > { %v1885_v62 = vpack.c.bf16 %v1864_v59, %v1863_v7  ;;  %v7633_v44 = vmax.f32 %v8782_v37, 0.0  ;;  %v8785_v37 = vld [vmem:[#allocation37_spill] sm:$0xff]  ;;  %v1623_v48 = vmul.f32 %v7575_v10, %v7640_v12  ;;  %v8787_v7 = vrot.slane %v7546_v3, 7  ;;  %v1936_v0 = vld [vmem:[#allocation2 + $0x5e0] sm:$0xff] }
 0x22c   : > { %v1801_v5 = vpop.permute.xlu1 %1800  ;;  %v1796_v36 = vpop.permute.xlu0 %1795  ;;  %v1338_v14 = vpack.c.bf16 %v1317_v19, %v1316_v57  ;;  %v1075_v24 = vmul.f32 %v8785_v37, %v7566_v60  ;;  %v8786_v19 = vld [vmem:[#allocation36_spill] sm:$0xff]  ;;  %v1319_v32 = vmul.f32 %v8789_v56, %v7546_v3  ;;  %v1365_v10 = vrot.slane %v7546_v3, 1 }
 0x22d   : > { %2077 = vperm.xlu1 %6031, %v1935_v2   ;;  %v7648_v2 = vsel %vm830_vm0, %v818_v46, %v819_v38  ;;  %v1076_v59 = vmul.f32 %v8786_v19, %v7552_v45  ;;  %v820_v19 = vrot.slane %v7633_v44, 7  ;;  %v1937_v60 = vld [vmem:[#allocation2 + $0x5e8] sm:$0xff] }
 0x22e   : > { %2072 = vperm.xlu0 %6030, %v1934_v63   ;;  %3559 = vmatmul.mubr.bf16.gmra.mrb[52].mxu1 %v1096_v42  ;;  %8784 = vst [vmem:[#allocation59_spill] sm:$0xff] %v7648_v2  ;;  %v7662_v63 = vsel %vm830_vm0, %v8787_v7, %v818_v46  ;;  %v1866_v57 = vmul.f32 %v1801_v5, %v7648_v2  ;;  %v8790_v46 = vld [vmem:[#allocation62_spill] sm:$0xff] }
 0x22f   : > { %3566 = vmatprep.mubr.bf16.mxu1 %v1338_v14  ;;  %v1622_v14 = vmul.f32 %v7577_v52, %v7644_v43  ;;  %8788 = vst [vmem:[#allocation75_spill] sm:$0xff] %v7662_v63  ;;  %v1865_v42 = vmul.f32 %v1796_v36, %v7662_v63  ;;  %v1366_v52 = vrot.slane %v7620_v58, 1  ;;  %v1097_v5 = vpack.c.bf16 %v1076_v59, %v1075_v24 }
 0x230   : > { %3720 = vmatmul.mubr.bf16.gmra.mrb[52].mxu0 %v1643_v17  ;;  %v1560_v53 = vpop.permute.xlu1 %1559  ;;  %v1555_v16 = vpop.permute.xlu0 %1554  ;;  %v2161_v17 = vld [vmem:[#allocation2 + $0x660] sm:$0xff]  ;;  %v7680_v3 = vsel %vm1376_vm1, %v1364_v47, %v1365_v10  ;;  %v8793_v24 = vrot.slane %v7636_v39, 7  ;;  %v7694_v47 = vsel %vm830_vm0, %v819_v38, %v820_v19  ;;  %v8798_v38 = vld [vmem:[#allocation81_spill] sm:$0xff] }
 0x231   : > { %3727 = vmatprep.mubr.bf16.mxu0 %v1885_v62  ;;  %2489 = vperm.xlu1 %6031, %v2403_v34   ;;  %v2162_v34 = vld [vmem:[#allocation2 + $0x668] sm:$0xff]  ;;  %v1644_v56 = vpack.c.bf16 %v1623_v48, %v1622_v14  ;;  %v1886_v45 = vpack.c.bf16 %v1866_v57, %v1865_v42  ;;  %8791 = vst [vmem:[#allocation34_spill] sm:$0xff] %v7680_v3  ;;  %8795 = vst [vmem:[#allocation82_spill] sm:$0xff] %v7694_v47 }
 0x232   : > { %2484 = vperm.xlu0 %6030, %v2402_v11   ;;  %v1318_v11 = vmul.f32 %v8790_v46, %v7539_v55  ;;  %v7684_v46 = vsel %vm1376_vm1, %v1365_v10, %v1366_v52  ;;  %v7690_v59 = vsel %vm830_vm0, %v820_v19, %v8793_v24  ;;  %v1624_v10 = vmul.f32 %v1555_v16, %v7680_v3  ;;  %v8801_v16 = vld [vmem:[#allocation64_spill] sm:$0xff]  ;;  %v2164_v3 = vld [vmem:[#allocation2 + $0x678] sm:$0xff] }
 0x233   : > { %8792 = vst [vmem:[#allocation60_spill] sm:$0xff] %v7684_v46  ;;  %8794 = vst [vmem:[#allocation80_spill] sm:$0xff] %v7690_v59  ;;  %v1625_v42 = vmul.f32 %v1560_v53, %v7684_v46  ;;  %v7705_v19 = vmax.f32 %v8798_v38, 0.0  ;;  %v1368_v24 = vrot.slane %v7633_v44, 1 }
 0x234   : > { %v7670_v62 = vpop.permute.xlu1 %1977  ;;  %v7672_v37 = vpop.permute.xlu0 %1972  ;;  %v1339_v36 = vpack.c.bf16 %v1319_v32, %v1318_v11  ;;  %v8796_v32 = vld [vmem:[#allocation38_spill] sm:$0xff]  ;;  %v8797_v11 = vld [vmem:[#allocation63_spill] sm:$0xff] }
 0x235   : > { %2248 = vperm.xlu1 %6031, %v2162_v34   ;;  %v1078_v57 = vmul.f32 %v8796_v32, %v7603_v49  ;;  %8799 = vst [vmem:[#allocation37_spill] sm:$0xff] %v7705_v19  ;;  %v1645_v49 = vpack.c.bf16 %v1625_v42, %v1624_v10  ;;  %v8807_v10 = vld [vmem:[#allocation40_spill] sm:$0xff] }
 0x236   : > { %2243 = vperm.xlu0 %6030, %v2161_v17   ;;  %3567 = vmatmul.mubr.bf16.gmra.mrb[56].mxu1 %v1097_v5  ;;  %v2405_v17 = vld [vmem:[#allocation2 + $0x778] sm:$0xff]  ;;  %v1321_v5 = vmul.f32 %v8797_v11, %v7593_v13 }
 0x237   : > { %3574 = vmatprep.mubr.bf16.mxu1 %v1339_v36  ;;  %v1367_v36 = vrot.slane %v7593_v13, 1  ;;  %v8553_v13 = vrot.slane %v7705_v19, 7 }
 0x238   : > { %3728 = vmatmul.mubr.bf16.gmra.mrb[56].mxu0 %v1644_v56  ;;  %v1811_v7 = vpop.permute.xlu1 %1810  ;;  %v1806_v48 = vpop.permute.xlu0 %1805 }
 0x239   : > { %3735 = vmatprep.mubr.bf16.mxu0 %v1886_v45  ;;  %v1868_v14 = vmul.f32 %v1811_v7, %v7690_v59  ;;  %v1867_v34 = vmul.f32 %v1806_v48, %v7694_v47  ;;  %2087 = vperm.xlu1 %6031, %v1937_v60   ;;  %v2404_v45 = vld [vmem:[#allocation2 + $0x770] sm:$0xff]  ;;  %v8800_v7 = vld [vmem:[#allocation39_spill] sm:$0xff]  ;;  %v7720_v46 = vsel %vm1376_vm1, %v1367_v36, %v1368_v24 }
 0x23a   : > { %2082 = vperm.xlu0 %6030, %v1936_v0   ;;  %v1077_v56 = vmul.f32 %v8800_v7, %v7615_v51  ;;  %v1320_v0 = vmul.f32 %v8801_v16, %v7620_v58  ;;  %v8802_v48 = vld [vmem:[#allocation79_spill] sm:$0xff]  ;;  %v2163_v7 = vld [vmem:[#allocation2 + $0x670] sm:$0xff]  ;;  %8804 = vst [vmem:[#allocation61_spill] sm:$0xff] %v7720_v46 }
 0x23b   : > { %v7714_v32 = vmax.f32 %v8802_v48, 0.0  ;;  %v1887_v11 = vpack.c.bf16 %v1868_v14, %v1867_v34  ;;  %v7728_v34 = vsel %vm1376_vm1, %v1366_v52, %v1367_v36  ;;  %v1938_v52 = vld [vmem:[#allocation2 + $0x5f0] sm:$0xff]  ;;  %v8810_v48 = vrot.slane %v7636_v39, 7 }
 0x23c   : > { %v1570_v60 = vpop.permute.xlu1 %1569  ;;  %v1565_v53 = vpop.permute.xlu0 %1564  ;;  %v1098_v38 = vpack.c.bf16 %v1078_v57, %v1077_v56  ;;  %v1340_v55 = vpack.c.bf16 %v1321_v5, %v1320_v0  ;;  %8805 = vst [vmem:[#allocation62_spill] sm:$0xff] %v7728_v34  ;;  %v8806_v57 = vld [vmem:[#allocation41_spill] sm:$0xff] }
 0x23d   : > { %8803 = vst [vmem:[#allocation36_spill] sm:$0xff] %v7714_v32  ;;  %2499 = vperm.xlu1 %6031, %v2405_v17   ;;  %v822_v51 = vrot.slane %v7714_v32, 7  ;;  %v1079_v42 = vmul.f32 %v8806_v57, %v7662_v63  ;;  %v1080_v17 = vmul.f32 %v8807_v10, %v7648_v2  ;;  %v1627_v5 = vmul.f32 %v1570_v60, %v7720_v46  ;;  %v2407_v2 = vld [vmem:[#allocation2 + $0x788] sm:$0xff] }
 0x23e   : > { %2494 = vperm.xlu0 %6030, %v2404_v45   ;;  %3575 = vmatmul.mubr.bf16.gmra.mrb[60].mxu1 %v1098_v38  ;;  %v8808_v45 = vld [vmem:[#allocation65_spill] sm:$0xff]  ;;  %v1369_v38 = vrot.slane %v7636_v39, 1 }
 0x23f   : > { %3582 = vmatprep.mubr.bf16.mxu1 %v1340_v55  ;;  %v1626_v55 = vmul.f32 %v1565_v53, %v7728_v34  ;;  %v1323_v56 = vmul.f32 %v8808_v45, %v7636_v39  ;;  %v7748_v60 = vsel %vm830_vm0, %v8810_v48, %v822_v51  ;;  %v8812_v53 = vld [vmem:[#allocation66_spill] sm:$0xff]  ;;  %v1099_v45 = vpack.c.bf16 %v1080_v17, %v1079_v42 }
 0x240   : > { %3736 = vmatmul.mubr.bf16.gmra.mrb[60].mxu0 %v1645_v49  ;;  %v7722_v16 = vpop.permute.xlu1 %1987  ;;  %v7724_v14 = vpop.permute.xlu0 %1982  ;;  %v1939_v49 = vld [vmem:[#allocation2 + $0x5f8] sm:$0xff]  ;;  %8811 = vst [vmem:[#allocation63_spill] sm:$0xff] %v7748_v60  ;;  %v7767_v17 = vsel %vm1376_vm1, %v1368_v24, %v1369_v38 }
 0x241   : > { %3743 = vmatprep.mubr.bf16.mxu0 %v1887_v11  ;;  %2258 = vperm.xlu1 %6031, %v2164_v3   ;;  %v7742_v3 = vsel %vm830_vm0, %v822_v51, %v8553_v13  ;;  %v1322_v11 = vmul.f32 %v8812_v53, %v7633_v44  ;;  %v1646_v13 = vpack.c.bf16 %v1627_v5, %v1626_v55  ;;  %v2406_v51 = vld [vmem:[#allocation2 + $0x780] sm:$0xff]  ;;  %v8813_v48 = vld [vmem:[#allocation86_spill] sm:$0xff] }
 0x242   : > { %2253 = vperm.xlu0 %6030, %v2163_v7   ;;  %8809 = vst [vmem:[#allocation38_spill] sm:$0xff] %v7742_v3  ;;  %v8560_v7 = vrot.slane %v7714_v32, 1  ;;  %v7757_v34 = vmax.f32 %v8813_v48, 0.0  ;;  %8815 = vst [vmem:[#allocation39_spill] sm:$0xff] %v7767_v17 }
 0x243   : > { %v1341_v63 = vpack.c.bf16 %v1323_v56, %v1322_v11  ;;  %v8817_v56 = vld [vmem:[#allocation69_spill] sm:$0xff]  ;;  %v8818_v11 = vld [vmem:[#allocation43_spill] sm:$0xff] }
 0x244   : > { %v1821_v36 = vpop.permute.xlu1 %1820  ;;  %v1816_v0 = vpop.permute.xlu0 %1815 }
 0x245   : > { %v1870_v57 = vmul.f32 %v1821_v36, %v7742_v3  ;;  %v1869_v10 = vmul.f32 %v1816_v0, %v7748_v60  ;;  %2097 = vperm.xlu1 %6031, %v1939_v49   ;;  %v7763_v36 = vsel %vm1376_vm1, %v1369_v38, %v8560_v7  ;;  %v2166_v49 = vld [vmem:[#allocation2 + $0x688] sm:$0xff]  ;;  %v2165_v0 = vld [vmem:[#allocation2 + $0x680] sm:$0xff]  ;;  %v2633_v7 = vld [vmem:[#allocation2 + $0x810] sm:$0xff] }
 0x246   : > { %2092 = vperm.xlu0 %6030, %v1938_v52   ;;  %3583 = vmatmul.mubr.bf16.gmra.mrb[64].mxu1 %v1099_v45  ;;  %8814 = vst [vmem:[#allocation81_spill] sm:$0xff] %v7763_v36  ;;  %v1325_v52 = vmul.f32 %v8817_v56, %v7705_v19  ;;  %v824_v45 = vrot.slane %v7757_v34, 7 }
 0x247   : > { %v1888_v58 = vpack.c.bf16 %v1870_v57, %v1869_v10  ;;  %3590 = vmatprep.mubr.bf16.mxu1 %v1341_v63  ;;  %v1081_v57 = vmul.f32 %v8818_v11, %v7694_v47  ;;  %v8822_v11 = vrot.slane %v7705_v19, 7 }
 0x248   : > { %3744 = vmatmul.mubr.bf16.gmra.mrb[64].mxu0 %v1646_v13  ;;  %v1580_v53 = vpop.permute.xlu1 %1579  ;;  %v1575_v42 = vpop.permute.xlu0 %1574  ;;  %v8816_v13 = vld [vmem:[#allocation42_spill] sm:$0xff] }
 0x249   : > { %v1629_v5 = vmul.f32 %v1580_v53, %v7763_v36  ;;  %v1628_v55 = vmul.f32 %v1575_v42, %v7767_v17  ;;  %2509 = vperm.xlu1 %6031, %v2407_v2   ;;  %3751 = vmatprep.mubr.bf16.mxu0 %v1888_v58  ;;  %v1082_v63 = vmul.f32 %v8816_v13, %v7690_v59  ;;  %v8819_v2 = vld [vmem:[#allocation70_spill] sm:$0xff]  ;;  %v2632_v53 = vld [vmem:[#allocation2 + $0x808] sm:$0xff]  ;;  %v2631_v42 = vld [vmem:[#allocation2 + $0x800] sm:$0xff] }
 0x24a   : > { %2504 = vperm.xlu0 %6030, %v2406_v51   ;;  %v1324_v58 = vmul.f32 %v8819_v2, %v7714_v32 }
 0x24b   : > { %v1647_v24 = vpack.c.bf16 %v1629_v5, %v1628_v55  ;;  %v1100_v51 = vpack.c.bf16 %v1082_v63, %v1081_v57  ;;  %v8820_v5 = vrot.slane %v7035_v29, 7  ;;  %v7794_v63 = vsel %vm830_vm0, %v8822_v11, %v824_v45 }
 0x24c   : > { %v7777_v38 = vpop.permute.xlu1 %1997  ;;  %v7779_v10 = vpop.permute.xlu0 %1992  ;;  %v1342_v48 = vpack.c.bf16 %v1325_v52, %v1324_v58  ;;  %8823 = vst [vmem:[#allocation79_spill] sm:$0xff] %v7794_v63  ;;  %v1372_v52 = vrot.slane %v7757_v34, 1  ;;  %v8825_v58 = vld [vmem:[#allocation44_spill] sm:$0xff] }
 0x24d   : > { %2268 = vperm.xlu1 %6031, %v2166_v49   ;;  %v7788_v55 = vsel %vm830_vm0, %v824_v45, %v8820_v5  ;;  %v1371_v49 = vrot.slane %v7705_v19, 1  ;;  %v8826_v45 = vld [vmem:[#allocation73_spill] sm:$0xff] }
 0x24e   : > { %2263 = vperm.xlu0 %6030, %v2165_v0   ;;  %3591 = vmatmul.mubr.bf16.gmra.mrb[68].mxu1 %v1100_v51  ;;  %8821 = vst [vmem:[#allocation64_spill] sm:$0xff] %v7788_v55  ;;  %v1084_v51 = vmul.f32 %v8825_v58, %v7742_v3  ;;  %v1327_v5 = vmul.f32 %v8826_v45, %v7035_v29  ;;  %v2409_v3 = vld [vmem:[#allocation2 + $0x798] sm:$0xff]  ;;  %v2408_v19 = vld [vmem:[#allocation2 + $0x790] sm:$0xff] }
 0x24f   : > { %3598 = vmatprep.mubr.bf16.mxu1 %v1342_v48  ;;  %v2634_v48 = vld [vmem:[#allocation2 + $0x818] sm:$0xff] }
 0x250   : > { %3752 = vmatmul.mubr.bf16.gmra.mrb[68].mxu0 %v1647_v24  ;;  %v1831_v13 = vpop.permute.xlu1 %1830  ;;  %v1826_v56 = vpop.permute.xlu0 %1825  ;;  %v8824_v24 = vld [vmem:[#allocation45_spill] sm:$0xff] }
 0x251   : > { %v1872_v0 = vmul.f32 %v1831_v13, %v7788_v55  ;;  %v1871_v57 = vmul.f32 %v1826_v56, %v7794_v63  ;;  %2670 = vperm.xlu1 %6031, %v2632_v53   ;;  %v1083_v2 = vmul.f32 %v8824_v24, %v7748_v60  ;;  %v7808_v13 = vsel %vm1376_vm1, %v1371_v49, %v1372_v52 }
 0x252   : > { %2665 = vperm.xlu0 %6030, %v2631_v42   ;;  %v8827_v53 = vrot.slane %v7714_v32, 1  ;;  %v8828_v42 = vld [vmem:[#allocation74_spill] sm:$0xff] }
 0x253   : > { %v1889_v11 = vpack.c.bf16 %v1872_v0, %v1871_v57  ;;  %v1326_v58 = vmul.f32 %v8828_v42, %v7757_v34  ;;  %v1101_v57 = vpack.c.bf16 %v1084_v51, %v1083_v2  ;;  %v2101_v2 = vmul.f32 %v7433_v28, %v7121_v4  ;;  %v2167_v51 = vld [vmem:[#allocation2 + $0x690] sm:$0xff] }
 0x254   : > { %v1590_v47 = vpop.permute.xlu1 %1589  ;;  %v1585_v56 = vpop.permute.xlu0 %1584  ;;  %v7814_v24 = vsel %vm1376_vm1, %v8827_v53, %v1371_v49 }
 0x255   : > { %v1631_v60 = vmul.f32 %v1590_v47, %v7808_v13  ;;  %v1630_v0 = vmul.f32 %v1585_v56, %v7814_v24  ;;  %2680 = vperm.xlu1 %6031, %v2634_v48   ;;  %3759 = vmatprep.mubr.bf16.mxu0 %v1889_v11  ;;  %v1343_v45 = vpack.c.bf16 %v1327_v5, %v1326_v58  ;;  %v8829_v47 = vld [vmem:[#allocation46_spill] sm:$0xff]  ;;  %v8830_v48 = vld [vmem:[#allocation47_spill] sm:$0xff] }
 0x256   : > { %2675 = vperm.xlu0 %6030, %v2633_v7   ;;  %3599 = vmatmul.mubr.bf16.gmra.mrb[72].mxu1 %v1101_v57  ;;  %v1086_v53 = vmul.f32 %v8829_v47, %v7788_v55  ;;  %v2100_v7 = vmul.f32 %v7435_v21, %v7129_v50  ;;  %v1085_v5 = vmul.f32 %v8830_v48, %v7794_v63  ;;  %v8832_v58 = vld [vmem:[#allocation95_spill] sm:$0xff] }
 0x257   : > { %v1648_v59 = vpack.c.bf16 %v1631_v60, %v1630_v0  ;;  %3606 = vmatprep.mubr.bf16.mxu1 %v1343_v45  ;;  %v2168_v60 = vld [vmem:[#allocation2 + $0x698] sm:$0xff]  ;;  %v2636_v45 = vld [vmem:[#allocation2 + $0x828] sm:$0xff] }
 0x258   : > { %v7820_v32 = vpop.permute.xlu1 %2007  ;;  %v7822_v49 = vpop.permute.xlu0 %2002  ;;  %v1102_v57 = vpack.c.bf16 %v1086_v53, %v1085_v5  ;;  %v2132_v28 = vpack.c.bf16 %v2101_v2, %v2100_v7  ;;  %v8833_v50 = vld [vmem:[#allocation87_spill] sm:$0xff]  ;;  %v2103_v7 = vmul.f32 %v7524_v26, %v7183_v18  ;;  %v2411_v26 = vld [vmem:[#allocation2 + $0x7a8] sm:$0xff] }
 0x259   : > { %2519 = vperm.xlu1 %6031, %v2409_v3   ;;  %3760 = vmatmul.mubr.bf16.gmra.mrb[72].mxu0 %v1648_v59  ;;  %v1373_v3 = vrot.slane %v7035_v29, 1  ;;  %v8831_v59 = vld [vmem:[#allocation94_spill] sm:$0xff]  ;;  %v8834_v48 = vrot.slane %v8833_v50, 1 }
 0x25a   : > { %2514 = vperm.xlu0 %6030, %v2408_v19   ;;  %v2635_v19 = vld [vmem:[#allocation2 + $0x820] sm:$0xff] }
 0x25b   : > { %v7839_v4 = vsel %vm1376_vm1, %v1373_v3, %v8834_v48  ;;  %v2170_v48 = vld [vmem:[#allocation2 + $0x6a8] sm:$0xff] }
 0x25c   : > { %v1841_v11 = vpop.permute.xlu1 %1840  ;;  %v1836_v56 = vpop.permute.xlu0 %1835 }
 0x25d   : > { %v1874_v42 = vmul.f32 %v1841_v11, %v8831_v59  ;;  %v1873_v0 = vmul.f32 %v1836_v56, %v8832_v58  ;;  %2278 = vperm.xlu1 %6031, %v2168_v60   ;;  %v7843_v11 = vsel %vm1376_vm1, %v1372_v52, %v1373_v3  ;;  %v2102_v60 = vmul.f32 %v7526_v23, %v7189_v22  ;;  %v2637_v56 = vld [vmem:[#allocation2 + $0x830] sm:$0xff]  ;;  %v8875_v58 = vld [vmem:[#allocation27_spill] sm:$0xff] }
 0x25e   : > { %2273 = vperm.xlu0 %6030, %v2167_v51   ;;  %3607 = vmatmul.mubr.bf16.gmra.mrb[76].mxu1 %v1102_v57  ;;  %v2638_v51 = vld [vmem:[#allocation2 + $0x838] sm:$0xff]  ;;  %v6121_v52 = vld [vmem:[#allocation8 + $0x208] sm:$0xff]  }
 0x25f   : > { %v1890_v21 = vpack.c.bf16 %v1874_v42, %v1873_v0  ;;  %3808 = vmatprep.mubr.bf16.mxu1 %v2132_v28  ;;  %v2133_v3 = vpack.c.bf16 %v2103_v7, %v2102_v60  ;;  %v2410_v0 = vld [vmem:[#allocation2 + $0x7a0] sm:$0xff] }
 0x260   : > { %v1600_v47 = vpop.permute.xlu1 %1599  ;;  %v1595_v63 = vpop.permute.xlu0 %1594 }
 0x261   : > { %v1633_v53 = vmul.f32 %v1600_v47, %v7839_v4  ;;  %v1632_v2 = vmul.f32 %v1595_v63, %v7843_v11  ;;  %2690 = vperm.xlu1 %6031, %v2636_v45   ;;  %3767 = vmatprep.mubr.bf16.mxu0 %v1890_v21  ;;  %v1891_v63 = vpack.c.bf16 %v6977_v61, %v6983_v27  ;;  %v6122_v45 = vld [vmem:[#allocation8 + $0x210] sm:$0xff]  }
 0x262   : > { %2685 = vperm.xlu0 %6030, %v2635_v19   ;;  %v2105_v21 = vmul.f32 %v7588_v40, %v7243_v25  ;;  %v2104_v19 = vmul.f32 %v7590_v15, %v7249_v31  ;;  %v6123_v40 = vld [vmem:[#allocation8 + $0x218] sm:$0xff]  }
 0x263   : > { %v1649_v5 = vpack.c.bf16 %v1633_v53, %v1632_v2  ;;  %v2169_v53 = vld [vmem:[#allocation2 + $0x6a0] sm:$0xff] }
 0x264   : > { %v7851_v42 = vpop.permute.xlu1 %2017  ;;  %v7853_v1 = vpop.permute.xlu0 %2012 }
 0x265   : > { %2700 = vperm.xlu1 %6031, %v2638_v51   ;;  %3768 = vmatmul.mubr.bf16.gmra.mrb[76].mxu0 %v1649_v5  ;;  %v1892_v51 = vpack.c.bf16 %v6985_v20, %v6990_v54  ;;  %v2134_v5 = vpack.c.bf16 %v2105_v21, %v2104_v19  ;;  %v6125_v19 = vld [vmem:[#allocation8 + $0x228] sm:$0xff]  }
 0x266   : > { %2695 = vperm.xlu0 %6030, %v2637_v56   ;;  %3809 = vmatmul.mubr.bf16.vlgmr.msra.gmra.mrb[80].mxu1 %v1891_v63  ;;  %v2640_v56 = vld [vmem:[#allocation2 + $0x848] sm:$0xff]  ;;  %v2639_v63 = vld [vmem:[#allocation2 + $0x840] sm:$0xff] }
 0x267   : > { %3816 = vmatprep.mubr.bf16.mxu1 %v2133_v3  ;;  %5802 = vmatpush3.bf16.msra.mxu1 %v7483_v33 }
 0x268   : > { %v2430_v23 = vpop.permute.xlu1 %2429  ;;  %5803 = vmatprep.subr.bf16.mxu1 %v6121_v52 }
 0x269   : > { %v2583_v57 = vmul.f32 %v2430_v23, %v6985_v20  ;;  %v2425_v28 = vpop.permute.xlu0 %2424  ;;  %2529 = vperm.xlu1 %6031, %v2411_v26   ;;  %v6124_v20 = vld [vmem:[#allocation8 + $0x220] sm:$0xff]   ;;  %v2642_v26 = vld [vmem:[#allocation2 + $0x858] sm:$0xff] }
 0x26a   : > { %v2582_v47 = vmul.f32 %v2425_v28, %v6990_v54  ;;  %2524 = vperm.xlu0 %6030, %v2410_v0   ;;  %v2107_v54 = vmul.f32 %v7670_v62, %v7303_v41  ;;  %v2641_v0 = vld [vmem:[#allocation2 + $0x850] sm:$0xff] }
 0x26b   : > { %5804 = vmatpush3.bf16.msra.mxu1 %v6121_v52 }
 0x26c   : > { %v2614_v2 = vpack.c.bf16 %v2583_v57, %v2582_v47  ;;  %v2189_v7 = vpop.permute.xlu1 %2188  ;;  %5805 = vmatprep.subr.bf16.mxu1 %v6122_v45 }
 0x26d   : > { %v2342_v33 = vmul.f32 %v2189_v7, %v7048_v6  ;;  %v2184_v60 = vpop.permute.xlu0 %2183  ;;  %2288 = vperm.xlu1 %6031, %v2170_v48   ;;  %v2412_v48 = vld [vmem:[#allocation2 + $0x7b0] sm:$0xff]  ;;  %v8836_v7 = vld [vmem:[#allocation103_spill] sm:$0xff] }
 0x26e   : > { %v2341_v15 = vmul.f32 %v2184_v60, %v7052_v9  ;;  %2283 = vperm.xlu0 %6030, %v2169_v53   ;;  %3969 = vmatprep.mubr.bf16.mxu0 %v2614_v2  ;;  %v2106_v9 = vmul.f32 %v7672_v37, %v7309_v30  ;;  %v2413_v37 = vld [vmem:[#allocation2 + $0x7b8] sm:$0xff] }
 0x26f   : > { %3817 = vmatmul.mubr.bf16.gmra.mrb[84].mxu1 %v1892_v51  ;;  %v6126_v51 = vld [vmem:[#allocation8 + $0x230] sm:$0xff]  }
 0x270   : > { %v2373_v3 = vpack.c.bf16 %v2342_v33, %v2341_v15  ;;  %3824 = vmatprep.mubr.bf16.mxu1 %v2134_v5  ;;  %v7868_v52 = vpop.permute.xlu1 %2027  ;;  %5806 = vmatpush3.bf16.msra.mxu1 %v6122_v45  ;;  %v8835_v45 = vld [vmem:[#allocation92_spill] sm:$0xff]  ;;  %v2135_v47 = vpack.c.bf16 %v2107_v54, %v2106_v9  ;;  %v8838_v5 = vld [vmem:[#allocation49_spill] sm:$0xff] }
 0x271   : > { %v7870_v6 = vpop.permute.xlu0 %2022  ;;  %2710 = vperm.xlu1 %6031, %v2640_v56   ;;  %5807 = vmatprep.subr.bf16.mxu1 %v6123_v40  ;;  %v1893_v21 = vpack.c.bf16 %v7067_v8, %v8835_v45  ;;  %v2108_v15 = vmul.f32 %v7724_v14, %v8838_v5  ;;  %v8839_v56 = vld [vmem:[#allocation101_spill] sm:$0xff] }
 0x272   : > { %2705 = vperm.xlu0 %6030, %v2639_v63   ;;  %3970 = vmatmul.mubr.bf16.vlgmr.msra.gmra.mrb[80].mxu0 %v2373_v3  ;;  %v2172_v3 = vld [vmem:[#allocation2 + $0x6b8] sm:$0xff]  ;;  %v2171_v54 = vld [vmem:[#allocation2 + $0x6b0] sm:$0xff]  ;;  %v2644_v14 = vld [vmem:[#allocation2 + $0x868] sm:$0xff] }
 0x274   : > { %v2440_v23 = vpop.permute.xlu1 %2439  ;;  %5808 = vmatpush3.bf16.msra.mxu1 %v6123_v40 }
 0x275   : > { %v2585_v57 = vmul.f32 %v2440_v23, %v7067_v8  ;;  %v2435_v28 = vpop.permute.xlu0 %2434  ;;  %2720 = vperm.xlu1 %6031, %v2642_v26   ;;  %5809 = vmatprep.subr.bf16.mxu1 %v6124_v20  ;;  %v8837_v8 = vld [vmem:[#allocation24_spill] sm:$0xff] }
 0x276   : > { %v2584_v62 = vmul.f32 %v2435_v28, %v8835_v45  ;;  %2715 = vperm.xlu0 %6030, %v2641_v0   ;;  %v2109_v40 = vmul.f32 %v7722_v16, %v8837_v8  ;;  %v8840_v0 = vld [vmem:[#allocation102_spill] sm:$0xff]  ;;  %v8841_v23 = vld [vmem:[#allocation100_spill] sm:$0xff] }
 0x277   : > { %3825 = vmatmul.mubr.bf16.gmra.mrb[88].mxu1 %v1893_v21  ;;  %v6127_v16 = vld [vmem:[#allocation8 + $0x238] sm:$0xff]  }
 0x278   : > { %v2615_v53 = vpack.c.bf16 %v2585_v57, %v2584_v62  ;;  %3832 = vmatprep.mubr.bf16.mxu1 %v2135_v47  ;;  %v2199_v2 = vpop.permute.xlu1 %2198  ;;  %5810 = vmatpush3.bf16.msra.mxu1 %v6124_v20  ;;  %v1894_v57 = vpack.c.bf16 %v8841_v23, %v8840_v0  ;;  %v2136_v28 = vpack.c.bf16 %v2109_v40, %v2108_v15  ;;  %v2643_v45 = vld [vmem:[#allocation2 + $0x860] sm:$0xff] }
 0x279   : > { %v2344_v33 = vmul.f32 %v2199_v2, %v8836_v7  ;;  %v2194_v60 = vpop.permute.xlu0 %2193  ;;  %2539 = vperm.xlu1 %6031, %v2413_v37   ;;  %5811 = vmatprep.subr.bf16.mxu1 %v6125_v19  ;;  %v2111_v62 = vmul.f32 %v7777_v38, %v7421_v35  ;;  %v8842_v37 = vld [vmem:[#allocation51_spill] sm:$0xff]  ;;  %v2645_v7 = vld [vmem:[#allocation2 + $0x870] sm:$0xff] }
 0x27a   : > { %v2343_v63 = vmul.f32 %v2194_v60, %v8839_v56  ;;  %2534 = vperm.xlu0 %6030, %v2412_v48   ;;  %3977 = vmatprep.mubr.bf16.mxu0 %v2615_v53  ;;  %v2110_v48 = vmul.f32 %v7779_v10, %v8842_v37  ;;  %v2646_v2 = vld [vmem:[#allocation2 + $0x878] sm:$0xff]  ;;  %v8844_v56 = vld [vmem:[#allocation105_spill] sm:$0xff] }
 0x27b   : > { %v8846_v38 = vld [vmem:[#allocation106_spill] sm:$0xff]  ;;  %v2415_v10 = vld [vmem:[#allocation2 + $0x7c8] sm:$0xff] }
 0x27c   : > { %v2374_v9 = vpack.c.bf16 %v2344_v33, %v2343_v63  ;;  %v7886_v20 = vpop.permute.xlu1 %2037  ;;  %5812 = vmatpush3.bf16.msra.mxu1 %v6125_v19  ;;  %v8845_v63 = vld [vmem:[#allocation107_spill] sm:$0xff] }
 0x27d   : > { %v7888_v26 = vpop.permute.xlu0 %2032  ;;  %2298 = vperm.xlu1 %6031, %v2172_v3   ;;  %5813 = vmatprep.subr.bf16.mxu1 %v6126_v51  ;;  %v1895_v3 = vpack.c.bf16 %v8845_v63, %v8844_v56 }
 0x27e   : > { %2293 = vperm.xlu0 %6030, %v2171_v54   ;;  %3978 = vmatmul.mubr.bf16.gmra.mrb[84].mxu0 %v2374_v9  ;;  %v2137_v54 = vpack.c.bf16 %v2111_v62, %v2110_v48 }
 0x27f   : > { %3833 = vmatmul.mubr.bf16.gmra.mrb[92].mxu1 %v1894_v57 }
 0x280   : > { %3840 = vmatprep.mubr.bf16.mxu1 %v2136_v28  ;;  %v2450_v21 = vpop.permute.xlu1 %2449  ;;  %5814 = vmatpush3.bf16.msra.mxu1 %v6126_v51  ;;  %v8843_v51 = vld [vmem:[#allocation104_spill] sm:$0xff]  ;;  %v8847_v28 = vld [vmem:[#allocation29_spill] sm:$0xff] }
 0x281   : > { %v2587_v47 = vmul.f32 %v2450_v21, %v8841_v23  ;;  %v2445_v19 = vpop.permute.xlu0 %2444  ;;  %2730 = vperm.xlu1 %6031, %v2644_v14   ;;  %5815 = vmatprep.subr.bf16.mxu1 %v6127_v16  ;;  %v2113_v14 = vmul.f32 %v7820_v32, %v8847_v28  ;;  %v2648_v32 = vld [vmem:[#allocation2 + $0x888] sm:$0xff] }
 0x282   : > { %v2586_v53 = vmul.f32 %v2445_v19, %v8840_v0  ;;  %2725 = vperm.xlu0 %6030, %v2643_v45   ;;  %v2414_v0 = vld [vmem:[#allocation2 + $0x7c0] sm:$0xff] }
 0x283   : > { %v8848_v45 = vld [vmem:[#allocation28_spill] sm:$0xff] }
 0x284   : > { %v2616_v33 = vpack.c.bf16 %v2587_v47, %v2586_v53  ;;  %v2209_v60 = vpop.permute.xlu1 %2208  ;;  %5816 = vmatpush3.bf16.msra.mxu1 %v6127_v16  ;;  %v2112_v21 = vmul.f32 %v7822_v49, %v8848_v45  ;;  %v2174_v47 = vld [vmem:[#allocation2 + $0x6c8] sm:$0xff]  ;;  %v2173_v19 = vld [vmem:[#allocation2 + $0x6c0] sm:$0xff] }
 0x285   : > { %v2346_v40 = vmul.f32 %v2209_v60, %v8843_v51  ;;  %v2204_v15 = vpop.permute.xlu0 %2203  ;;  %2740 = vperm.xlu1 %6031, %v2646_v2   ;;  %v8849_v2 = vld [vmem:[#allocation108_spill] sm:$0xff] }
 0x286   : > { %v2345_v9 = vmul.f32 %v2204_v15, %v8846_v38  ;;  %2735 = vperm.xlu0 %6030, %v2645_v7   ;;  %3985 = vmatprep.mubr.bf16.mxu0 %v2616_v33  ;;  %v8850_v7 = vld [vmem:[#allocation109_spill] sm:$0xff]  ;;  %v2138_v60 = vpack.c.bf16 %v2113_v14, %v2112_v21 }
 0x287   : > { %3841 = vmatmul.mubr.bf16.gmra.mrb[96].mxu1 %v1895_v3  ;;  %v1896_v33 = vpack.c.bf16 %v8850_v7, %v8849_v2  ;;  %v8851_v3 = vld [vmem:[#allocation111_spill] sm:$0xff]  ;;  %v2649_v21 = vld [vmem:[#allocation2 + $0x890] sm:$0xff] }
 0x288   : > { %v2375_v23 = vpack.c.bf16 %v2346_v40, %v2345_v9  ;;  %3848 = vmatprep.mubr.bf16.mxu1 %v2137_v54  ;;  %v7902_v57 = vpop.permute.xlu1 %2047  ;;  %v2647_v40 = vld [vmem:[#allocation2 + $0x880] sm:$0xff] }
 0x289   : > { %v7904_v16 = vpop.permute.xlu0 %2042  ;;  %2549 = vperm.xlu1 %6031, %v2415_v10   ;;  %v8853_v10 = vld [vmem:[#allocation55_spill] sm:$0xff] }
 0x28a   : > { %2544 = vperm.xlu0 %6030, %v2414_v0   ;;  %3986 = vmatmul.mubr.bf16.gmra.mrb[88].mxu0 %v2375_v23  ;;  %v2114_v0 = vmul.f32 %v7853_v1, %v8853_v10  ;;  %v8854_v23 = vld [vmem:[#allocation110_spill] sm:$0xff] }
 0x28b   : > { %v2416_v1 = vld [vmem:[#allocation2 + $0x7d0] sm:$0xff] }
 0x28c   : > { %v2460_v62 = vpop.permute.xlu1 %2459 }
 0x28d   : > { %v2589_v48 = vmul.f32 %v2460_v62, %v8845_v63  ;;  %v2455_v53 = vpop.permute.xlu0 %2454  ;;  %2308 = vperm.xlu1 %6031, %v2174_v47   ;;  %v8852_v63 = vld [vmem:[#allocation31_spill] sm:$0xff] }
 0x28e   : > { %v2588_v51 = vmul.f32 %v2455_v53, %v8844_v56  ;;  %2303 = vperm.xlu0 %6030, %v2173_v19   ;;  %v2115_v9 = vmul.f32 %v7851_v42, %v8852_v63  ;;  %v2650_v56 = vld [vmem:[#allocation2 + $0x898] sm:$0xff]  ;;  %v8856_v53 = vld [vmem:[#allocation89_spill] sm:$0xff] }
 0x28f   : > { %3849 = vmatmul.mubr.bf16.gmra.mrb[100].mxu1 %v1896_v33  ;;  %v2417_v42 = vld [vmem:[#allocation2 + $0x7d8] sm:$0xff] }
 0x290   : > { %v2617_v49 = vpack.c.bf16 %v2589_v48, %v2588_v51  ;;  %3856 = vmatprep.mubr.bf16.mxu1 %v2138_v60  ;;  %v2219_v15 = vpop.permute.xlu1 %2218  ;;  %v8855_v48 = vld [vmem:[#allocation48_spill] sm:$0xff]  ;;  %v2139_v60 = vpack.c.bf16 %v2115_v9, %v2114_v0  ;;  %v2176_v9 = vld [vmem:[#allocation2 + $0x6d8] sm:$0xff]  ;;  %v2175_v0 = vld [vmem:[#allocation2 + $0x6d0] sm:$0xff] }
 0x291   : > { %v2348_v54 = vmul.f32 %v2219_v15, %v8851_v3  ;;  %v2214_v38 = vpop.permute.xlu0 %2213  ;;  %2750 = vperm.xlu1 %6031, %v2648_v32   ;;  %v1897_v33 = vpack.c.bf16 %v8856_v53, %v8855_v48  ;;  %v8858_v3 = vld [vmem:[#allocation33_spill] sm:$0xff] }
 0x292   : > { %v2347_v14 = vmul.f32 %v2214_v38, %v8854_v23  ;;  %2745 = vperm.xlu0 %6030, %v2647_v40   ;;  %3993 = vmatprep.mubr.bf16.mxu0 %v2617_v49  ;;  %v8857_v49 = vld [vmem:[#allocation57_spill] sm:$0xff] }
 0x293   : > { %v2117_v15 = vmul.f32 %v7868_v52, %v8857_v49 }
 0x294   : > { %v2376_v47 = vpack.c.bf16 %v2348_v54, %v2347_v14  ;;  %v7920_v19 = vpop.permute.xlu1 %2057  ;;  %v2116_v54 = vmul.f32 %v7870_v6, %v8858_v3  ;;  %v2652_v6 = vld [vmem:[#allocation2 + $0x8a8] sm:$0xff] }
 0x295   : > { %v7922_v62 = vpop.permute.xlu0 %2052  ;;  %2760 = vperm.xlu1 %6031, %v2650_v56   ;;  %v8859_v56 = vld [vmem:[#allocation112_spill] sm:$0xff] }
 0x296   : > { %2755 = vperm.xlu0 %6030, %v2649_v21   ;;  %3994 = vmatmul.mubr.bf16.gmra.mrb[92].mxu0 %v2376_v47 }
 0x297   : > { %3857 = vmatmul.mubr.bf16.gmra.mrb[104].mxu1 %v1897_v33  ;;  %v8861_v33 = vld [vmem:[#allocation50_spill] sm:$0xff] }
 0x298   : > { %3864 = vmatprep.mubr.bf16.mxu1 %v2139_v60  ;;  %v2470_v51 = vpop.permute.xlu1 %2469 }
 0x299   : > { %v2591_v32 = vmul.f32 %v2470_v51, %v8850_v7  ;;  %v2465_v40 = vpop.permute.xlu0 %2464  ;;  %2559 = vperm.xlu1 %6031, %v2417_v42   ;;  %v8860_v7 = vld [vmem:[#allocation84_spill] sm:$0xff]  ;;  %v2140_v42 = vpack.c.bf16 %v2117_v15, %v2116_v54  ;;  %v8862_v51 = vld [vmem:[#allocation25_spill] sm:$0xff]  ;;  %v2118_v15 = vmul.f32 %v7888_v26, %v7644_v43  ;;  %v2654_v54 = vld [vmem:[#allocation2 + $0x8b8] sm:$0xff] }
 0x29a   : > { %v2590_v38 = vmul.f32 %v2465_v40, %v8849_v2  ;;  %2554 = vperm.xlu0 %6030, %v2416_v1   ;;  %v1898_v60 = vpack.c.bf16 %v8861_v33, %v8860_v7  ;;  %v2651_v2 = vld [vmem:[#allocation2 + $0x8a0] sm:$0xff] }
 0x29c   : > { %v2618_v23 = vpack.c.bf16 %v2591_v32, %v2590_v38  ;;  %v2229_v14 = vpop.permute.xlu1 %2228  ;;  %v2119_v38 = vmul.f32 %v7886_v20, %v7640_v12  ;;  %v2419_v20 = vld [vmem:[#allocation2 + $0x7e8] sm:$0xff] }
 0x29d   : > { %v2350_v21 = vmul.f32 %v2229_v14, %v8859_v56  ;;  %v2224_v47 = vpop.permute.xlu0 %2223  ;;  %2318 = vperm.xlu1 %6031, %v2176_v9   ;;  %v2653_v9 = vld [vmem:[#allocation2 + $0x8b0] sm:$0xff]  ;;  %v8863_v56 = vld [vmem:[#allocation68_spill] sm:$0xff] }
 0x29e   : > { %v2349_v52 = vmul.f32 %v2224_v47, %v8862_v51  ;;  %2313 = vperm.xlu0 %6030, %v2175_v0   ;;  %4001 = vmatprep.mubr.bf16.mxu0 %v2618_v23  ;;  %v2418_v51 = vld [vmem:[#allocation2 + $0x7e0] sm:$0xff] }
 0x29f   : > { %3865 = vmatmul.mubr.bf16.gmra.mrb[108].mxu1 %v1898_v60  ;;  %v2141_v60 = vpack.c.bf16 %v2119_v38, %v2118_v15  ;;  %v8868_v38 = vld [vmem:[#allocation88_spill] sm:$0xff] }
 0x2a0   : > { %v2377_v1 = vpack.c.bf16 %v2350_v21, %v2349_v52  ;;  %3872 = vmatprep.mubr.bf16.mxu1 %v2140_v42  ;;  %v7936_v40 = vpop.permute.xlu1 %2067  ;;  %v8864_v21 = vld [vmem:[#allocation52_spill] sm:$0xff] }
 0x2a1   : > { %v7938_v32 = vpop.permute.xlu0 %2062  ;;  %2770 = vperm.xlu1 %6031, %v2652_v6   ;;  %v1899_v47 = vpack.c.bf16 %v8864_v21, %v8863_v56  ;;  %v8865_v6 = vld [vmem:[#allocation26_spill] sm:$0xff] }
 0x2a2   : > { %2765 = vperm.xlu0 %6030, %v2651_v2   ;;  %4002 = vmatmul.mubr.bf16.gmra.mrb[96].mxu0 %v2377_v1 }
 0x2a4   : > { %v2480_v0 = vpop.permute.xlu1 %2479 }
 0x2a5   : > { %v2593_v23 = vmul.f32 %v2480_v0, %v8856_v53  ;;  %v2475_v14 = vpop.permute.xlu0 %2474  ;;  %2780 = vperm.xlu1 %6031, %v2654_v54   ;;  %v8866_v53 = vld [vmem:[#allocation60_spill] sm:$0xff]  ;;  %v8867_v0 = vld [vmem:[#allocation34_spill] sm:$0xff] }
 0x2a6   : > { %v2592_v42 = vmul.f32 %v2475_v14, %v8855_v48  ;;  %2775 = vperm.xlu0 %6030, %v2653_v9   ;;  %v2121_v54 = vmul.f32 %v7902_v57, %v8866_v53  ;;  %v2120_v27 = vmul.f32 %v7904_v16, %v8867_v0  ;;  %v2178_v48 = vld [vmem:[#allocation2 + $0x6e8] sm:$0xff]  ;;  %v2177_v9 = vld [vmem:[#allocation2 + $0x6e0] sm:$0xff] }
 0x2a7   : > { %3873 = vmatmul.mubr.bf16.gmra.mrb[112].mxu1 %v1899_v47  ;;  %v2656_v57 = vld [vmem:[#allocation2 + $0x8c8] sm:$0xff]  ;;  %v2655_v16 = vld [vmem:[#allocation2 + $0x8c0] sm:$0xff] }
 0x2a8   : > { %v2619_v26 = vpack.c.bf16 %v2593_v23, %v2592_v42  ;;  %3880 = vmatprep.mubr.bf16.mxu1 %v2141_v60  ;;  %v2239_v52 = vpop.permute.xlu1 %2238  ;;  %v8869_v60 = vld [vmem:[#allocation30_spill] sm:$0xff]  ;;  %v8870_v42 = vld [vmem:[#allocation53_spill] sm:$0xff] }
 0x2a9   : > { %v2352_v2 = vmul.f32 %v2239_v52, %v8865_v6  ;;  %v2234_v1 = vpop.permute.xlu0 %2233  ;;  %2569 = vperm.xlu1 %6031, %v2419_v20   ;;  %v1900_v20 = vpack.c.bf16 %v8870_v42, %v8869_v60  ;;  %v2142_v52 = vpack.c.bf16 %v2121_v54, %v2120_v27  ;;  %v2658_v27 = vld [vmem:[#allocation2 + $0x8d8] sm:$0xff]  ;;  %v2657_v54 = vld [vmem:[#allocation2 + $0x8d0] sm:$0xff] }
 0x2aa   : > { %v2351_v15 = vmul.f32 %v2234_v1, %v8868_v38  ;;  %2564 = vperm.xlu0 %6030, %v2418_v51   ;;  %4009 = vmatprep.mubr.bf16.mxu0 %v2619_v26  ;;  %v8871_v1 = vld [vmem:[#allocation62_spill] sm:$0xff] }
 0x2ab   : > { %v2122_v38 = vmul.f32 %v7922_v62, %v8871_v1  ;;  %v2421_v62 = vld [vmem:[#allocation2 + $0x7f8] sm:$0xff]  ;;  %v2660_v1 = vld [vmem:[#allocation2 + $0x8e8] sm:$0xff] }
 0x2ac   : > { %v2378_v14 = vpack.c.bf16 %v2352_v2, %v2351_v15  ;;  %v7954_v23 = vpop.permute.xlu1 %2077  ;;  %v2123_v2 = vmul.f32 %v7920_v19, %v7720_v46 }
 0x2ad   : > { %v7956_v47 = vpop.permute.xlu0 %2072  ;;  %2328 = vperm.xlu1 %6031, %v2178_v48  }
 0x2ae   : > { %2323 = vperm.xlu0 %6030, %v2177_v9   ;;  %4010 = vmatmul.mubr.bf16.gmra.mrb[100].mxu0 %v2378_v14  ;;  %v8872_v14 = vld [vmem:[#allocation72_spill] sm:$0xff]  ;;  %v2143_v61 = vpack.c.bf16 %v2123_v2, %v2122_v38  ;;  %v2124_v2 = vmul.f32 %v7938_v32, %v7767_v17 }
 0x2af   : > { %3881 = vmatmul.mubr.bf16.gmra.mrb[116].mxu1 %v1900_v20 }
 0x2b0   : > { %3888 = vmatprep.mubr.bf16.mxu1 %v2142_v52  ;;  %v2490_v51 = vpop.permute.xlu1 %2489 }
 0x2b1   : > { %v2595_v26 = vmul.f32 %v2490_v51, %v8861_v33  ;;  %v2485_v6 = vpop.permute.xlu0 %2484  ;;  %2790 = vperm.xlu1 %6031, %v2656_v57   ;;  %v8873_v33 = vld [vmem:[#allocation67_spill] sm:$0xff]  ;;  %v8874_v51 = vld [vmem:[#allocation56_spill] sm:$0xff] }
 0x2b2   : > { %v2594_v15 = vmul.f32 %v2485_v6, %v8860_v7  ;;  %2785 = vperm.xlu0 %6030, %v2655_v16   ;;  %v1901_v57 = vpack.c.bf16 %v8874_v51, %v8873_v33  ;;  %v2420_v7 = vld [vmem:[#allocation2 + $0x7f0] sm:$0xff] }
 0x2b4   : > { %v2620_v48 = vpack.c.bf16 %v2595_v26, %v2594_v15  ;;  %v2249_v9 = vpop.permute.xlu1 %2248  ;;  %v2125_v15 = vmul.f32 %v7936_v40, %v7763_v36  ;;  %v8876_v40 = vld [vmem:[#allocation35_spill] sm:$0xff] }
 0x2b5   : > { %v2354_v20 = vmul.f32 %v2249_v9, %v8872_v14  ;;  %v2244_v52 = vpop.permute.xlu0 %2243  ;;  %2800 = vperm.xlu1 %6031, %v2658_v27  }
 0x2b6   : > { %v2353_v19 = vmul.f32 %v2244_v52, %v8875_v58  ;;  %2795 = vperm.xlu0 %6030, %v2657_v54   ;;  %4017 = vmatprep.mubr.bf16.mxu0 %v2620_v48  ;;  %v2180_v58 = vld [vmem:[#allocation2 + $0x6f8] sm:$0xff]  ;;  %v7978_v54 = vld [vmem:[#allocation10] ss:$0 sm:$0xff]  ;;  %v2144_v32 = vpack.c.bf16 %v2125_v15, %v2124_v2  ;;  %v2127_v15 = vmul.f32 %v7954_v23, %v7808_v13 }
 0x2b7   : > { %3889 = vmatmul.mubr.bf16.gmra.mrb[120].mxu1 %v1901_v57  ;;  %v2126_v2 = vmul.f32 %v7956_v47, %v7814_v24 }
 0x2b8   : > { %v2379_v16 = vpack.c.bf16 %v2354_v20, %v2353_v19  ;;  %3896 = vmatprep.mubr.bf16.mxu1 %v2143_v61  ;;  %v7970_v6 = vpop.permute.xlu1 %2087  ;;  %v2179_v61 = vld [vmem:[#allocation2 + $0x6f0] sm:$0xff] }
 0x2b9   : > { %v7972_v26 = vpop.permute.xlu0 %2082  ;;  %2579 = vperm.xlu1 %6031, %v2421_v62   ;;  %v5273_v38 = vpop.f32.mrb[16].mxu1  ;;  %v8877_v62 = vld [vmem:[#allocation32_spill] sm:$0xff] }
 0x2ba   : > { %2574 = vperm.xlu0 %6030, %v2420_v7   ;;  %4018 = vmatmul.mubr.bf16.gmra.mrb[104].mxu0 %v2379_v16  ;;  %v5274_v48 = vpop.f32.mrb[17].mxu1  ;;  %v1902_v59 = vpack.c.bf16 %v8877_v62, %v8876_v40 }
 0x2bb   : > { %v5385_v27 = vpop.f32.mrb[16].mxu0  ;;  %v5275_v9 = vadd.f32 %v5274_v48, %v5273_v38  ;;  %v5276_v20 = vpop.f32.mrb[18].mxu1 }
 0x2bc   : > { %v5386_v14 = vpop.f32.mrb[17].mxu0  ;;  %v5277_v19 = vpop.f32.mrb[19].mxu1 }
 0x2bd   : > { %v5387_v52 = vadd.f32 %v5386_v14, %v5385_v27  ;;  %v5388_v57 = vpop.f32.mrb[18].mxu0  ;;  %2338 = vperm.xlu1 %6031, %v2180_v58   ;;  %v3489_v7 = vadd.f32 %v5275_v9, %v7978_v54  ;;  %v5278_v16 = vadd.f32 %v5277_v19, %v5276_v20  ;;  %v2500_v36 = vpop.permute.xlu1 %2499  ;;  %v2659_v27 = vld [vmem:[#allocation2 + $0x8e0] sm:$0xff]  ;;  %v8879_v9 = vld [vmem:[#allocation54_spill] sm:$0xff] }
 0x2be   : > { %v5389_v17 = vpop.f32.mrb[19].mxu0  ;;  %2333 = vperm.xlu0 %6030, %v2179_v61   ;;  %v2597_v38 = vmul.f32 %v2500_v36, %v8864_v21  ;;  %v2495_v48 = vpop.permute.xlu0 %2494  ;;  %v2662_v61 = vld [vmem:[#allocation2 + $0x8f8] sm:$0xff] }
 0x2bf   : > { %v5390_v46 = vadd.f32 %v5389_v17, %v5388_v57  ;;  %3897 = vmatmul.mubr.bf16.gmra.mrb[124].mxu1 %v1902_v59  ;;  %v7984_v14 = vadd.f32 %v5387_v52, %v3489_v7  ;;  %v3492_v58 = vadd.f32 %v5278_v16, %v7978_v54  ;;  %v2596_v55 = vmul.f32 %v2495_v48, %v8863_v56  ;;  %v2661_v56 = vld [vmem:[#allocation2 + $0x8f0] sm:$0xff]  ;;  %v8880_v19 = vld [vmem:[#allocation71_spill] sm:$0xff] }
 0x2c0   : > { %3904 = vmatprep.mubr.bf16.mxu1 %v2144_v32 }
 0x2c1   : > { %2810 = vperm.xlu1 %6031, %v2660_v1   ;;  %v7992_v17 = vadd.f32 %v5390_v46, %v3492_v58  ;;  %v2621_v36 = vpack.c.bf16 %v2597_v38, %v2596_v55  ;;  %v2259_v21 = vpop.permute.xlu1 %2258  ;;  %v5279_v59 = vpop.f32.mrb[20].mxu1  ;;  %v1903_v55 = vpack.c.bf16 %v7636_v39, %v7633_v44  ;;  %v2145_v38 = vpack.c.bf16 %v2127_v15, %v2126_v2 }
 0x2c2   : > { %2805 = vperm.xlu0 %6030, %v2659_v27   ;;  %v2356_v20 = vmul.f32 %v2259_v21, %v8879_v9  ;;  %v2254_v52 = vpop.permute.xlu0 %2253  ;;  %v5280_v32 = vpop.f32.mrb[21].mxu1  ;;  %v2129_v15 = vmul.f32 %v7970_v6, %v7839_v4  ;;  %v2128_v2 = vmul.f32 %v7972_v26, %v7843_v11 }
 0x2c3   : > { %8878 = vst [vmem:[#allocation41_spill] sm:$0xff] %v7992_v17  ;;  %v5391_v57 = vpop.f32.mrb[20].mxu0  ;;  %v2355_v1 = vmul.f32 %v2254_v52, %v8880_v19  ;;  %4025 = vmatprep.mubr.bf16.mxu0 %v2621_v36  ;;  %v5281_v23 = vadd.f32 %v5280_v32, %v5279_v59  ;;  %v5282_v47 = vpop.f32.mrb[22].mxu1 }
 0x2c4   : > { %v5392_v7 = vpop.f32.mrb[21].mxu0  ;;  %v5283_v27 = vpop.f32.mrb[23].mxu1 }
 0x2c5   : > { %v5393_v16 = vadd.f32 %v5392_v7, %v5391_v57  ;;  %v5394_v46 = vpop.f32.mrb[22].mxu0  ;;  %2820 = vperm.xlu1 %6031, %v2662_v61   ;;  %v2380_v48 = vpack.c.bf16 %v2356_v20, %v2355_v1  ;;  %v3497_v21 = vadd.f32 %v5281_v23, %v7978_v54  ;;  %v5284_v9 = vadd.f32 %v5283_v27, %v5282_v47  ;;  %v2098_v19 = vpop.permute.xlu1 %2097 }
 0x2c6   : > { %v5395_v58 = vpop.f32.mrb[23].mxu0  ;;  %2815 = vperm.xlu0 %6030, %v2661_v56   ;;  %v2093_v17 = vpop.permute.xlu0 %2092 }
 0x2c7   : > { %v5396_v52 = vadd.f32 %v5395_v58, %v5394_v46  ;;  %3905 = vmatmul.mubr.bf16.gmra.mrb[128].mxu1 %v1903_v55  ;;  %4026 = vmatmul.mubr.bf16.gmra.mrb[108].mxu0 %v2380_v48  ;;  %v7999_v36 = vadd.f32 %v5393_v16, %v3497_v21  ;;  %v3500_v59 = vadd.f32 %v5284_v9, %v7978_v54  ;;  %v8881_v55 = vld [vmem:[#allocation36_spill] sm:$0xff] }
 0x2c8   : > { %3912 = vmatprep.mubr.bf16.mxu1 %v2145_v38  ;;  %v8882_v38 = vld [vmem:[#allocation37_spill] sm:$0xff]  ;;  %v2146_v48 = vpack.c.bf16 %v2129_v15, %v2128_v2  ;;  %v8885_v2 = vld [vmem:[#allocation78_spill] sm:$0xff] }
 0x2c9   : > { %v5285_v61 = vpop.f32.mrb[24].mxu1  ;;  %v8006_v20 = vadd.f32 %v5396_v52, %v3500_v59  ;;  %v2510_v57 = vpop.permute.xlu1 %2509  ;;  %v1904_v6 = vpack.c.bf16 %v8882_v38, %v8881_v55 }
 0x2ca   : > { %v2505_v56 = vpop.permute.xlu0 %2504  ;;  %v2599_v1 = vmul.f32 %v2510_v57, %v8870_v42  ;;  %v5286_v23 = vpop.f32.mrb[25].mxu1  ;;  %v8883_v57 = vld [vmem:[#allocation76_spill] sm:$0xff] }
 0x2cb   : > { %v2598_v32 = vmul.f32 %v2505_v56, %v8869_v60  ;;  %v5397_v7 = vpop.f32.mrb[24].mxu0  ;;  %v5287_v16 = vadd.f32 %v5286_v23, %v5285_v61  ;;  %v5288_v46 = vpop.f32.mrb[26].mxu1 }
 0x2cc   : > { %v5398_v47 = vpop.f32.mrb[25].mxu0  ;;  %v5289_v21 = vpop.f32.mrb[27].mxu1 }
 0x2cd   : > { %v2622_v27 = vpack.c.bf16 %v2599_v1, %v2598_v32  ;;  %v5399_v26 = vadd.f32 %v5398_v47, %v5397_v7  ;;  %v5400_v58 = vpop.f32.mrb[26].mxu0  ;;  %v3505_v9 = vadd.f32 %v5287_v16, %v7978_v54  ;;  %v5290_v52 = vadd.f32 %v5289_v21, %v5288_v46  ;;  %v2269_v42 = vpop.permute.xlu1 %2268  ;;  %v8886_v32 = vld [vmem:[#allocation97_spill] sm:$0xff]  ;;  %v8887_v47 = vld [vmem:[#allocation96_spill] sm:$0xff] }
 0x2ce   : > { %v5401_v59 = vpop.f32.mrb[27].mxu0  ;;  %v2358_v56 = vmul.f32 %v2269_v42, %v8883_v57  ;;  %v2264_v61 = vpop.permute.xlu0 %2263  ;;  %v2131_v7 = vmul.f32 %v2098_v19, %v8886_v32  ;;  %v2130_v16 = vmul.f32 %v2093_v17, %v8887_v47 }
 0x2cf   : > { %3913 = vmatmul.mubr.bf16.gmra.mrb[132].mxu1 %v1904_v6  ;;  %v5402_v60 = vadd.f32 %v5401_v59, %v5400_v58  ;;  %4033 = vmatprep.mubr.bf16.mxu0 %v2622_v27  ;;  %v8014_v23 = vadd.f32 %v5399_v26, %v3505_v9  ;;  %v3508_v15 = vadd.f32 %v5290_v52, %v7978_v54 }
 0x2d0   : > { %3920 = vmatprep.mubr.bf16.mxu1 %v2146_v48  ;;  %v2357_v1 = vmul.f32 %v2264_v61, %v8885_v2  ;;  %v1905_v9 = vpack.c.bf16 %v7035_v29, %v7757_v34  ;;  %v2147_v52 = vpack.c.bf16 %v2131_v7, %v2130_v16 }
 0x2d1   : > { %8884 = vst [vmem:[#allocation40_spill] sm:$0xff] %v8014_v23  ;;  %v5291_v46 = vpop.f32.mrb[28].mxu1  ;;  %v8020_v21 = vadd.f32 %v5402_v60, %v3508_v15  ;;  %v2671_v58 = vpop.permute.xlu1 %2670 }
 0x2d2   : > { %v2381_v6 = vpack.c.bf16 %v2358_v56, %v2357_v1  ;;  %v2666_v42 = vpop.permute.xlu0 %2665  ;;  %v5292_v57 = vpop.f32.mrb[29].mxu1 }
 0x2d3   : > { %8888 = vst [vmem:[#allocation65_spill] sm:$0xff] %v8020_v21  ;;  %v5403_v59 = vpop.f32.mrb[28].mxu0  ;;  %v5293_v27 = vadd.f32 %v5292_v57, %v5291_v46  ;;  %v5294_v26 = vpop.f32.mrb[30].mxu1  ;;  %v2824_v57 = vmul.f32 %v2671_v58, %v7183_v18  ;;  %v2823_v7 = vmul.f32 %v2666_v42, %v7189_v22 }
 0x2d4   : > { %v5404_v48 = vpop.f32.mrb[29].mxu0  ;;  %4034 = vmatmul.mubr.bf16.gmra.mrb[112].mxu0 %v2381_v6  ;;  %v5295_v2 = vpop.f32.mrb[31].mxu1 }
 0x2d5   : > { %v5405_v61 = vadd.f32 %v5404_v48, %v5403_v59  ;;  %v5406_v19 = vpop.f32.mrb[30].mxu0  ;;  %v3513_v17 = vadd.f32 %v5293_v27, %v7978_v54  ;;  %v5296_v60 = vadd.f32 %v5295_v2, %v5294_v26  ;;  %v2681_v56 = vpop.permute.xlu1 %2680  ;;  %v2855_v18 = vpack.c.bf16 %v2824_v57, %v2823_v7 }
 0x2d6   : > { %v5407_v15 = vpop.f32.mrb[31].mxu0  ;;  %v2676_v21 = vpop.permute.xlu0 %2675 }
 0x2d7   : > { %3921 = vmatmul.mubr.bf16.gmra.mrb[136].mxu1 %v1905_v9  ;;  %v5408_v1 = vadd.f32 %v5407_v15, %v5406_v19  ;;  %v8025_v46 = vadd.f32 %v5405_v61, %v3513_v17  ;;  %v3516_v6 = vadd.f32 %v5296_v60, %v7978_v54  ;;  %v8891_v60 = vld [vmem:[#allocation90_spill] sm:$0xff]  ;;  %v2825_v23 = vmul.f32 %v2676_v21, %v7249_v31 }
 0x2d8   : > { %3928 = vmatprep.mubr.bf16.mxu1 %v2147_v52  ;;  %v1906_v15 = vpack.c.bf16 %v8891_v60, %v8833_v50 }
 0x2d9   : > { %8889 = vst [vmem:[#allocation66_spill] sm:$0xff] %v8025_v46  ;;  %v5297_v16 = vpop.f32.mrb[32].mxu1  ;;  %v8030_v59 = vadd.f32 %v5408_v1, %v3516_v6  ;;  %v2520_v48 = vpop.permute.xlu1 %2519 }
 0x2da   : > { %v2601_v26 = vmul.f32 %v2520_v48, %v8874_v51  ;;  %v2515_v2 = vpop.permute.xlu0 %2514  ;;  %v5298_v9 = vpop.f32.mrb[33].mxu1  ;;  %v2826_v48 = vmul.f32 %v2681_v56, %v7243_v25 }
 0x2db   : > { %8890 = vst [vmem:[#allocation86_spill] sm:$0xff] %v8030_v59  ;;  %v5409_v27 = vpop.f32.mrb[32].mxu0  ;;  %v2600_v19 = vmul.f32 %v2515_v2, %v8873_v33  ;;  %v5299_v52 = vadd.f32 %v5298_v9, %v5297_v16  ;;  %v5300_v17 = vpop.f32.mrb[34].mxu1  ;;  %v8892_v16 = vld [vmem:[#allocation58_spill] sm:$0xff] }
 0x2dc   : > { %v5410_v61 = vpop.f32.mrb[33].mxu0  ;;  %v5301_v42 = vpop.f32.mrb[35].mxu1 }
 0x2dd   : > { %v5411_v58 = vadd.f32 %v5410_v61, %v5409_v27  ;;  %v5412_v22 = vpop.f32.mrb[34].mxu0  ;;  %v2623_v1 = vpack.c.bf16 %v2601_v26, %v2600_v19  ;;  %v3521_v6 = vadd.f32 %v5299_v52, %v7978_v54  ;;  %v5302_v59 = vadd.f32 %v5301_v42, %v5300_v17  ;;  %v2279_v51 = vpop.permute.xlu1 %2278  ;;  %v8893_v27 = vld [vmem:[#allocation77_spill] sm:$0xff] }
 0x2de   : > { %v5413_v46 = vpop.f32.mrb[35].mxu0  ;;  %v2360_v2 = vmul.f32 %v2279_v51, %v8892_v16  ;;  %v2274_v9 = vpop.permute.xlu0 %2273 }
 0x2df   : > { %3929 = vmatmul.mubr.bf16.gmra.mrb[140].mxu1 %v1906_v15  ;;  %v5414_v33 = vadd.f32 %v5413_v46, %v5412_v22  ;;  %v8040_v57 = vadd.f32 %v5411_v58, %v3521_v6  ;;  %v3524_v7 = vadd.f32 %v5302_v59, %v7978_v54  ;;  %v2359_v26 = vmul.f32 %v2274_v9, %v8893_v27 }
 0x2e0   : > { %5817 = vmatprep.mubr.bf16.mxu1 %v2855_v18  ;;  %4041 = vmatprep.mubr.bf16.mxu0 %v2623_v1  ;;  %v2856_v18 = vpack.c.bf16 %v2826_v48, %v2825_v23 }
 0x2e1   : > { %v5303_v19 = vpop.f32.mrb[36].mxu1  ;;  %v8044_v52 = vadd.f32 %v5414_v33, %v3524_v7  ;;  %v2382_v61 = vpack.c.bf16 %v2360_v2, %v2359_v26  ;;  %v2691_v17 = vpop.permute.xlu1 %2690 }
 0x2e2   : > { %v2828_v56 = vmul.f32 %v2691_v17, %v7303_v41  ;;  %v2686_v46 = vpop.permute.xlu0 %2685  ;;  %v5304_v15 = vpop.f32.mrb[37].mxu1 }
 0x2e3   : > { %v5415_v25 = vpop.f32.mrb[36].mxu0  ;;  %v2827_v31 = vmul.f32 %v2686_v46, %v7309_v30  ;;  %v5305_v21 = vadd.f32 %v5304_v15, %v5303_v19  ;;  %4042 = vmatmul.mubr.bf16.gmra.mrb[116].mxu0 %v2382_v61  ;;  %v5306_v59 = vpop.f32.mrb[38].mxu1 }
 0x2e4   : > { %v5416_v58 = vpop.f32.mrb[37].mxu0  ;;  %v5307_v1 = vpop.f32.mrb[39].mxu1 }
 0x2e5   : > { %v5417_v22 = vadd.f32 %v5416_v58, %v5415_v25  ;;  %v5418_v42 = vpop.f32.mrb[38].mxu0  ;;  %v2857_v6 = vpack.c.bf16 %v2828_v56, %v2827_v31  ;;  %v3529_v51 = vadd.f32 %v5305_v21, %v7978_v54  ;;  %v5308_v33 = vadd.f32 %v5307_v1, %v5306_v59  ;;  %v2701_v2 = vpop.permute.xlu1 %2700 }
 0x2e6   : > { %v5419_v16 = vpop.f32.mrb[39].mxu0  ;;  %v2696_v9 = vpop.permute.xlu0 %2695  ;;  %v2830_v23 = vmul.f32 %v2701_v2, %v8837_v8  ;;  %v6128_v2 = vld [vmem:[#allocation11] sm:$0xff]  }
 0x2e7   : > { %5818 = vmatmul.mubr.bf16.vlgmr.msra.gmra.mrb[144].mxu1 %v2856_v18  ;;  %v5420_v41 = vadd.f32 %v5419_v16, %v5418_v42  ;;  %v8049_v7 = vadd.f32 %v5417_v22, %v3529_v51  ;;  %v3532_v30 = vadd.f32 %v5308_v33, %v7978_v54  ;;  %v2829_v48 = vmul.f32 %v2696_v9, %v8838_v5  ;;  %v8895_v9 = vld [vmem:[#allocation75_spill] sm:$0xff] }
 0x2e8   : > { %5821 = vmatprep.mubr.bf16.mxu1 %v2857_v6  ;;  %5849 = vmatprep.subr.bf16.mxu0 %v6128_v2 }
 0x2e9   : > { %v5309_v27 = vpop.f32.mrb[40].mxu1  ;;  %v8054_v26 = vadd.f32 %v5420_v41, %v3532_v30  ;;  %v2530_v19 = vpop.permute.xlu1 %2529  ;;  %v2858_v46 = vpack.c.bf16 %v2830_v23, %v2829_v48  ;;  %5850 = vmatpush3.bf16.msra.mxu0 %v6128_v2 }
 0x2ea   : > { %v2603_v17 = vmul.f32 %v2530_v19, %v8877_v62  ;;  %v2525_v25 = vpop.permute.xlu0 %2524  ;;  %v5310_v56 = vpop.f32.mrb[41].mxu1  ;;  %v8894_v62 = vld [vmem:[#allocation59_spill] sm:$0xff] }
 0x2eb   : > { %v5421_v61 = vpop.f32.mrb[40].mxu0  ;;  %v2602_v15 = vmul.f32 %v2525_v25, %v8876_v40  ;;  %v5311_v18 = vadd.f32 %v5310_v56, %v5309_v27  ;;  %v5312_v21 = vpop.f32.mrb[42].mxu1 }
 0x2ec   : > { %v5422_v31 = vpop.f32.mrb[41].mxu0  ;;  %v5313_v59 = vpop.f32.mrb[43].mxu1 }
 0x2ed   : > { %v5423_v58 = vadd.f32 %v5422_v31, %v5421_v61  ;;  %v5424_v8 = vpop.f32.mrb[42].mxu0  ;;  %v2624_v5 = vpack.c.bf16 %v2603_v17, %v2602_v15  ;;  %v3537_v22 = vadd.f32 %v5311_v18, %v7978_v54  ;;  %v5314_v42 = vadd.f32 %v5313_v59, %v5312_v21  ;;  %v2289_v6 = vpop.permute.xlu1 %2288 }
 0x2ee   : > { %v5425_v1 = vpop.f32.mrb[43].mxu0  ;;  %v2362_v33 = vmul.f32 %v2289_v6, %v8894_v62  ;;  %v2284_v16 = vpop.permute.xlu0 %2283 }
 0x2ef   : > { %5822 = vmatmul.mubr.bf16.gmra.mrb[148].mxu1 %v2858_v46  ;;  %v5426_v51 = vadd.f32 %v5425_v1, %v5424_v8  ;;  %v8060_v41 = vadd.f32 %v5423_v58, %v3537_v22  ;;  %v3540_v40 = vadd.f32 %v5314_v42, %v7978_v54  ;;  %v2361_v30 = vmul.f32 %v2284_v16, %v8895_v9 }
 0x2f0   : > { %4049 = vmatprep.mubr.bf16.mxu0 %v2624_v5 }
 0x2f1   : > { %v5315_v23 = vpop.f32.mrb[44].mxu1  ;;  %v8064_v48 = vadd.f32 %v5426_v51, %v3540_v40  ;;  %v2383_v27 = vpack.c.bf16 %v2362_v33, %v2361_v30  ;;  %v2711_v19 = vpop.permute.xlu1 %2710 }
 0x2f2   : > { %v2832_v17 = vmul.f32 %v2711_v19, %v7421_v35  ;;  %v2706_v25 = vpop.permute.xlu0 %2705  ;;  %v5316_v56 = vpop.f32.mrb[45].mxu1 }
 0x2f3   : > { %v5427_v61 = vpop.f32.mrb[44].mxu0  ;;  %v2831_v46 = vmul.f32 %v2706_v25, %v8842_v37  ;;  %v5317_v15 = vadd.f32 %v5316_v56, %v5315_v23  ;;  %4050 = vmatmul.mubr.bf16.gmra.mrb[120].mxu0 %v2383_v27  ;;  %v5318_v31 = vpop.f32.mrb[46].mxu1 }
 0x2f4   : > { %v5428_v18 = vpop.f32.mrb[45].mxu0  ;;  %v5319_v8 = vpop.f32.mrb[47].mxu1 }
 0x2f5   : > { %v5429_v21 = vadd.f32 %v5428_v18, %v5427_v61  ;;  %v5430_v58 = vpop.f32.mrb[46].mxu0  ;;  %v2859_v59 = vpack.c.bf16 %v2832_v17, %v2831_v46  ;;  %v3545_v5 = vadd.f32 %v5317_v15, %v7978_v54  ;;  %v5320_v22 = vadd.f32 %v5319_v8, %v5318_v31  ;;  %v2721_v1 = vpop.permute.xlu1 %2720 }
 0x2f6   : > { %v5431_v42 = vpop.f32.mrb[47].mxu0  ;;  %v2834_v35 = vmul.f32 %v2721_v1, %v8847_v28  ;;  %v2716_v51 = vpop.permute.xlu0 %2715  ;;  %v8897_v1 = vld [vmem:[#allocation82_spill] sm:$0xff] }
 0x2f7   : > { %v5432_v6 = vadd.f32 %v5431_v42, %v5430_v58  ;;  %v8070_v62 = vadd.f32 %v5429_v21, %v3545_v5  ;;  %v3548_v37 = vadd.f32 %v5320_v22, %v7978_v54  ;;  %v2833_v33 = vmul.f32 %v2716_v51, %v8848_v45  ;;  %5825 = vmatprep.mubr.bf16.mxu1 %v2859_v59  ;;  %v8896_v59 = vld [vmem:[#allocation80_spill] sm:$0xff] }
 0x2f8   : > { %v6129_v22 = vld [vmem:[#allocation11 + $0x8] sm:$0xff]  }
 0x2f9   : > { %v5321_v16 = vpop.f32.mrb[48].mxu1  ;;  %v8074_v2 = vadd.f32 %v5432_v6, %v3548_v37  ;;  %v2860_v40 = vpack.c.bf16 %v2834_v35, %v2833_v33  ;;  %v2540_v9 = vpop.permute.xlu1 %2539  ;;  %5851 = vmatprep.subr.bf16.mxu0 %v6129_v22 }
 0x2fa   : > { %v2605_v23 = vmul.f32 %v2540_v9, %v7636_v39  ;;  %v2535_v27 = vpop.permute.xlu0 %2534  ;;  %v5322_v19 = vpop.f32.mrb[49].mxu1  ;;  %5852 = vmatpush3.bf16.msra.mxu0 %v6129_v22 }
 0x2fb   : > { %v5433_v30 = vpop.f32.mrb[48].mxu0  ;;  %v2604_v28 = vmul.f32 %v2535_v27, %v7633_v44  ;;  %v5323_v61 = vadd.f32 %v5322_v19, %v5321_v16  ;;  %5826 = vmatmul.mubr.bf16.gmra.mrb[152].mxu1 %v2860_v40  ;;  %v5324_v25 = vpop.f32.mrb[50].mxu1 }
 0x2fc   : > { %v5434_v17 = vpop.f32.mrb[49].mxu0  ;;  %v5325_v45 = vpop.f32.mrb[51].mxu1 }
 0x2fd   : > { %v5435_v56 = vadd.f32 %v5434_v17, %v5433_v30  ;;  %v5436_v46 = vpop.f32.mrb[50].mxu0  ;;  %v2625_v15 = vpack.c.bf16 %v2605_v23, %v2604_v28  ;;  %v3553_v18 = vadd.f32 %v5323_v61, %v7978_v54  ;;  %v5326_v31 = vadd.f32 %v5325_v45, %v5324_v25  ;;  %v2299_v58 = vpop.permute.xlu1 %2298 }
 0x2fe   : > { %v5437_v21 = vpop.f32.mrb[51].mxu0  ;;  %v2364_v39 = vmul.f32 %v2299_v58, %v8896_v59  ;;  %v2294_v5 = vpop.permute.xlu0 %2293 }
 0x2ff   : > { %v5438_v8 = vadd.f32 %v5437_v21, %v5436_v46  ;;  %v8080_v42 = vadd.f32 %v5435_v56, %v3553_v18  ;;  %v3556_v44 = vadd.f32 %v5326_v31, %v7978_v54  ;;  %v2363_v6 = vmul.f32 %v2294_v5, %v8897_v1  ;;  %4057 = vmatprep.mubr.bf16.mxu0 %v2625_v15 }
 0x301   : > { %v5327_v35 = vpop.f32.mrb[52].mxu1  ;;  %v8084_v51 = vadd.f32 %v5438_v8, %v3556_v44  ;;  %v2384_v37 = vpack.c.bf16 %v2364_v39, %v2363_v6  ;;  %v2731_v33 = vpop.permute.xlu1 %2730 }
 0x302   : > { %v2836_v40 = vmul.f32 %v2731_v33, %v8852_v63  ;;  %v2726_v9 = vpop.permute.xlu0 %2725  ;;  %v5328_v30 = vpop.f32.mrb[53].mxu1 }
 0x303   : > { %v5439_v16 = vpop.f32.mrb[52].mxu0  ;;  %v2835_v23 = vmul.f32 %v2726_v9, %v8853_v10  ;;  %v5329_v27 = vadd.f32 %v5328_v30, %v5327_v35  ;;  %4058 = vmatmul.mubr.bf16.gmra.mrb[124].mxu0 %v2384_v37  ;;  %v5330_v28 = vpop.f32.mrb[54].mxu1 }
 0x304   : > { %v5440_v19 = vpop.f32.mrb[53].mxu0  ;;  %v5331_v25 = vpop.f32.mrb[55].mxu1 }
 0x305   : > { %v5441_v61 = vadd.f32 %v5440_v19, %v5439_v16  ;;  %v5442_v17 = vpop.f32.mrb[54].mxu0  ;;  %v2861_v56 = vpack.c.bf16 %v2836_v40, %v2835_v23  ;;  %v3561_v46 = vadd.f32 %v5329_v27, %v7978_v54  ;;  %v5332_v45 = vadd.f32 %v5331_v25, %v5330_v28  ;;  %v2741_v18 = vpop.permute.xlu1 %2740 }
 0x306   : > { %v5443_v15 = vpop.f32.mrb[55].mxu0  ;;  %v2838_v63 = vmul.f32 %v2741_v18, %v8857_v49  ;;  %v2736_v21 = vpop.permute.xlu0 %2735 }
 0x307   : > { %v5444_v31 = vadd.f32 %v5443_v15, %v5442_v17  ;;  %v8090_v58 = vadd.f32 %v5441_v61, %v3561_v46  ;;  %v3564_v10 = vadd.f32 %v5332_v45, %v7978_v54  ;;  %v2837_v8 = vmul.f32 %v2736_v21, %v8858_v3  ;;  %5829 = vmatprep.mubr.bf16.mxu1 %v2861_v56  ;;  %v8898_v17 = vld [vmem:[#allocation38_spill] sm:$0xff]  ;;  %v8899_v45 = vld [vmem:[#allocation63_spill] sm:$0xff] }
 0x308   : > { %v6130_v56 = vld [vmem:[#allocation11 + $0x10] sm:$0xff]  }
 0x309   : > { %v5333_v59 = vpop.f32.mrb[56].mxu1  ;;  %v8094_v39 = vadd.f32 %v5444_v31, %v3564_v10  ;;  %v2862_v5 = vpack.c.bf16 %v2838_v63, %v2837_v8  ;;  %v2550_v22 = vpop.permute.xlu1 %2549  ;;  %5853 = vmatprep.subr.bf16.mxu0 %v6130_v56 }
 0x30a   : > { %v2607_v1 = vmul.f32 %v2550_v22, %v8882_v38  ;;  %v2545_v6 = vpop.permute.xlu0 %2544  ;;  %v5334_v35 = vpop.f32.mrb[57].mxu1  ;;  %5854 = vmatpush3.bf16.msra.mxu0 %v6130_v56 }
 0x30b   : > { %v5445_v44 = vpop.f32.mrb[56].mxu0  ;;  %v2606_v49 = vmul.f32 %v2545_v6, %v8881_v55  ;;  %v5335_v37 = vadd.f32 %v5334_v35, %v5333_v59  ;;  %5830 = vmatmul.mubr.bf16.gmra.mrb[156].mxu1 %v2862_v5  ;;  %v5336_v16 = vpop.f32.mrb[58].mxu1 }
 0x30c   : > { %v5446_v33 = vpop.f32.mrb[57].mxu0  ;;  %v5337_v3 = vpop.f32.mrb[59].mxu1 }
 0x30d   : > { %v5447_v40 = vadd.f32 %v5446_v33, %v5445_v44  ;;  %v5448_v9 = vpop.f32.mrb[58].mxu0  ;;  %v2626_v30 = vpack.c.bf16 %v2607_v1, %v2606_v49  ;;  %v3569_v23 = vadd.f32 %v5335_v37, %v7978_v54  ;;  %v5338_v27 = vadd.f32 %v5337_v3, %v5336_v16  ;;  %v2309_v28 = vpop.permute.xlu1 %2308 }
 0x30e   : > { %v5449_v19 = vpop.f32.mrb[59].mxu0  ;;  %v2366_v38 = vmul.f32 %v2309_v28, %v8898_v17  ;;  %v2304_v25 = vpop.permute.xlu0 %2303 }
 0x30f   : > { %v5450_v61 = vadd.f32 %v5449_v19, %v5448_v9  ;;  %v8100_v46 = vadd.f32 %v5447_v40, %v3569_v23  ;;  %v3572_v55 = vadd.f32 %v5338_v27, %v7978_v54  ;;  %v2365_v15 = vmul.f32 %v2304_v25, %v8899_v45  ;;  %4065 = vmatprep.mubr.bf16.mxu0 %v2626_v30 }
 0x311   : > { %v5339_v18 = vpop.f32.mrb[60].mxu1  ;;  %v8104_v31 = vadd.f32 %v5450_v61, %v3572_v55  ;;  %v2385_v63 = vpack.c.bf16 %v2366_v38, %v2365_v15  ;;  %v2751_v21 = vpop.permute.xlu1 %2750 }
 0x312   : > { %v2840_v8 = vmul.f32 %v2751_v21, %v7640_v12  ;;  %v2746_v59 = vpop.permute.xlu0 %2745  ;;  %v5340_v5 = vpop.f32.mrb[61].mxu1 }
 0x313   : > { %v5451_v10 = vpop.f32.mrb[60].mxu0  ;;  %v2839_v22 = vmul.f32 %v2746_v59, %v7644_v43  ;;  %v5341_v44 = vadd.f32 %v5340_v5, %v5339_v18  ;;  %4066 = vmatmul.mubr.bf16.gmra.mrb[128].mxu0 %v2385_v63  ;;  %v5342_v6 = vpop.f32.mrb[62].mxu1 }
 0x314   : > { %v5452_v1 = vpop.f32.mrb[61].mxu0  ;;  %v5343_v37 = vpop.f32.mrb[63].mxu1 }
 0x315   : > { %v5453_v35 = vadd.f32 %v5452_v1, %v5451_v10  ;;  %v5454_v49 = vpop.f32.mrb[62].mxu0  ;;  %v2863_v33 = vpack.c.bf16 %v2840_v8, %v2839_v22  ;;  %v3577_v16 = vadd.f32 %v5341_v44, %v7978_v54  ;;  %v5344_v40 = vadd.f32 %v5343_v37, %v5342_v6  ;;  %v2761_v3 = vpop.permute.xlu1 %2760  ;;  %v8900_v6 = vld [vmem:[#allocation64_spill] sm:$0xff] }
 0x316   : > { %v5455_v9 = vpop.f32.mrb[63].mxu0  ;;  %v2842_v12 = vmul.f32 %v2761_v3, %v8866_v53  ;;  %v2756_v23 = vpop.permute.xlu0 %2755 }
 0x317   : > { %v5456_v30 = vadd.f32 %v5455_v9, %v5454_v49  ;;  %v8110_v27 = vadd.f32 %v5453_v35, %v3577_v16  ;;  %v3580_v43 = vadd.f32 %v5344_v40, %v7978_v54  ;;  %v2841_v19 = vmul.f32 %v2756_v23, %v8867_v0  ;;  %5833 = vmatprep.mubr.bf16.mxu1 %v2863_v33  ;;  %v6131_v49 = vld [vmem:[#allocation11 + $0x18] sm:$0xff]   ;;  %v8902_v23 = vld [vmem:[#allocation61_spill] sm:$0xff] }
 0x318   : > { %v8901_v33 = vld [vmem:[#allocation79_spill] sm:$0xff]  ;;  %5855 = vmatprep.subr.bf16.mxu0 %v6131_v49 }
 0x319   : > { %v5345_v28 = vpop.f32.mrb[64].mxu1  ;;  %v8114_v61 = vadd.f32 %v5456_v30, %v3580_v43  ;;  %v2864_v17 = vpack.c.bf16 %v2842_v12, %v2841_v19  ;;  %v2560_v38 = vpop.permute.xlu1 %2559  ;;  %5856 = vmatpush3.bf16.msra.mxu0 %v6131_v49 }
 0x31a   : > { %v2609_v56 = vmul.f32 %v2560_v38, %v7035_v29  ;;  %v2555_v55 = vpop.permute.xlu0 %2554  ;;  %v5346_v45 = vpop.f32.mrb[65].mxu1 }
 0x31b   : > { %v5457_v25 = vpop.f32.mrb[64].mxu0  ;;  %v2608_v53 = vmul.f32 %v2555_v55, %v7757_v34  ;;  %v5347_v15 = vadd.f32 %v5346_v45, %v5345_v28  ;;  %5834 = vmatmul.mubr.bf16.gmra.mrb[160].mxu1 %v2864_v17  ;;  %v5348_v63 = vpop.f32.mrb[66].mxu1  ;;  %v8903_v17 = vld [vmem:[#allocation62_spill] sm:$0xff] }
 0x31c   : > { %v5458_v18 = vpop.f32.mrb[65].mxu0  ;;  %v5349_v0 = vpop.f32.mrb[67].mxu1 }
 0x31d   : > { %v5459_v21 = vadd.f32 %v5458_v18, %v5457_v25  ;;  %v5460_v10 = vpop.f32.mrb[66].mxu0  ;;  %v2627_v8 = vpack.c.bf16 %v2609_v56, %v2608_v53  ;;  %v3585_v59 = vadd.f32 %v5347_v15, %v7978_v54  ;;  %v5350_v5 = vadd.f32 %v5349_v0, %v5348_v63  ;;  %v2319_v44 = vpop.permute.xlu1 %2318 }
 0x31e   : > { %v5461_v22 = vpop.f32.mrb[67].mxu0  ;;  %v2368_v29 = vmul.f32 %v2319_v44, %v8900_v6  ;;  %v2314_v35 = vpop.permute.xlu0 %2313  ;;  %v8905_v6 = vld [vmem:[#allocation39_spill] sm:$0xff] }
 0x31f   : > { %v5462_v1 = vadd.f32 %v5461_v22, %v5460_v10  ;;  %v8120_v37 = vadd.f32 %v5459_v21, %v3585_v59  ;;  %v3588_v34 = vadd.f32 %v5350_v5, %v7978_v54  ;;  %v2367_v16 = vmul.f32 %v2314_v35, %v8901_v33  ;;  %4073 = vmatprep.mubr.bf16.mxu0 %v2627_v8  ;;  %v8904_v59 = vld [vmem:[#allocation81_spill] sm:$0xff] }
 0x321   : > { %v5351_v40 = vpop.f32.mrb[68].mxu1  ;;  %v8124_v9 = vadd.f32 %v5462_v1, %v3588_v34  ;;  %v2386_v3 = vpack.c.bf16 %v2368_v29, %v2367_v16  ;;  %v2771_v30 = vpop.permute.xlu1 %2770 }
 0x322   : > { %v2844_v43 = vmul.f32 %v2771_v30, %v8902_v23  ;;  %v2766_v19 = vpop.permute.xlu0 %2765  ;;  %v5352_v28 = vpop.f32.mrb[69].mxu1 }
 0x323   : > { %v5463_v12 = vpop.f32.mrb[68].mxu0  ;;  %v2843_v38 = vmul.f32 %v2766_v19, %v8903_v17  ;;  %v5353_v25 = vadd.f32 %v5352_v28, %v5351_v40  ;;  %4074 = vmatmul.mubr.bf16.gmra.mrb[132].mxu0 %v2386_v3  ;;  %v5354_v55 = vpop.f32.mrb[70].mxu1 }
 0x324   : > { %v5464_v56 = vpop.f32.mrb[69].mxu0  ;;  %v5355_v15 = vpop.f32.mrb[71].mxu1 }
 0x325   : > { %v5465_v45 = vadd.f32 %v5464_v56, %v5463_v12  ;;  %v5466_v53 = vpop.f32.mrb[70].mxu0  ;;  %v2865_v18 = vpack.c.bf16 %v2844_v43, %v2843_v38  ;;  %v3593_v63 = vadd.f32 %v5353_v25, %v7978_v54  ;;  %v5356_v21 = vadd.f32 %v5355_v15, %v5354_v55  ;;  %v2781_v0 = vpop.permute.xlu1 %2780 }
 0x326   : > { %v5467_v10 = vpop.f32.mrb[71].mxu0  ;;  %v2846_v5 = vmul.f32 %v2781_v0, %v8904_v59  ;;  %v2776_v22 = vpop.permute.xlu0 %2775 }
 0x327   : > { %v5468_v8 = vadd.f32 %v5467_v10, %v5466_v53  ;;  %v8130_v44 = vadd.f32 %v5465_v45, %v3593_v63  ;;  %v3596_v1 = vadd.f32 %v5356_v21, %v7978_v54  ;;  %v2845_v29 = vmul.f32 %v2776_v22, %v8905_v6  ;;  %5837 = vmatprep.mubr.bf16.mxu1 %v2865_v18  ;;  %v8906_v53 = vld [vmem:[#allocation94_spill] sm:$0xff]  ;;  %v6132_v63 = vld [vmem:[#allocation11 + $0x20] sm:$0xff]  }
 0x328   : > { %v8907_v10 = vld [vmem:[#allocation95_spill] sm:$0xff]  ;;  %5857 = vmatprep.subr.bf16.mxu0 %v6132_v63 }
 0x329   : > { %v5357_v35 = vpop.f32.mrb[72].mxu1  ;;  %v8134_v49 = vadd.f32 %v5468_v8, %v3596_v1  ;;  %v2866_v34 = vpack.c.bf16 %v2846_v5, %v2845_v29  ;;  %v2570_v33 = vpop.permute.xlu1 %2569  ;;  %5858 = vmatpush3.bf16.msra.mxu0 %v6132_v63 }
 0x32a   : > { %v5358_v16 = vpop.f32.mrb[73].mxu1  ;;  %v2611_v40 = vmul.f32 %v2570_v33, %v8891_v60  ;;  %v2565_v3 = vpop.permute.xlu0 %2564 }
 0x32b   : > { %v5359_v30 = vadd.f32 %v5358_v16, %v5357_v35  ;;  %v5360_v12 = vpop.f32.mrb[74].mxu1  ;;  %v2610_v23 = vmul.f32 %v2565_v3, %v8833_v50  ;;  %5838 = vmatmul.mubr.bf16.gmra.mrb[164].mxu1 %v2866_v34 }
 0x32c   : > { %v5361_v43 = vpop.f32.mrb[75].mxu1  ;;  %v5469_v19 = vpop.f32.mrb[72].mxu0 }
 0x32d   : > { %v5362_v28 = vadd.f32 %v5361_v43, %v5360_v12  ;;  %v5470_v17 = vpop.f32.mrb[73].mxu0  ;;  %v2628_v38 = vpack.c.bf16 %v2611_v40, %v2610_v23  ;;  %v3601_v25 = vadd.f32 %v5359_v30, %v7978_v54  ;;  %v2329_v56 = vpop.permute.xlu1 %2328 }
 0x32e   : > { %v5471_v55 = vadd.f32 %v5470_v17, %v5469_v19  ;;  %v5472_v45 = vpop.f32.mrb[74].mxu0  ;;  %v2370_v15 = vmul.f32 %v2329_v56, %v8906_v53  ;;  %v2324_v18 = vpop.permute.xlu0 %2323  ;;  %v8908_v53 = vld [vmem:[#allocation83_spill] sm:$0xff] }
 0x32f   : > { %v5473_v60 = vpop.f32.mrb[75].mxu0  ;;  %v3604_v21 = vadd.f32 %v5362_v28, %v7978_v54  ;;  %v2369_v50 = vmul.f32 %v2324_v18, %v8907_v10  ;;  %4081 = vmatprep.mubr.bf16.mxu0 %v2628_v38  ;;  %v8909_v10 = vld [vmem:[#allocation85_spill] sm:$0xff] }
 0x330   : > { %v8142_v0 = vadd.f32 %v5471_v55, %v3601_v25  ;;  %v5474_v8 = vadd.f32 %v5473_v60, %v5472_v45 }
 0x331   : > { %v5363_v59 = vpop.f32.mrb[76].mxu1  ;;  %v2387_v5 = vpack.c.bf16 %v2370_v15, %v2369_v50  ;;  %v2791_v1 = vpop.permute.xlu1 %2790 }
 0x332   : > { %v8144_v22 = vadd.f32 %v5474_v8, %v3604_v21  ;;  %v5364_v6 = vpop.f32.mrb[77].mxu1  ;;  %v2848_v29 = vmul.f32 %v2791_v1, %v7808_v13  ;;  %v2786_v35 = vpop.permute.xlu0 %2785  ;;  %v6133_v21 = vld [vmem:[#allocation11 + $0x28] sm:$0xff]  }
 0x333   : > { %v5365_v34 = vadd.f32 %v5364_v6, %v5363_v59  ;;  %v5366_v33 = vpop.f32.mrb[78].mxu1  ;;  %v2847_v16 = vmul.f32 %v2786_v35, %v7814_v24  ;;  %4082 = vmatmul.mubr.bf16.gmra.mrb[136].mxu0 %v2387_v5  ;;  %5859 = vmatprep.subr.bf16.mxu0 %v6133_v21 }
 0x334   : > { %v5367_v40 = vpop.f32.mrb[79].mxu1  ;;  %5860 = vmatpush3.bf16.msra.mxu0 %v6133_v21 }
 0x335   : > { %v5368_v3 = vadd.f32 %v5367_v40, %v5366_v33  ;;  %v2867_v30 = vpack.c.bf16 %v2848_v29, %v2847_v16  ;;  %v2801_v12 = vpop.permute.xlu1 %2800  ;;  %v3609_v13 = vadd.f32 %v5365_v34, %v7978_v54  ;;  %v8910_v33 = vld [vmem:[#allocation41_spill] sm:$0xff]  ;;  %v8911_v40 = vld [vmem:[#allocation91_spill] sm:$0xff] }
 0x336   : > { %v2850_v23 = vmul.f32 %v2801_v12, %v7839_v4  ;;  %v2796_v43 = vpop.permute.xlu0 %2795 }
 0x337   : > { %v2849_v28 = vmul.f32 %v2796_v43, %v7843_v11  ;;  %5841 = vmatprep.mubr.bf16.mxu1 %v2867_v30  ;;  %v3612_v59 = vadd.f32 %v5368_v3, %v7978_v54  ;;  %v6134_v54 = vld [vmem:[#allocation11 + $0x30] sm:$0xff]  }
 0x338   : > { %v5475_v19 = vpop.f32.mrb[76].mxu0  ;;  %5861 = vmatprep.subr.bf16.mxu0 %v6134_v54 }
 0x339   : > { %v5476_v17 = vpop.f32.mrb[77].mxu0  ;;  %v5497_v38 = vpop.f32.mrb[80].mxu1  ;;  %v2868_v55 = vpack.c.bf16 %v2850_v23, %v2849_v28  ;;  %v8912_v23 = vld [vmem:[#allocation93_spill] sm:$0xff]  ;;  %5862 = vmatpush3.bf16.msra.mxu0 %v6134_v54 }
 0x33a   : > { %v5477_v25 = vadd.f32 %v5476_v17, %v5475_v19  ;;  %v5478_v56 = vpop.f32.mrb[78].mxu0  ;;  %v2580_v24 = vpop.permute.xlu1 %2579  ;;  %v6135_v17 = vld [vmem:[#allocation11 + $0x38] sm:$0xff]   ;;  %v8916_v54 = vld [vmem:[#allocation65_spill] sm:$0xff] }
 0x33b   : > { %v5498_v45 = vpop.f32.mrb[81].mxu1  ;;  %v2613_v15 = vmul.f32 %v2580_v24, %v8908_v53  ;;  %v2575_v18 = vpop.permute.xlu0 %2574  ;;  %5842 = vmatmul.mubr.bf16.gmra.mrb[168].mxu1 %v2868_v55  ;;  %5863 = vmatprep.subr.bf16.mxu0 %v6135_v17 }
 0x33c   : > { %v8152_v60 = vadd.f32 %v5477_v25, %v3609_v13  ;;  %v5499_v4 = vadd.f32 %v5498_v45, %v5497_v38  ;;  %v5500_v63 = vpop.f32.mrb[82].mxu1  ;;  %v2612_v11 = vmul.f32 %v2575_v18, %v8909_v10  ;;  %v5479_v50 = vpop.f32.mrb[79].mxu0 }
 0x33d   : > { %v5501_v8 = vpop.f32.mrb[83].mxu1  ;;  %v5480_v1 = vadd.f32 %v5479_v50, %v5478_v56  ;;  %5864 = vmatpush3.bf16.msra.mxu0 %v6135_v17 }
 0x33e   : > { %v3811_v5 = vadd.f32 %v5499_v4, %v7984_v14  ;;  %v5502_v6 = vadd.f32 %v5501_v8, %v5500_v63  ;;  %v2629_v29 = vpack.c.bf16 %v2613_v15, %v2612_v11  ;;  %v2339_v35 = vpop.permute.xlu1 %2338  ;;  %v8913_v11 = vld [vmem:[#allocation98_spill] sm:$0xff] }
 0x33f   : > { %v8157_v34 = vadd.f32 %v5480_v1, %v3612_v59  ;;  %v2372_v30 = vmul.f32 %v2339_v35, %v8911_v40  ;;  %v2334_v12 = vpop.permute.xlu0 %2333 }
 0x340   : > { %v3814_v16 = vadd.f32 %v5502_v6, %v8910_v33  ;;  %v2371_v43 = vmul.f32 %v2334_v12, %v8912_v23  ;;  %4089 = vmatprep.mubr.bf16.mxu0 %v2629_v29  ;;  %v8915_v23 = vld [vmem:[#allocation40_spill] sm:$0xff] }
 0x342   : > { %v5503_v19 = vpop.f32.mrb[84].mxu1  ;;  %v2388_v3 = vpack.c.bf16 %v2372_v30, %v2371_v43  ;;  %v2811_v14 = vpop.permute.xlu1 %2810 }
 0x343   : > { %v5504_v28 = vpop.f32.mrb[85].mxu1  ;;  %v2852_v13 = vmul.f32 %v2811_v14, %v8886_v32  ;;  %v2806_v38 = vpop.permute.xlu0 %2805 }
 0x344   : > { %v5505_v25 = vadd.f32 %v5504_v28, %v5503_v19  ;;  %v5506_v56 = vpop.f32.mrb[86].mxu1  ;;  %v2851_v55 = vmul.f32 %v2806_v38, %v8887_v47  ;;  %4090 = vmatmul.mubr.bf16.gmra.mrb[140].mxu0 %v2388_v3  ;;  %v8914_v47 = vld [vmem:[#allocation99_spill] sm:$0xff] }
 0x345   : > { %v5507_v24 = vpop.f32.mrb[87].mxu1  ;;  %v5609_v45 = vpop.f32.mrb[80].mxu0 }
 0x346   : > { %v3819_v53 = vadd.f32 %v5505_v25, %v7999_v36  ;;  %v5508_v15 = vadd.f32 %v5507_v24, %v5506_v56  ;;  %v5610_v18 = vpop.f32.mrb[81].mxu0  ;;  %v2869_v4 = vpack.c.bf16 %v2852_v13, %v2851_v55  ;;  %v2821_v63 = vpop.permute.xlu1 %2820 }
 0x347   : > { %v5611_v21 = vadd.f32 %v5610_v18, %v5609_v45  ;;  %v5612_v10 = vpop.f32.mrb[82].mxu0  ;;  %v2854_v50 = vmul.f32 %v2821_v63, %v8913_v11  ;;  %v2816_v8 = vpop.permute.xlu0 %2815 }
 0x348   : > { %v3822_v32 = vadd.f32 %v5508_v15, %v8006_v20  ;;  %v5613_v59 = vpop.f32.mrb[83].mxu0  ;;  %v2853_v1 = vmul.f32 %v2816_v8, %v8914_v47  ;;  %5845 = vmatprep.mubr.bf16.mxu1 %v2869_v4  ;;  %v8917_v15 = vld [vmem:[#allocation66_spill] sm:$0xff] }
 0x349   : > { %v5614_v6 = vadd.f32 %v5613_v59, %v5612_v10  ;;  %v8168_v29 = vadd.f32 %v5611_v21, %v3811_v5  ;;  %v8918_v21 = vld [vmem:[#allocation86_spill] sm:$0xff] }
 0x34a   : > { %v5509_v36 = vpop.f32.mrb[88].mxu1  ;;  %v2870_v35 = vpack.c.bf16 %v2854_v50, %v2853_v1 }
 0x34b   : > { %v5510_v33 = vpop.f32.mrb[89].mxu1  ;;  %v8170_v40 = vadd.f32 %v5614_v6, %v3814_v16 }
 0x34c   : > { %v5511_v30 = vadd.f32 %v5510_v33, %v5509_v36  ;;  %v5512_v12 = vpop.f32.mrb[90].mxu1  ;;  %5846 = vmatmul.mubr.bf16.gmra.mrb[172].mxu1 %v2870_v35 }
 0x34d   : > { %v5513_v20 = vpop.f32.mrb[91].mxu1 }
 0x34e   : > { %v3827_v43 = vadd.f32 %v5511_v30, %v8915_v23  ;;  %v5514_v19 = vadd.f32 %v5513_v20, %v5512_v12 }
 0x350   : > { %v3830_v3 = vadd.f32 %v5514_v19, %v8916_v54 }
 0x351   : > { %v5615_v14 = vpop.f32.mrb[84].mxu0 }
 0x352   : > { %v5515_v28 = vpop.f32.mrb[92].mxu1  ;;  %v5616_v13 = vpop.f32.mrb[85].mxu0 }
 0x353   : > { %v5516_v5 = vpop.f32.mrb[93].mxu1  ;;  %v5617_v38 = vadd.f32 %v5616_v13, %v5615_v14  ;;  %v5618_v25 = vpop.f32.mrb[86].mxu0 }
 0x354   : > { %v5517_v17 = vadd.f32 %v5516_v5, %v5515_v28  ;;  %v5518_v56 = vpop.f32.mrb[94].mxu1  ;;  %v5619_v55 = vpop.f32.mrb[87].mxu0 }
 0x355   : > { %v5519_v16 = vpop.f32.mrb[95].mxu1  ;;  %v5620_v24 = vadd.f32 %v5619_v55, %v5618_v25  ;;  %v8174_v45 = vadd.f32 %v5617_v38, %v3819_v53 }
 0x356   : > { %v3835_v18 = vadd.f32 %v5517_v17, %v8917_v15  ;;  %v5520_v4 = vadd.f32 %v5519_v16, %v5518_v56 }
 0x357   : > { %v8177_v63 = vadd.f32 %v5620_v24, %v3822_v32 }
 0x358   : > { %v3838_v10 = vadd.f32 %v5520_v4, %v8918_v21 }
 0x35a   : > { %v5521_v11 = vpop.f32.mrb[96].mxu1 }
 0x35b   : > { %v5522_v50 = vpop.f32.mrb[97].mxu1 }
 0x35c   : > { %v5523_v8 = vadd.f32 %v5522_v50, %v5521_v11  ;;  %v5524_v59 = vpop.f32.mrb[98].mxu1 }
 0x35d   : > { %v5525_v47 = vpop.f32.mrb[99].mxu1  ;;  %v5621_v1 = vpop.f32.mrb[88].mxu0 }
 0x35e   : > { %v3843_v6 = vadd.f32 %v5523_v8, %v8040_v57  ;;  %v5526_v36 = vadd.f32 %v5525_v47, %v5524_v59  ;;  %v5622_v35 = vpop.f32.mrb[89].mxu0 }
 0x35f   : > { %v5623_v33 = vadd.f32 %v5622_v35, %v5621_v1  ;;  %v5624_v53 = vpop.f32.mrb[90].mxu0 }
 0x360   : > { %v3846_v30 = vadd.f32 %v5526_v36, %v8044_v52  ;;  %v5625_v12 = vpop.f32.mrb[91].mxu0 }
 0x361   : > { %v5626_v20 = vadd.f32 %v5625_v12, %v5624_v53  ;;  %v8182_v32 = vadd.f32 %v5623_v33, %v3827_v43 }
 0x362   : > { %v5527_v23 = vpop.f32.mrb[100].mxu1 }
 0x363   : > { %v5528_v19 = vpop.f32.mrb[101].mxu1  ;;  %v8184_v54 = vadd.f32 %v5626_v20, %v3830_v3 }
 0x364   : > { %v5529_v14 = vadd.f32 %v5528_v19, %v5527_v23  ;;  %v5530_v28 = vpop.f32.mrb[102].mxu1 }
 0x365   : > { %v5531_v13 = vpop.f32.mrb[103].mxu1 }
 0x366   : > { %v3851_v5 = vadd.f32 %v5529_v14, %v8049_v7  ;;  %v5532_v57 = vadd.f32 %v5531_v13, %v5530_v28 }
 0x368   : > { %v3854_v38 = vadd.f32 %v5532_v57, %v8054_v26 }
 0x369   : > { %v5627_v25 = vpop.f32.mrb[92].mxu0 }
 0x36a   : > { %v5533_v17 = vpop.f32.mrb[104].mxu1  ;;  %v5628_v56 = vpop.f32.mrb[93].mxu0 }
 0x36b   : > { %v5534_v52 = vpop.f32.mrb[105].mxu1  ;;  %v5629_v55 = vadd.f32 %v5628_v56, %v5627_v25  ;;  %v5630_v16 = vpop.f32.mrb[94].mxu0 }
 0x36c   : > { %v5535_v43 = vadd.f32 %v5534_v52, %v5533_v17  ;;  %v5536_v24 = vpop.f32.mrb[106].mxu1  ;;  %v5631_v15 = vpop.f32.mrb[95].mxu0 }
 0x36d   : > { %v5537_v4 = vpop.f32.mrb[107].mxu1  ;;  %v5632_v3 = vadd.f32 %v5631_v15, %v5630_v16  ;;  %v8188_v21 = vadd.f32 %v5629_v55, %v3835_v18 }
 0x36e   : > { %v3859_v11 = vadd.f32 %v5535_v43, %v8060_v41  ;;  %v5538_v50 = vadd.f32 %v5537_v4, %v5536_v24 }
 0x36f   : > { %v8191_v7 = vadd.f32 %v5632_v3, %v3838_v10 }
 0x370   : > { %v3862_v26 = vadd.f32 %v5538_v50, %v8064_v48 }
 0x372   : > { %v5539_v8 = vpop.f32.mrb[108].mxu1 }
 0x373   : > { %v5540_v59 = vpop.f32.mrb[109].mxu1 }
 0x374   : > { %v5541_v47 = vadd.f32 %v5540_v59, %v5539_v8  ;;  %v5542_v1 = vpop.f32.mrb[110].mxu1 }
 0x375   : > { %v5543_v36 = vpop.f32.mrb[111].mxu1  ;;  %v5633_v35 = vpop.f32.mrb[96].mxu0 }
 0x376   : > { %v8195_v33 = vadd.f32 %v5541_v47, %v8070_v62  ;;  %v5544_v53 = vadd.f32 %v5543_v36, %v5542_v1  ;;  %v5634_v12 = vpop.f32.mrb[97].mxu0 }
 0x377   : > { %v5635_v18 = vadd.f32 %v5634_v12, %v5633_v35  ;;  %v5636_v20 = vpop.f32.mrb[98].mxu0 }
 0x378   : > { %v8198_v41 = vadd.f32 %v5544_v53, %v8074_v2  ;;  %v5637_v10 = vpop.f32.mrb[99].mxu0 }
 0x379   : > { %v5638_v23 = vadd.f32 %v5637_v10, %v5636_v20  ;;  %v8200_v19 = vadd.f32 %v5635_v18, %v3843_v6 }
 0x37a   : > { %v5545_v48 = vpop.f32.mrb[112].mxu1 }
 0x37b   : > { %v5546_v14 = vpop.f32.mrb[113].mxu1  ;;  %v8202_v28 = vadd.f32 %v5638_v23, %v3846_v30 }
 0x37c   : > { %v5547_v13 = vadd.f32 %v5546_v14, %v5545_v48  ;;  %v5548_v57 = vpop.f32.mrb[114].mxu1 }
 0x37d   : > { %v5549_v25 = vpop.f32.mrb[115].mxu1 }
 0x37e   : > { %v8205_v62 = vadd.f32 %v5547_v13, %v8080_v42  ;;  %v5550_v17 = vadd.f32 %v5549_v25, %v5548_v57 }
 0x380   : > { %v8208_v56 = vadd.f32 %v5550_v17, %v8084_v51 }
 0x381   : > { %v5639_v2 = vpop.f32.mrb[100].mxu0 }
 0x382   : > { %v5551_v52 = vpop.f32.mrb[116].mxu1  ;;  %v5640_v55 = vpop.f32.mrb[101].mxu0 }
 0x383   : > { %v5552_v16 = vpop.f32.mrb[117].mxu1  ;;  %v5641_v6 = vadd.f32 %v5640_v55, %v5639_v2  ;;  %v5642_v43 = vpop.f32.mrb[102].mxu0 }
 0x384   : > { %v5553_v24 = vadd.f32 %v5552_v16, %v5551_v52  ;;  %v5554_v15 = vpop.f32.mrb[118].mxu1  ;;  %v5643_v30 = vpop.f32.mrb[103].mxu0 }
 0x385   : > { %v5555_v4 = vpop.f32.mrb[119].mxu1  ;;  %v5644_v3 = vadd.f32 %v5643_v30, %v5642_v43  ;;  %v8210_v50 = vadd.f32 %v5641_v6, %v3851_v5 }
 0x386   : > { %v8213_v42 = vadd.f32 %v5553_v24, %v8090_v58  ;;  %v5556_v8 = vadd.f32 %v5555_v4, %v5554_v15 }
 0x387   : > { %v8215_v59 = vadd.f32 %v5644_v3, %v3854_v38 }
 0x388   : > { %v8218_v51 = vadd.f32 %v5556_v8, %v8094_v39 }
 0x38a   : > { %v5557_v47 = vpop.f32.mrb[120].mxu1 }
 0x38b   : > { %v5558_v1 = vpop.f32.mrb[121].mxu1 }
 0x38c   : > { %v5559_v36 = vadd.f32 %v5558_v1, %v5557_v47  ;;  %v5560_v35 = vpop.f32.mrb[122].mxu1 }
 0x38d   : > { %v5561_v53 = vpop.f32.mrb[123].mxu1  ;;  %v5645_v12 = vpop.f32.mrb[104].mxu0 }
 0x38e   : > { %v8221_v18 = vadd.f32 %v5559_v36, %v8100_v46  ;;  %v5562_v5 = vadd.f32 %v5561_v53, %v5560_v35  ;;  %v5646_v20 = vpop.f32.mrb[105].mxu0 }
 0x38f   : > { %v5647_v10 = vadd.f32 %v5646_v20, %v5645_v12  ;;  %v5648_v58 = vpop.f32.mrb[106].mxu0 }
 0x390   : > { %v8224_v23 = vadd.f32 %v5562_v5, %v8104_v31  ;;  %v5649_v38 = vpop.f32.mrb[107].mxu0 }
 0x391   : > { %v5650_v48 = vadd.f32 %v5649_v38, %v5648_v58  ;;  %v8226_v39 = vadd.f32 %v5647_v10, %v3859_v11 }
 0x392   : > { %v5563_v14 = vpop.f32.mrb[124].mxu1 }
 0x393   : > { %v5564_v13 = vpop.f32.mrb[125].mxu1  ;;  %v8228_v57 = vadd.f32 %v5650_v48, %v3862_v26 }
 0x394   : > { %v5565_v25 = vadd.f32 %v5564_v13, %v5563_v14  ;;  %v5566_v17 = vpop.f32.mrb[126].mxu1 }
 0x395   : > { %v5567_v2 = vpop.f32.mrb[127].mxu1 }
 0x396   : > { %v8231_v46 = vadd.f32 %v5565_v25, %v8110_v27  ;;  %v5568_v52 = vadd.f32 %v5567_v2, %v5566_v17 }
 0x398   : > { %v8234_v55 = vadd.f32 %v5568_v52, %v8114_v61 }
 0x39a   : > { %v5569_v31 = vpop.f32.mrb[128].mxu1  ;;  %v5651_v16 = vpop.f32.mrb[108].mxu0 }
 0x39b   : > { %v5570_v6 = vpop.f32.mrb[129].mxu1  ;;  %v5652_v11 = vpop.f32.mrb[109].mxu0 }
 0x39c   : > { %v5571_v43 = vadd.f32 %v5570_v6, %v5569_v31  ;;  %v5572_v24 = vpop.f32.mrb[130].mxu1  ;;  %v5653_v15 = vadd.f32 %v5652_v11, %v5651_v16  ;;  %v5654_v30 = vpop.f32.mrb[110].mxu0 }
 0x39d   : > { %v5573_v26 = vpop.f32.mrb[131].mxu1  ;;  %v5655_v8 = vpop.f32.mrb[111].mxu0 }
 0x39e   : > { %v8237_v4 = vadd.f32 %v5571_v43, %v8120_v37  ;;  %v5574_v3 = vadd.f32 %v5573_v26, %v5572_v24  ;;  %v5656_v27 = vadd.f32 %v5655_v8, %v5654_v30  ;;  %v8240_v47 = vadd.f32 %v5653_v15, %v8195_v33 }
 0x3a0   : > { %v8243_v61 = vadd.f32 %v5574_v3, %v8124_v9  ;;  %v8246_v1 = vadd.f32 %v5656_v27, %v8198_v41 }
 0x3a2   : > { %v5575_v36 = vpop.f32.mrb[132].mxu1 }
 0x3a3   : > { %v5576_v35 = vpop.f32.mrb[133].mxu1 }
 0x3a4   : > { %v5577_v53 = vadd.f32 %v5576_v35, %v5575_v36  ;;  %v5578_v12 = vpop.f32.mrb[134].mxu1 }
 0x3a5   : > { %v5579_v5 = vpop.f32.mrb[135].mxu1 }
 0x3a6   : > { %v8249_v37 = vadd.f32 %v5577_v53, %v8130_v44  ;;  %v5580_v20 = vadd.f32 %v5579_v5, %v5578_v12 }
 0x3a7   : > { %v5657_v33 = vpop.f32.mrb[112].mxu0 }
 0x3a8   : > { %v8252_v10 = vadd.f32 %v5580_v20, %v8134_v49  ;;  %v5658_v58 = vpop.f32.mrb[113].mxu0 }
 0x3a9   : > { %v5659_v38 = vadd.f32 %v5658_v58, %v5657_v33  ;;  %v5660_v9 = vpop.f32.mrb[114].mxu0 }
 0x3aa   : > { %v5581_v48 = vpop.f32.mrb[136].mxu1  ;;  %v5661_v14 = vpop.f32.mrb[115].mxu0 }
 0x3ab   : > { %v5582_v41 = vpop.f32.mrb[137].mxu1  ;;  %v5662_v13 = vadd.f32 %v5661_v14, %v5660_v9  ;;  %v8255_v2 = vadd.f32 %v5659_v38, %v8205_v62 }
 0x3ac   : > { %v5583_v25 = vadd.f32 %v5582_v41, %v5581_v48  ;;  %v5584_v17 = vpop.f32.mrb[138].mxu1 }
 0x3ad   : > { %v5585_v52 = vpop.f32.mrb[139].mxu1  ;;  %v8261_v49 = vadd.f32 %v5662_v13, %v8208_v56 }
 0x3ae   : > { %v8258_v44 = vadd.f32 %v5583_v25, %v8142_v0  ;;  %v5586_v31 = vadd.f32 %v5585_v52, %v5584_v17 }
 0x3b0   : > { %v8264_v16 = vadd.f32 %v5586_v31, %v8144_v22 }
 0x3b2   : > { %v5587_v6 = vpop.f32.mrb[140].mxu1 }
 0x3b3   : > { %v5588_v43 = vpop.f32.mrb[141].mxu1 }
 0x3b4   : > { %v5589_v11 = vadd.f32 %v5588_v43, %v5587_v6  ;;  %v5590_v24 = vpop.f32.mrb[142].mxu1 }
 0x3b5   : > { %v5591_v15 = vpop.f32.mrb[143].mxu1 }
 0x3b6   : > { %v8267_v30 = vadd.f32 %v5589_v11, %v8152_v60  ;;  %v5592_v62 = vadd.f32 %v5591_v15, %v5590_v24  ;;  %v5663_v0 = vpop.f32.mrb[116].mxu0 }
 0x3b7   : > { %v5664_v3 = vpop.f32.mrb[117].mxu0 }
 0x3b8   : > { %v8270_v26 = vadd.f32 %v5592_v62, %v8157_v34  ;;  %v5665_v8 = vadd.f32 %v5664_v3, %v5663_v0  ;;  %v5666_v56 = vpop.f32.mrb[118].mxu0 }
 0x3b9   : > { %v5667_v36 = vpop.f32.mrb[119].mxu0 }
 0x3ba   : > { %v5819_v27 = vpop.f32.mrb[144].mxu1  ;;  %v5668_v53 = vadd.f32 %v5667_v36, %v5666_v56  ;;  %v8275_v60 = vadd.f32 %v5665_v8, %v8213_v42 }
 0x3bb   : > { %v4141_v22 = vadd.f32 %v5819_v27, %v8174_v45  ;;  %v4132_v35 = vpop.f32.mrb[145].mxu1 }
 0x3bc   : > { %v4133_v12 = vadd.f32 %v4132_v35, %v8168_v29  ;;  %v5820_v5 = vpop.f32.mrb[146].mxu1  ;;  %v8280_v58 = vadd.f32 %v5668_v53, %v8218_v51 }
 0x3bd   : > { %v4144_v20 = vadd.f32 %v5820_v5, %v8177_v63  ;;  %v4135_v34 = vpop.f32.mrb[147].mxu1  ;;  %v4261_v38 = vmax.f32 %v4141_v22, 0.0 }
 0x3be   : > { %v4136_v33 = vadd.f32 %v4135_v34, %v8170_v40  ;;  %v4259_v48 = vmax.f32 %v4133_v12, 0.0 }
 0x3bf   : > { %v4262_v9 = vmax.f32 %v4144_v20, 0.0 }
 0x3c0   : > { %v4260_v45 = vmax.f32 %v4136_v33, 0.0 }
 0x3c1   : > { %v4292_v14 = vpack.c.bf16 %v4262_v9, %v4261_v38 }
 0x3c2   : > { %v4291_v41 = vpack.c.bf16 %v4260_v45, %v4259_v48  ;;  %v5823_v13 = vpop.f32.mrb[148].mxu1 }
 0x3c3   : > { %v4157_v29 = vadd.f32 %v5823_v13, %v8188_v21  ;;  %v4148_v25 = vpop.f32.mrb[149].mxu1 }
 0x3c4   : > { %v4149_v42 = vadd.f32 %v4148_v25, %v8182_v32  ;;  %v5824_v17 = vpop.f32.mrb[150].mxu1  ;;  %5865 = vmatprep.mubr.bf16.mxu0 %v4291_v41 }
 0x3c5   : > { %v4160_v63 = vadd.f32 %v5824_v17, %v8191_v7  ;;  %v4151_v40 = vpop.f32.mrb[151].mxu1  ;;  %5866 = vmatmul.mubr.bf16.vlgmr.msra.gmra.mrb[144].mxu0 %v4292_v14  ;;  %v4265_v52 = vmax.f32 %v4157_v29, 0.0 }
 0x3c6   : > { %v4152_v51 = vadd.f32 %v4151_v40, %v8184_v54  ;;  %v4263_v6 = vmax.f32 %v4149_v42, 0.0  ;;  %v5669_v11 = vpop.f32.mrb[120].mxu0 }
 0x3c7   : > { %v4266_v31 = vmax.f32 %v4160_v63, 0.0  ;;  %v5670_v15 = vpop.f32.mrb[121].mxu0 }
 0x3c8   : > { %v4264_v43 = vmax.f32 %v4152_v51, 0.0  ;;  %v5671_v21 = vadd.f32 %v5670_v15, %v5669_v11  ;;  %v5672_v0 = vpop.f32.mrb[122].mxu0 }
 0x3c9   : > { %v4294_v24 = vpack.c.bf16 %v4266_v31, %v4265_v52  ;;  %v5673_v3 = vpop.f32.mrb[123].mxu0 }
 0x3ca   : > { %v4293_v62 = vpack.c.bf16 %v4264_v43, %v4263_v6  ;;  %v5674_v32 = vadd.f32 %v5673_v3, %v5672_v0  ;;  %v8287_v8 = vadd.f32 %v5671_v21, %v8221_v18 }
 0x3cc   : > { %5869 = vmatprep.mubr.bf16.mxu0 %v4293_v62  ;;  %v8290_v7 = vadd.f32 %v5674_v32, %v8224_v23 }
 0x3cd   : > { %5870 = vmatmul.mubr.bf16.gmra.mrb[148].mxu0 %v4294_v24 }
 0x3ce   : > { %v5827_v54 = vpop.f32.mrb[152].mxu1 }
 0x3cf   : > { %v4173_v56 = vadd.f32 %v5827_v54, %v8210_v50  ;;  %v4164_v27 = vpop.f32.mrb[153].mxu1 }
 0x3d0   : > { %v4165_v36 = vadd.f32 %v4164_v27, %v8200_v19  ;;  %v5828_v22 = vpop.f32.mrb[154].mxu1 }
 0x3d1   : > { %v4176_v35 = vadd.f32 %v5828_v22, %v8215_v59  ;;  %v4167_v53 = vpop.f32.mrb[155].mxu1  ;;  %v4269_v5 = vmax.f32 %v4173_v56, 0.0 }
 0x3d2   : > { %v4168_v12 = vadd.f32 %v4167_v53, %v8202_v28  ;;  %v4267_v18 = vmax.f32 %v4165_v36, 0.0 }
 0x3d3   : > { %v4270_v20 = vmax.f32 %v4176_v35, 0.0 }
 0x3d4   : > { %v4268_v34 = vmax.f32 %v4168_v12, 0.0 }
 0x3d5   : > { %v4296_v33 = vpack.c.bf16 %v4270_v20, %v4269_v5 }
 0x3d6   : > { %v4295_v38 = vpack.c.bf16 %v4268_v34, %v4267_v18  ;;  %v5675_v23 = vpop.f32.mrb[124].mxu0 }
 0x3d7   : > { %v5676_v9 = vpop.f32.mrb[125].mxu0 }
 0x3d8   : > { %v5677_v48 = vadd.f32 %v5676_v9, %v5675_v23  ;;  %v5678_v45 = vpop.f32.mrb[126].mxu0  ;;  %5873 = vmatprep.mubr.bf16.mxu0 %v4295_v38 }
 0x3d9   : > { %v5679_v50 = vpop.f32.mrb[127].mxu0  ;;  %5874 = vmatmul.mubr.bf16.gmra.mrb[152].mxu0 %v4296_v33 }
 0x3da   : > { %v5680_v19 = vadd.f32 %v5679_v50, %v5678_v45  ;;  %v4060_v14 = vadd.f32 %v5677_v48, %v8231_v46 }
 0x3dc   : > { %v4063_v59 = vadd.f32 %v5680_v19, %v8234_v55 }
 0x3de   : > { %v5831_v41 = vpop.f32.mrb[156].mxu1 }
 0x3df   : > { %v4189_v28 = vadd.f32 %v5831_v41, %v8240_v47  ;;  %v4180_v13 = vpop.f32.mrb[157].mxu1 }
 0x3e0   : > { %v4181_v29 = vadd.f32 %v4180_v13, %v8226_v39  ;;  %v5832_v25 = vpop.f32.mrb[158].mxu1 }
 0x3e1   : > { %v4192_v42 = vadd.f32 %v5832_v25, %v8246_v1  ;;  %v4183_v17 = vpop.f32.mrb[159].mxu1  ;;  %v4273_v40 = vmax.f32 %v4189_v28, 0.0 }
 0x3e2   : > { %v4184_v63 = vadd.f32 %v4183_v17, %v8228_v57  ;;  %v4271_v52 = vmax.f32 %v4181_v29, 0.0 }
 0x3e3   : > { %v4274_v51 = vmax.f32 %v4192_v42, 0.0 }
 0x3e4   : > { %v4272_v31 = vmax.f32 %v4184_v63, 0.0 }
 0x3e5   : > { %v4298_v6 = vpack.c.bf16 %v4274_v51, %v4273_v40 }
 0x3e6   : > { %v4297_v46 = vpack.c.bf16 %v4272_v31, %v4271_v52  ;;  %v5681_v43 = vpop.f32.mrb[128].mxu0 }
 0x3e7   : > { %v5682_v55 = vpop.f32.mrb[129].mxu0 }
 0x3e8   : > { %v5683_v11 = vadd.f32 %v5682_v55, %v5681_v43  ;;  %v5684_v24 = vpop.f32.mrb[130].mxu0  ;;  %5877 = vmatprep.mubr.bf16.mxu0 %v4297_v46 }
 0x3e9   : > { %v5685_v47 = vpop.f32.mrb[131].mxu0  ;;  %5878 = vmatmul.mubr.bf16.gmra.mrb[156].mxu0 %v4298_v6 }
 0x3ea   : > { %v5686_v39 = vadd.f32 %v5685_v47, %v5684_v24  ;;  %v4068_v15 = vadd.f32 %v5683_v11, %v8237_v4 }
 0x3ec   : > { %v4071_v1 = vadd.f32 %v5686_v39, %v8243_v61 }
 0x3ee   : > { %v5835_v62 = vpop.f32.mrb[160].mxu1 }
 0x3ef   : > { %v4205_v57 = vadd.f32 %v5835_v62, %v8275_v60  ;;  %v4196_v21 = vpop.f32.mrb[161].mxu1 }
 0x3f0   : > { %v4197_v0 = vadd.f32 %v4196_v21, %v8255_v2  ;;  %v5836_v3 = vpop.f32.mrb[162].mxu1 }
 0x3f1   : > { %v4208_v32 = vadd.f32 %v5836_v3, %v8280_v58  ;;  %v4199_v54 = vpop.f32.mrb[163].mxu1  ;;  %v4277_v27 = vmax.f32 %v4205_v57, 0.0 }
 0x3f2   : > { %v4200_v56 = vadd.f32 %v4199_v54, %v8261_v49  ;;  %v4275_v22 = vmax.f32 %v4197_v0, 0.0 }
 0x3f3   : > { %v4278_v36 = vmax.f32 %v4208_v32, 0.0 }
 0x3f4   : > { %v4276_v35 = vmax.f32 %v4200_v56, 0.0 }
 0x3f5   : > { %v4300_v53 = vpack.c.bf16 %v4278_v36, %v4277_v27 }
 0x3f6   : > { %v4299_v4 = vpack.c.bf16 %v4276_v35, %v4275_v22  ;;  %v5687_v12 = vpop.f32.mrb[132].mxu0 }
 0x3f7   : > { %v5688_v61 = vpop.f32.mrb[133].mxu0 }
 0x3f8   : > { %v5689_v5 = vadd.f32 %v5688_v61, %v5687_v12  ;;  %v5690_v20 = vpop.f32.mrb[134].mxu0  ;;  %5881 = vmatprep.mubr.bf16.mxu0 %v4299_v4 }
 0x3f9   : > { %v5691_v60 = vpop.f32.mrb[135].mxu0  ;;  %5882 = vmatmul.mubr.bf16.gmra.mrb[160].mxu0 %v4300_v53 }
 0x3fa   : > { %v5692_v2 = vadd.f32 %v5691_v60, %v5690_v20  ;;  %v4076_v18 = vadd.f32 %v5689_v5, %v8249_v37 }
 0x3fc   : > { %v4079_v58 = vadd.f32 %v5692_v2, %v8252_v10  ;;  %v6153_v2 = vld [vmem:[%s6753_s29] sm:$0xff]  }
 0x3fe   : > { %v5839_v34 = vpop.f32.mrb[164].mxu1 }
 0x3ff   : > { %v4221_v49 = vadd.f32 %v5839_v34, %v4060_v14  ;;  %v4212_v33 = vpop.f32.mrb[165].mxu1 }
 0x400   : > { %v4213_v38 = vadd.f32 %v4212_v33, %v8287_v8  ;;  %v5840_v23 = vpop.f32.mrb[166].mxu1 }
 0x401   : > { %v4224_v9 = vadd.f32 %v5840_v23, %v4063_v59  ;;  %v4215_v48 = vpop.f32.mrb[167].mxu1  ;;  %v4281_v50 = vmax.f32 %v4221_v49, 0.0 }
 0x402   : > { %v4216_v45 = vadd.f32 %v4215_v48, %v8290_v7  ;;  %v4279_v41 = vmax.f32 %v4213_v38, 0.0  ;;  %v4324_v38 = vunpack.c.h.bf16 %v6153_v2 }
 0x403   : > { %v4282_v19 = vmax.f32 %v4224_v9, 0.0 }
 0x404   : > { %v4280_v28 = vmax.f32 %v4216_v45, 0.0 }
 0x405   : > { %v4302_v13 = vpack.c.bf16 %v4282_v19, %v4281_v50 }
 0x406   : > { %v4301_v29 = vpack.c.bf16 %v4280_v28, %v4279_v41  ;;  %v5693_v25 = vpop.f32.mrb[136].mxu0 }
 0x407   : > { %v5694_v37 = vpop.f32.mrb[137].mxu0 }
 0x408   : > { %v5695_v42 = vadd.f32 %v5694_v37, %v5693_v25  ;;  %v5696_v10 = vpop.f32.mrb[138].mxu0  ;;  %5885 = vmatprep.mubr.bf16.mxu0 %v4301_v29  ;;  %v6154_v37 = vld [vmem:[%s6753_s29 + $0x18] sm:$0xff]  }
 0x409   : > { %v5697_v14 = vpop.f32.mrb[139].mxu0  ;;  %5886 = vmatmul.mubr.bf16.gmra.mrb[164].mxu0 %v4302_v13 }
 0x40a   : > { %v5698_v17 = vadd.f32 %v5697_v14, %v5696_v10  ;;  %v4084_v8 = vadd.f32 %v5695_v42, %v8258_v44  ;;  %v4329_v42 = vunpack.c.l.bf16 %v6154_v37 }
 0x40c   : > { %v4087_v59 = vadd.f32 %v5698_v17, %v8264_v16 }
 0x40e   : > { %v5843_v63 = vpop.f32.mrb[168].mxu1 }
 0x40f   : > { %v4237_v7 = vadd.f32 %v5843_v63, %v4076_v18  ;;  %v4228_v40 = vpop.f32.mrb[169].mxu1  ;;  %v4323_v18 = vunpack.c.l.bf16 %v6153_v2 }
 0x410   : > { %v4229_v51 = vadd.f32 %v4228_v40, %v4068_v15  ;;  %v5844_v52 = vpop.f32.mrb[170].mxu1 }
 0x411   : > { %v4240_v31 = vadd.f32 %v5844_v52, %v4079_v58  ;;  %v4231_v6 = vpop.f32.mrb[171].mxu1  ;;  %v4285_v43 = vmax.f32 %v4237_v7, 0.0 }
 0x412   : > { %v4232_v46 = vadd.f32 %v4231_v6, %v4071_v1  ;;  %v4283_v11 = vmax.f32 %v4229_v51, 0.0  ;;  %v4330_v51 = vunpack.c.h.bf16 %v6154_v37 }
 0x413   : > { %v4286_v55 = vmax.f32 %v4240_v31, 0.0 }
 0x414   : > { %v4284_v24 = vmax.f32 %v4232_v46, 0.0 }
 0x415   : > { %v4304_v47 = vpack.c.bf16 %v4286_v55, %v4285_v43 }
 0x416   : > { %v4303_v39 = vpack.c.bf16 %v4284_v24, %v4283_v11 }
 0x417   : > { %v5699_v62 = vpop.f32.mrb[140].mxu0 }
 0x418   : > { %v5700_v57 = vpop.f32.mrb[141].mxu0  ;;  %5889 = vmatprep.mubr.bf16.mxu0 %v4303_v39 }
 0x419   : > { %v5701_v21 = vadd.f32 %v5700_v57, %v5699_v62  ;;  %v5702_v44 = vpop.f32.mrb[142].mxu0  ;;  %5890 = vmatmul.mubr.bf16.gmra.mrb[168].mxu0 %v4304_v47 }
 0x41a   : > { %v5703_v16 = vpop.f32.mrb[143].mxu0 }
 0x41b   : > { %v5704_v0 = vadd.f32 %v5703_v16, %v5702_v44  ;;  %v4092_v15 = vadd.f32 %v5701_v21, %v8267_v30  ;;  %v8316_v30 = vld [vmem:[#allocation13] ss:$0 sm:$0xff] }
 0x41d   : > { %v4095_v3 = vadd.f32 %v5704_v0, %v8270_v26  ;;  %v6152_v26 = vld [vmem:[%s6753_s29 + $0x8] sm:$0xff]  }
 0x41e   : > { %v4325_v60 = vunpack.c.l.bf16 %v6152_v26  ;;  %v4326_v33 = vunpack.c.h.bf16 %v6152_v26 }
 0x41f   : > { %v5847_v32 = vpop.f32.mrb[172].mxu1 }
 0x420   : > { %v4253_v1 = vadd.f32 %v5847_v32, %v4092_v15  ;;  %v4244_v54 = vpop.f32.mrb[173].mxu1 }
 0x421   : > { %v4245_v56 = vadd.f32 %v4244_v54, %v4084_v8  ;;  %v5848_v27 = vpop.f32.mrb[174].mxu1  ;;  %v6155_v8 = vld [vmem:[%s6753_s29 + $0x10] sm:$0xff]   ;;  %v6157_v54 = vld [vmem:[%s6753_s29 + $0x20] sm:$0xff]  }
 0x422   : > { %v4256_v36 = vadd.f32 %v5848_v27, %v4095_v3  ;;  %v4247_v22 = vpop.f32.mrb[175].mxu1  ;;  %v4289_v53 = vmax.f32 %v4253_v1, 0.0  ;;  %v4328_v46 = vunpack.c.h.bf16 %v6155_v8  ;;  %v6156_v3 = vld [vmem:[%s6753_s29 + $0x28] sm:$0xff]  }
 0x423   : > { %v4248_v35 = vadd.f32 %v4247_v22, %v4087_v59  ;;  %v4287_v12 = vmax.f32 %v4245_v56, 0.0  ;;  %v4327_v59 = vunpack.c.l.bf16 %v6155_v8  ;;  %v4333_v32 = vunpack.c.l.bf16 %v6156_v3 }
 0x424   : > { %v4290_v4 = vmax.f32 %v4256_v36, 0.0  ;;  %v4331_v56 = vunpack.c.l.bf16 %v6157_v54  ;;  %v4334_v22 = vunpack.c.h.bf16 %v6156_v3 }
 0x425   : > { %v4288_v61 = vmax.f32 %v4248_v35, 0.0 }
 0x426   : > { %v4306_v5 = vpack.c.bf16 %v4290_v4, %v4289_v53  ;;  %v4332_v4 = vunpack.c.h.bf16 %v6157_v54 }
 0x427   : > { %v4305_v20 = vpack.c.bf16 %v4288_v61, %v4287_v12 }
 0x429   : > { %5893 = vmatprep.mubr.bf16.mxu0 %v4305_v20 }
 0x42a   : > { %5894 = vmatmul.mubr.bf16.gmra.mrb[172].mxu0 %v4306_v5 }
 0x498   : > { %v5867_v58 = vpop.f32.mrb[144].mxu0 }
 0x499   : > { %v4453_v34 = vadd.f32 %v5867_v58, %v8316_v30  ;;  %v4444_v49 = vpop.f32.mrb[145].mxu0 }
 0x49a   : > { %v4445_v23 = vadd.f32 %v8316_v30, %v4444_v49  ;;  %v5868_v9 = vpop.f32.mrb[146].mxu0 }
 0x49b   : > { %v4573_v48 = vadd.f32 %v4453_v34, %v4325_v60  ;;  %v4456_v45 = vadd.f32 %v5868_v9, %v8316_v30  ;;  %v4447_v50 = vpop.f32.mrb[147].mxu0 }
 0x49c   : > { %v4571_v19 = vadd.f32 %v4445_v23, %v4323_v18  ;;  %v4448_v41 = vadd.f32 %v8316_v30, %v4447_v50  ;;  %v6158_v23 = vld [vmem:[%s6753_s29 + $0x38] sm:$0xff]  }
 0x49d   : > { %v4574_v28 = vadd.f32 %v4456_v45, %v4326_v33  ;;  %v4605_v29 = vmax.f32 %v4573_v48, 0.0  ;;  %v4337_v9 = vunpack.c.l.bf16 %v6158_v23  ;;  %v6159_v45 = vld [vmem:[%s6753_s29 + $0x30] sm:$0xff]  }
 0x49e   : > { %v4572_v13 = vadd.f32 %v4448_v41, %v4324_v38  ;;  %v4603_v10 = vmax.f32 %v4571_v19, 0.0  ;;  %v4335_v50 = vunpack.c.l.bf16 %v6159_v45 }
 0x49f   : > { %v4606_v25 = vmax.f32 %v4574_v28, 0.0  ;;  %v4338_v28 = vunpack.c.h.bf16 %v6158_v23 }
 0x4a0   : > { %v4604_v14 = vmax.f32 %v4572_v13, 0.0  ;;  %v5871_v17 = vpop.f32.mrb[148].mxu0 }
 0x4a1   : > { %v5146_v63 = vpack.c.bf16 %v4606_v25, %v4605_v29  ;;  %v4469_v7 = vadd.f32 %v5871_v17, %v8316_v30  ;;  %v4460_v40 = vpop.f32.mrb[149].mxu0  ;;  %v4336_v25 = vunpack.c.h.bf16 %v6159_v45 }
 0x4a2   : > { %v5141_v52 = vpack.c.bf16 %v4604_v14, %v4603_v10  ;;  %v4461_v31 = vadd.f32 %v8316_v30, %v4460_v40  ;;  %v5872_v6 = vpop.f32.mrb[150].mxu0 }
 0x4a3   : > { %5218 = vst [vmem:[%s8331_s21 + $0x8] sm:$0xff] %v5146_v63   ;;  %v4577_v43 = vadd.f32 %v4469_v7, %v4329_v42  ;;  %v4472_v55 = vadd.f32 %v5872_v6, %v8316_v30  ;;  %v4463_v11 = vpop.f32.mrb[151].mxu0  ;;  %v6160_v6 = vld [vmem:[%s6753_s29 + $0x48] sm:$0xff]  }
 0x4a4   : > { %5142 = vst [vmem:[%s8331_s21] sm:$0xff] %v5141_v52   ;;  %v4575_v24 = vadd.f32 %v4461_v31, %v4327_v59  ;;  %v4464_v47 = vadd.f32 %v8316_v30, %v4463_v11 }
 0x4a5   : > { %v4578_v39 = vadd.f32 %v4472_v55, %v4330_v51  ;;  %v4609_v57 = vmax.f32 %v4577_v43, 0.0  ;;  %v6161_v43 = vld [vmem:[%s6753_s29 + $0x40] sm:$0xff]  }
 0x4a6   : > { %v4576_v62 = vadd.f32 %v4464_v47, %v4328_v46  ;;  %v4607_v44 = vmax.f32 %v4575_v24, 0.0  ;;  %v4341_v46 = vunpack.c.l.bf16 %v6160_v6  ;;  %v4339_v55 = vunpack.c.l.bf16 %v6161_v43 }
 0x4a7   : > { %v4610_v21 = vmax.f32 %v4578_v39, 0.0  ;;  %v4342_v39 = vunpack.c.h.bf16 %v6160_v6 }
 0x4a8   : > { %v4608_v16 = vmax.f32 %v4576_v62, 0.0  ;;  %v4340_v62 = vunpack.c.h.bf16 %v6161_v43 }
 0x4a9   : > { %v5156_v0 = vpack.c.bf16 %v4610_v21, %v4609_v57 }
 0x4aa   : > { %v5151_v15 = vpack.c.bf16 %v4608_v16, %v4607_v44 }
 0x4ab   : > { %5220 = vst [vmem:[%s8331_s21 + $0x18] sm:$0xff] %v5156_v0  }
 0x4ac   : > { %5219 = vst [vmem:[%s8331_s21 + $0x10] sm:$0xff] %v5151_v15   ;;  %v5875_v1 = vpop.f32.mrb[152].mxu0 }
 0x4ad   : > { %v4485_v27 = vadd.f32 %v5875_v1, %v8316_v30  ;;  %v4476_v36 = vpop.f32.mrb[153].mxu0 }
 0x4ae   : > { %v4477_v35 = vadd.f32 %v8316_v30, %v4476_v36  ;;  %v5876_v53 = vpop.f32.mrb[154].mxu0 }
 0x4af   : > { %v4581_v12 = vadd.f32 %v4485_v27, %v4333_v32  ;;  %v4488_v61 = vadd.f32 %v5876_v53, %v8316_v30  ;;  %v4479_v5 = vpop.f32.mrb[155].mxu0  ;;  %v6162_v53 = vld [vmem:[%s6753_s29 + $0x58] sm:$0xff]  }
 0x4b0   : > { %v4579_v20 = vadd.f32 %v4477_v35, %v4331_v56  ;;  %v4480_v26 = vadd.f32 %v8316_v30, %v4479_v5 }
 0x4b1   : > { %v4582_v60 = vadd.f32 %v4488_v61, %v4334_v22  ;;  %v4613_v18 = vmax.f32 %v4581_v12, 0.0  ;;  %v6163_v61 = vld [vmem:[%s6753_s29 + $0x50] sm:$0xff]  }
 0x4b2   : > { %v4580_v2 = vadd.f32 %v4480_v26, %v4332_v4  ;;  %v4611_v34 = vmax.f32 %v4579_v20, 0.0  ;;  %v4345_v4 = vunpack.c.l.bf16 %v6162_v53  ;;  %v4343_v5 = vunpack.c.l.bf16 %v6163_v61 }
 0x4b3   : > { %v4614_v58 = vmax.f32 %v4582_v60, 0.0  ;;  %v4346_v60 = vunpack.c.h.bf16 %v6162_v53 }
 0x4b4   : > { %v4612_v49 = vmax.f32 %v4580_v2, 0.0 }
 0x4b5   : > { %v5166_v33 = vpack.c.bf16 %v4614_v58, %v4613_v18  ;;  %v4344_v58 = vunpack.c.h.bf16 %v6163_v61 }
 0x4b6   : > { %v5161_v38 = vpack.c.bf16 %v4612_v49, %v4611_v34 }
 0x4b7   : > { %5222 = vst [vmem:[%s8331_s21 + $0x28] sm:$0xff] %v5166_v33  }
 0x4b8   : > { %5221 = vst [vmem:[%s8331_s21 + $0x20] sm:$0xff] %v5161_v38  }
 0x4bc   : > { %v5879_v48 = vpop.f32.mrb[156].mxu0 }
 0x4bd   : > { %v4501_v19 = vadd.f32 %v5879_v48, %v8316_v30  ;;  %v4492_v41 = vpop.f32.mrb[157].mxu0 }
 0x4be   : > { %v4493_v13 = vadd.f32 %v8316_v30, %v4492_v41  ;;  %v5880_v29 = vpop.f32.mrb[158].mxu0 }
 0x4bf   : > { %v4585_v37 = vadd.f32 %v4501_v19, %v4337_v9  ;;  %v4504_v42 = vadd.f32 %v5880_v29, %v8316_v30  ;;  %v4495_v10 = vpop.f32.mrb[159].mxu0  ;;  %v6164_v29 = vld [vmem:[%s6753_s29 + $0x68] sm:$0xff]  }
 0x4c0   : > { %v4583_v14 = vadd.f32 %v4493_v13, %v4335_v50  ;;  %v4496_v17 = vadd.f32 %v8316_v30, %v4495_v10 }
 0x4c1   : > { %v4586_v8 = vadd.f32 %v4504_v42, %v4338_v28  ;;  %v4617_v63 = vmax.f32 %v4585_v37, 0.0  ;;  %v6165_v42 = vld [vmem:[%s6753_s29 + $0x60] sm:$0xff]  }
 0x4c2   : > { %v4584_v59 = vadd.f32 %v4496_v17, %v4336_v25  ;;  %v4615_v40 = vmax.f32 %v4583_v14, 0.0  ;;  %v4349_v25 = vunpack.c.l.bf16 %v6164_v29  ;;  %v4347_v10 = vunpack.c.l.bf16 %v6165_v42 }
 0x4c3   : > { %v4618_v7 = vmax.f32 %v4586_v8, 0.0  ;;  %v4350_v8 = vunpack.c.h.bf16 %v6164_v29 }
 0x4c4   : > { %v4616_v51 = vmax.f32 %v4584_v59, 0.0 }
 0x4c5   : > { %v5176_v52 = vpack.c.bf16 %v4618_v7, %v4617_v63  ;;  %v4348_v7 = vunpack.c.h.bf16 %v6165_v42 }
 0x4c6   : > { %v5171_v31 = vpack.c.bf16 %v4616_v51, %v4615_v40 }
 0x4c7   : > { %5224 = vst [vmem:[%s8331_s21 + $0x38] sm:$0xff] %v5176_v52  }
 0x4c8   : > { %5223 = vst [vmem:[%s8331_s21 + $0x30] sm:$0xff] %v5171_v31  }
 0x4cc   : > { %v5883_v11 = vpop.f32.mrb[160].mxu0 }
 0x4cd   : > { %v4517_v24 = vadd.f32 %v5883_v11, %v8316_v30  ;;  %v4508_v47 = vpop.f32.mrb[161].mxu0 }
 0x4ce   : > { %v4509_v57 = vadd.f32 %v8316_v30, %v4508_v47  ;;  %v5884_v21 = vpop.f32.mrb[162].mxu0 }
 0x4cf   : > { %v4589_v44 = vadd.f32 %v4517_v24, %v4341_v46  ;;  %v4520_v16 = vadd.f32 %v5884_v21, %v8316_v30  ;;  %v4511_v0 = vpop.f32.mrb[163].mxu0 }
 0x4d0   : > { %v4587_v15 = vadd.f32 %v4509_v57, %v4339_v55  ;;  %v4512_v3 = vadd.f32 %v8316_v30, %v4511_v0  ;;  %v6166_v57 = vld [vmem:[%s6753_s29 + $0x78] sm:$0xff]  }
 0x4d1   : > { %v4590_v32 = vadd.f32 %v4520_v16, %v4342_v39  ;;  %v4621_v54 = vmax.f32 %v4589_v44, 0.0  ;;  %v4353_v21 = vunpack.c.l.bf16 %v6166_v57  ;;  %v6167_v16 = vld [vmem:[%s6753_s29 + $0x70] sm:$0xff]  }
 0x4d2   : > { %v4588_v1 = vadd.f32 %v4512_v3, %v4340_v62  ;;  %v4619_v27 = vmax.f32 %v4587_v15, 0.0  ;;  %v4351_v0 = vunpack.c.l.bf16 %v6167_v16 }
 0x4d3   : > { %v4622_v56 = vmax.f32 %v4590_v32, 0.0  ;;  %v4354_v32 = vunpack.c.h.bf16 %v6166_v57 }
 0x4d4   : > { %v4620_v36 = vmax.f32 %v4588_v1, 0.0 }
 0x4d5   : > { %v5186_v22 = vpack.c.bf16 %v4622_v56, %v4621_v54  ;;  %v4352_v56 = vunpack.c.h.bf16 %v6167_v16 }
 0x4d6   : > { %v5181_v35 = vpack.c.bf16 %v4620_v36, %v4619_v27 }
 0x4d7   : > { %5226 = vst [vmem:[%s8331_s21 + $0x48] sm:$0xff] %v5186_v22  }
 0x4d8   : > { %5225 = vst [vmem:[%s8331_s21 + $0x40] sm:$0xff] %v5181_v35  }
 0x4dc   : > { %v5887_v12 = vpop.f32.mrb[164].mxu0 }
 0x4dd   : > { %v4533_v20 = vadd.f32 %v5887_v12, %v8316_v30  ;;  %v4524_v26 = vpop.f32.mrb[165].mxu0 }
 0x4de   : > { %v4525_v2 = vadd.f32 %v8316_v30, %v4524_v26  ;;  %v5888_v18 = vpop.f32.mrb[166].mxu0 }
 0x4df   : > { %v4593_v34 = vadd.f32 %v4533_v20, %v4345_v4  ;;  %v4536_v49 = vadd.f32 %v5888_v18, %v8316_v30  ;;  %v4527_v33 = vpop.f32.mrb[167].mxu0 }
 0x4e0   : > { %v4591_v38 = vadd.f32 %v4525_v2, %v4343_v5  ;;  %v4528_v23 = vadd.f32 %v8316_v30, %v4527_v33 }
 0x4e1   : > { %v4594_v9 = vadd.f32 %v4536_v49, %v4346_v60  ;;  %v4625_v45 = vmax.f32 %v4593_v34, 0.0 }
 0x4e2   : > { %v4592_v48 = vadd.f32 %v4528_v23, %v4344_v58  ;;  %v4623_v19 = vmax.f32 %v4591_v38, 0.0 }
 0x4e3   : > { %v4626_v50 = vmax.f32 %v4594_v9, 0.0 }
 0x4e4   : > { %v4624_v41 = vmax.f32 %v4592_v48, 0.0 }
 0x4e5   : > { %v5196_v28 = vpack.c.bf16 %v4626_v50, %v4625_v45 }
 0x4e6   : > { %v5191_v13 = vpack.c.bf16 %v4624_v41, %v4623_v19 }
 0x4e7   : > { %5228 = vst [vmem:[%s8331_s21 + $0x58] sm:$0xff] %v5196_v28  }
 0x4e8   : > { %5227 = vst [vmem:[%s8331_s21 + $0x50] sm:$0xff] %v5191_v13  }
 0x4ec   : > { %v5891_v37 = vpop.f32.mrb[168].mxu0 }
 0x4ed   : > { %v4549_v14 = vadd.f32 %v5891_v37, %v8316_v30  ;;  %v4540_v17 = vpop.f32.mrb[169].mxu0 }
 0x4ee   : > { %v4541_v59 = vadd.f32 %v8316_v30, %v4540_v17  ;;  %v5892_v63 = vpop.f32.mrb[170].mxu0 }
 0x4ef   : > { %v4597_v40 = vadd.f32 %v4549_v14, %v4349_v25  ;;  %v4552_v51 = vadd.f32 %v5892_v63, %v8316_v30  ;;  %v4543_v52 = vpop.f32.mrb[171].mxu0 }
 0x4f0   : > { %v4595_v31 = vadd.f32 %v4541_v59, %v4347_v10  ;;  %v4544_v6 = vadd.f32 %v8316_v30, %v4543_v52 }
 0x4f1   : > { %v4598_v46 = vadd.f32 %v4552_v51, %v4350_v8  ;;  %v4629_v55 = vmax.f32 %v4597_v40, 0.0 }
 0x4f2   : > { %v4596_v43 = vadd.f32 %v4544_v6, %v4348_v7  ;;  %v4627_v24 = vmax.f32 %v4595_v31, 0.0 }
 0x4f3   : > { %v4630_v11 = vmax.f32 %v4598_v46, 0.0 }
 0x4f4   : > { %v4628_v47 = vmax.f32 %v4596_v43, 0.0 }
 0x4f5   : > { %v5206_v39 = vpack.c.bf16 %v4630_v11, %v4629_v55 }
 0x4f6   : > { %v5201_v62 = vpack.c.bf16 %v4628_v47, %v4627_v24 }
 0x4f7   : > { %5230 = vst [vmem:[%s8331_s21 + $0x68] sm:$0xff] %v5206_v39  }
 0x4f8   : > { %5229 = vst [vmem:[%s8331_s21 + $0x60] sm:$0xff] %v5201_v62  }
 0x4fd   : > { %v5895_v44 = vpop.f32.mrb[172].mxu0 }
 0x4fe   : > { %v4565_v15 = vadd.f32 %v5895_v44, %v8316_v30  ;;  %v4556_v3 = vpop.f32.mrb[173].mxu0 }
 0x4ff   : > { %v4557_v1 = vadd.f32 %v8316_v30, %v4556_v3  ;;  %v5896_v54 = vpop.f32.mrb[174].mxu0 }
 0x500   : > { %v4601_v27 = vadd.f32 %v4565_v15, %v4353_v21  ;;  %v4568_v36 = vadd.f32 %v5896_v54, %v8316_v30  ;;  %v4559_v22 = vpop.f32.mrb[175].mxu0 }
 0x501   : > { %v4599_v35 = vadd.f32 %v4557_v1, %v4351_v0  ;;  %v4560_v53 = vadd.f32 %v8316_v30, %v4559_v22 }
 0x502   : > { %v4602_v4 = vadd.f32 %v4568_v36, %v4354_v32  ;;  %v4633_v61 = vmax.f32 %v4601_v27, 0.0 }
 0x503   : > { %v4600_v12 = vadd.f32 %v4560_v53, %v4352_v56  ;;  %v4631_v20 = vmax.f32 %v4599_v35, 0.0 }
 0x504   : > { %v4634_v5 = vmax.f32 %v4602_v4, 0.0 }
 0x505   : > { %v4632_v26 = vmax.f32 %v4600_v12, 0.0 }
 0x506   : > { %v5216_v60 = vpack.c.bf16 %v4634_v5, %v4633_v61 }
 0x507   : > { %v5211_v30 = vpack.c.bf16 %v4632_v26, %v4631_v20 }
 0x508   : > { %5232 = vst [vmem:[%s8331_s21 + $0x78] sm:$0xff] %v5216_v60  }
 0x509   : > { %5231 = vst [vmem:[%s8331_s21 + $0x70] sm:$0xff] %v5211_v30  }
 0x50a   : > { %6377 = shalt.err (!%p6374_p2)
}
 0x50b   : > { %s6378_s17 = scalar_lea.hbm %s8390_s22, 2048  ;;  %s6382_s10 = scalar_lea.hbm %s8447_s8, 4096 }
 0x50c   : > { %p6379_p3 = scmp.ne.s32.totalorder %s8390_s22, %s6378_s17  ;;  %p6383_p7 = scmp.lt.u32.totalorder %s8390_s22, %s8447_s8 }
 0x50d   : > { %p6384_p8 = scmp.lt.u32.totalorder %s6382_s10, %s6378_s17  ;;  %p6386_p13 = scmp.lt.u32.totalorder %s6378_s17, %s8390_s22 }
 0x50e   : > { %p6380_p4 = pnand %p6379_p3, %p8919_p1 }
 0x50f   : > { %p6385_p11 = por %p6384_p8, %p6383_p7 }
 0x510   : > { %p6381_p12 = pneg %p6380_p4 }
 0x511   : > { %p6387_p6 = por %p6386_p13, %p6385_p11 }
 0x513   : > { %p6388_p9 = pnand %p6387_p6, %p6381_p12 }
 0x515   : > { %6391 = shalt.err (!%p6388_p9)
}
 0x516   : > { %s6457_s12 = smov 64   ;;  %s6458_s21 = smov 4  }
 0x517   : > { %5941 = dma.vmem_to_hbm [thread:$0]  (%p8919_p1), %s8392_s25, 2048, %s8390_s22, %s8398_s9, %s6457_s12, %s6457_s12, %s6458_s21  }
 0x518 PF: > { %s8920_s23 = sld [smem:[#allocation23_spill]]  ;;  %p5983_p5 = scmp.ge.s32.totalorder %s6442_s30, 2 }
 0x519   : > { %s4824_s19 = sand.u32 1, %s6430_s27  }
 0x51a   : > { %s4825_s24 = scalar_lea.sflag [#allocation4], %s4824_s19 }
 0x51e   : > { %p8921_p10 = scmp.ne.s32.totalorder %s8920_s23, 0 }
 0x520   : > { %p5966_p0 = pnand %p5983_p5, %p8921_p10 }
 0x522   : > { %6425 = dma.done.wait (!%p5966_p0), %s4825_s24, 2048  }
 0x523   : > { %6427 = vsyncadd (!%p5966_p0), %s4825_s24, 4294965248  ;;  %s8922_s30 = sld [smem:[#allocation21_spill]]  ;;  %s8923_s13 = sld [smem:[#allocation20_spill]] }
 0x524   : > { %s8924_s29 = sld [smem:[#allocation22_spill]]  ;;  %s8925_s27 = smov %s6434_s28 }
 0x529   : > { %p22_p2 = scmp.ge.s32.totalorder %s8922_s30, 4   ;;  %s8926_s28 = smov %s8923_s13 }
 0x52b   :  { %24 = sbr.rel (!%p22_p2) target bundleno = 7 (0x7), region = 123 }
 0x532   :  { %4830 = vsyncpa [#allocation3], 1 }
 0x533   :  { %4832 = vsyncpa [#allocation3 + $0x1], 1 }
 0x534   :  { %4833 = vsyncpa [#allocation6], 1 }
 0x535   :  { %4834 = vsyncpa [#allocation9], 1 }
 0x536   :  { %4835 = vsyncpa [#allocation12], 1 }
 0x537   :  { %4836 = vsyncpa [#allocation4], 1 }
 0x538   :  { %4838 = vsyncpa [#allocation4 + $0x1], 1 }

</bundles_post_ra>
